<compile_context>
chip_gen: v5e
topology: v5e:2x2
jax: 0.10.0
libtpu: 0.0.40
codegen_flags: <defaults>
</compile_context>

<pallas_src>
import jax
import jax.numpy as jnp
from jax.experimental import pallas as pl
from jax.experimental.pallas import tpu as pltpu


# 3x3 tap offsets, row-major order matching the flattened (3, 3) kernel.
_TAPS = tuple((dy, dx) for dy in (-1, 0, 1) for dx in (-1, 0, 1))
_CENTER = 4  # index of (0, 0) in _TAPS


def _round_up(x, m):
    return (x + m - 1) // m * m


def _make_tap_masks(H, W):
    """(9, H*W) f32 validity masks: 1.0 where the shifted tap reads a real
    pixel of the same image, 0.0 where the 3x3 window falls into the conv's
    zero padding (this also covers every wrapped position of a roll)."""
    HW = H * W
    idx = jnp.arange(HW, dtype=jnp.int32)
    row = idx // W
    col = idx % W
    masks = []
    for dy, dx in _TAPS:
        m = jnp.ones((HW,), dtype=bool)
        if dy == -1:
            m = m & (row > 0)
        elif dy == 1:
            m = m & (row < H - 1)
        if dx == -1:
            m = m & (col > 0)
        elif dx == 1:
            m = m & (col < W - 1)
        masks.append(m)
    return jnp.stack(masks).astype(jnp.float32)


def _build_dw_planes(params, H, W, n_rep, cpad):
    """Mask-folded depthwise weight planes: (L, 9, cpad, n_rep*H*W) f32.

    plane[l, t, c, :] = tap_mask[t] * dw[l][c, t], zero-padded on the channel
    axis to cpad and tiled n_rep times along lanes (batch folded into lanes).
    """
    HW = H * W
    masks = _make_tap_masks(H, W)                        # (9, HW)
    planes = []
    for dw, _db, _pw, _pb in params:
        cin = dw.shape[0]
        dwf = dw.reshape(cin, 9).astype(jnp.float32)     # (cin, 9)
        p = dwf.T[:, :, None] * masks[:, None, :]        # (9, cin, HW)
        p = jnp.pad(p, ((0, 0), (0, cpad - cin), (0, 0)))
        if n_rep > 1:
            p = jnp.tile(p, (1, 1, n_rep))               # (9, cpad, n_rep*HW)
        planes.append(p)
    return jnp.stack(planes)                             # (L, 9, cpad, lanes)


def _build_pwpb_slab(params, cpad):
    """One lane-padded slab (L, cpad, 128): cols [0:cpad] = zero-padded pw,
    col cpad = fused bias pb + pw @ db (exact fold of the depthwise bias)."""
    assert cpad + 1 <= 128
    rows = []
    for _dw, db, pw, pb in params:
        cout, cin = pw.shape
        fused_b = (pb + pw @ db).astype(jnp.float32)     # (cout,)
        m = jnp.zeros((cpad, 128), jnp.float32)
        m = m.at[:cout, :cin].set(pw.astype(jnp.float32))
        m = m.at[:cout, cpad].set(fused_b)
        rows.append(m)
    return jnp.stack(rows)                               # (L, cpad, 128)


def _make_kernel(layer_dims, W, lanes, cpad, cout_final):
    """Fused kernel: all layers of (depthwise 3x3 s1 p1 + pointwise 1x1)."""

    def kernel(x_ref, dwp_ref, pwpb_ref, o_ref):
        x = x_ref[...].astype(jnp.float32)               # (cpad, lanes)
        for l, (cin, cout) in enumerate(layer_dims):
            # --- depthwise 3x3: 9 rolled multiply-accumulates (VPU + XLU) ---
            acc = x * dwp_ref[l, _CENTER]                # center tap: no roll
            for t, (dy, dx) in enumerate(_TAPS):
                if t == _CENTER:
                    continue
                s = dy * W + dx
                # shifted[p] = x[(p + s) % lanes]; mask-folded planes zero
                # every wrapped / padded position, so this is exact.
                shifted = pltpu.roll(x, (-s) % lanes, axis=1)
                acc = acc + shifted * dwp_ref[l, t]

            # --- pointwise 1x1 + fused (pb + pw @ db) bias ---
            pwpb = pwpb_ref[l]                           # (cpad, 128)
            if cin >= 32:
                # Wide channels: MXU matmul, bf16 operands, f32 accumulation.
                # (Not exercised at the test shapes; may need a slightly
                # looser tolerance vs. a Precision.HIGHEST reference.)
                y = jnp.dot(pwpb[:, :cpad].astype(jnp.bfloat16),
                            acc.astype(jnp.bfloat16),
                            preferred_element_type=jnp.float32)
            else:
                # Small channel counts: exact-f32 VPU broadcast-FMAs.
                y = jnp.zeros((cpad, lanes), jnp.float32)
                for ci in range(cpad):
                    y = y + pwpb[:, ci:ci + 1] * acc[ci:ci + 1, :]
            x = y + pwpb[:, cpad:cpad + 1]
        o_ref[...] = x[:cout_final].astype(o_ref.dtype)

    return kernel


def stacked_separable_conv(x_nchw, params, *, fold_batch=True):
    """Forward pass matching StackedSeparableConv.forward (NCHW in/out).

    fold_batch=True : batch folded into the lane axis, no grid (best for the
                      single-TensorCore v5e/v6e at small shapes).
    fold_batch=False: grid=(N,) marked "parallel" (keeps both v7x TCs busy).
    """
    N, C0, H, W = x_nchw.shape
    # roll + mask-folded planes are only valid for 3x3 / stride 1 / pad 1
    # with H, W >= 2 (so |dy*W + dx| <= W + 1 < H*W).
    assert H >= 2 and W >= 2

    HW = H * W
    layer_dims = [(p[0].shape[0], p[2].shape[0]) for p in params]  # (cin, cout)
    cout_final = layer_dims[-1][1]
    cpad = _round_up(max([C0] + [c for _, c in layer_dims]), 8)

    pwpb = _build_pwpb_slab(params, cpad)                # (L, cpad, 128)

    if fold_batch:
        lanes = N * HW
        dwp = _build_dw_planes(params, H, W, N, cpad)    # (L, 9, cpad, lanes)
        kernel = _make_kernel(layer_dims, W, lanes, cpad, cout_final)
        # (N, C0, HW) -> (C0, N*HW), zero-pad channels to cpad (cheap, tiny).
        x2d = jnp.transpose(x_nchw.reshape(N, C0, HW), (1, 0, 2)).reshape(C0, lanes)
        x2d = jnp.pad(x2d, ((0, cpad - C0), (0, 0)))
        out = pl.pallas_call(
            kernel,
            out_shape=jax.ShapeDtypeStruct((cout_final, lanes), x_nchw.dtype),
        )(x2d, dwp, pwpb)
        out = jnp.transpose(out.reshape(cout_final, N, HW), (1, 0, 2))
        return out.reshape(N, cout_final, H, W)

    # Grid path: one parallel step per batch image (v7x: 2 TCs).
    lanes = HW
    dwp = _build_dw_planes(params, H, W, 1, cpad)        # (L, 9, cpad, HW)
    kernel = _make_kernel(layer_dims, W, lanes, cpad, cout_final)
    x3d = x_nchw.reshape(N, C0, HW)
    x3d = jnp.pad(x3d, ((0, 0), (0, cpad - C0), (0, 0)))
    out = pl.pallas_call(
        kernel,
        out_shape=jax.ShapeDtypeStruct((N, cout_final, HW), x_nchw.dtype),
        grid=(N,),
        in_specs=[
            pl.BlockSpec((None, cpad, HW), lambda n: (n, 0, 0)),
            pl.BlockSpec(dwp.shape, lambda n: (0, 0, 0, 0)),
            pl.BlockSpec(pwpb.shape, lambda n: (0, 0, 0)),
        ],
        out_specs=pl.BlockSpec((None, cout_final, HW), lambda n: (n, 0, 0)),
        compiler_params=pltpu.CompilerParams(
            dimension_semantics=("parallel",)),
    )(x3d, dwp, pwpb)
    return out.reshape(N, cout_final, H, W)


def init_stacked_separable_conv(key, in_channels, out_channels, num_layers=5):
    """Deterministic parameter init (shapes mirror the PyTorch module)."""
    params = []
    for i in range(num_layers):
        cin = in_channels if i == 0 else out_channels
        key, k1, k2, k3, k4 = jax.random.split(key, 5)
        # depthwise: torch weight (cin, 1, 3, 3) -> stored (cin, 3, 3)
        dw = jax.random.uniform(k1, (cin, 3, 3), jnp.float32, -0.3, 0.3)
        db = jax.random.uniform(k2, (cin,), jnp.float32, -0.3, 0.3)
        # pointwise: torch weight (cout, cin, 1, 1) -> stored (cout, cin)
        pw = jax.random.uniform(k3, (out_channels, cin), jnp.float32, -0.3, 0.3)
        pb = jax.random.uniform(k4, (out_channels,), jnp.float32, -0.3, 0.3)
        params.append((dw, db, pw, pb))
    return params


def _stacked_ref(x_nchw, params):
    """Pure-JAX NCHW reference (mirrors PyTorch layer by layer)."""
    x = x_nchw
    for dw, db, pw, pb in params:
        cin = dw.shape[0]
        cout = pw.shape[0]
        y = jax.lax.conv_general_dilated(
            x, dw.reshape(cin, 1, 3, 3),
            window_strides=(1, 1), padding=((1, 1), (1, 1)),
            dimension_numbers=('NCHW', 'OIHW', 'NCHW'),
            feature_group_count=cin,
            precision=jax.lax.Precision.HIGHEST)
        y = y + db[None, :, None, None]
        y = jax.lax.conv_general_dilated(
            y, pw.reshape(cout, cin, 1, 1),
            window_strides=(1, 1), padding='VALID',
            dimension_numbers=('NCHW', 'OIHW', 'NCHW'),
            precision=jax.lax.Precision.HIGHEST)
        x = y + pb[None, :, None, None]
    return x


if __name__ == "__main__":
    key = jax.random.PRNGKey(0)
    k_x, k_p = jax.random.split(key)

    N, C_IN, C_OUT, H, W = 2, 4, 8, 16, 16
    x = jax.random.normal(k_x, (N, C_IN, H, W), jnp.float32)
    params = init_stacked_separable_conv(k_p, C_IN, C_OUT, num_layers=5)

    ref = jax.block_until_ready(_stacked_ref(x, params))

    # Batch-folded single-block path (v5e/v6e).
    out_fold = jax.block_until_ready(
        stacked_separable_conv(x, params, fold_batch=True))
    assert out_fold.shape == (N, C_OUT, H, W), out_fold.shape
    assert jnp.allclose(out_fold, ref, atol=1e-3, rtol=1e-3), \
        float(jnp.max(jnp.abs(out_fold - ref)))

    # Parallel-grid path (v7x, 2 TensorCores).
    out_grid = jax.block_until_ready(
        stacked_separable_conv(x, params, fold_batch=False))
    assert out_grid.shape == (N, C_OUT, H, W), out_grid.shape
    assert jnp.allclose(out_grid, ref, atol=1e-3, rtol=1e-3), \
        float(jnp.max(jnp.abs(out_grid - ref)))

    print("KERNEL_OK")
</pallas_src>

<mosaic_0001>
module attributes {stable_mosaic.version = 11 : i64} {
  func.func @kernel(%arg0: memref<8x512xf32, #tpu.memory_space<vmem>>, %arg1: memref<5x9x8x512xf32, #tpu.memory_space<vmem>>, %arg2: memref<5x8x128xf32, #tpu.memory_space<vmem>>, %arg3: memref<8x512xf32, #tpu.memory_space<vmem>>) attributes {dimension_semantics = [], scalar_prefetch = 0 : i64, scratch_operands = 0 : i64, tpu.core_type = #tpu.core_type<tc>} {
    %c0 = arith.constant 0 : index
    %c0_0 = arith.constant 0 : index
    %0 = vector.load %arg0[%c0, %c0_0] : memref<8x512xf32, #tpu.memory_space<vmem>>, vector<8x512xf32>
    %c0_1 = arith.constant 0 : index
    %c4 = arith.constant 4 : index
    %c0_2 = arith.constant 0 : index
    %c0_3 = arith.constant 0 : index
    %1 = vector.load %arg1[%c0_1, %c4, %c0_2, %c0_3] : memref<5x9x8x512xf32, #tpu.memory_space<vmem>>, vector<1x1x8x512xf32>
    %2 = vector.shape_cast %1 : vector<1x1x8x512xf32> to vector<8x512xf32>
    %3 = arith.mulf %0, %2 : vector<8x512xf32>
    %c17_i32 = arith.constant 17 : i32
    %4 = tpu.dynamic_rotate %0 by %c17_i32 dim 1 : vector<8x512xf32>, i32 -> vector<8x512xf32>
    %c0_4 = arith.constant 0 : index
    %c0_5 = arith.constant 0 : index
    %c0_6 = arith.constant 0 : index
    %c0_7 = arith.constant 0 : index
    %5 = vector.load %arg1[%c0_4, %c0_5, %c0_6, %c0_7] : memref<5x9x8x512xf32, #tpu.memory_space<vmem>>, vector<1x1x8x512xf32>
    %6 = vector.shape_cast %5 : vector<1x1x8x512xf32> to vector<8x512xf32>
    %7 = arith.mulf %4, %6 : vector<8x512xf32>
    %8 = arith.addf %3, %7 : vector<8x512xf32>
    %c16_i32 = arith.constant 16 : i32
    %9 = tpu.dynamic_rotate %0 by %c16_i32 dim 1 : vector<8x512xf32>, i32 -> vector<8x512xf32>
    %c0_8 = arith.constant 0 : index
    %c1 = arith.constant 1 : index
    %c0_9 = arith.constant 0 : index
    %c0_10 = arith.constant 0 : index
    %10 = vector.load %arg1[%c0_8, %c1, %c0_9, %c0_10] : memref<5x9x8x512xf32, #tpu.memory_space<vmem>>, vector<1x1x8x512xf32>
    %11 = vector.shape_cast %10 : vector<1x1x8x512xf32> to vector<8x512xf32>
    %12 = arith.mulf %9, %11 : vector<8x512xf32>
    %13 = arith.addf %8, %12 : vector<8x512xf32>
    %c15_i32 = arith.constant 15 : i32
    %14 = tpu.dynamic_rotate %0 by %c15_i32 dim 1 : vector<8x512xf32>, i32 -> vector<8x512xf32>
    %c0_11 = arith.constant 0 : index
    %c2 = arith.constant 2 : index
    %c0_12 = arith.constant 0 : index
    %c0_13 = arith.constant 0 : index
    %15 = vector.load %arg1[%c0_11, %c2, %c0_12, %c0_13] : memref<5x9x8x512xf32, #tpu.memory_space<vmem>>, vector<1x1x8x512xf32>
    %16 = vector.shape_cast %15 : vector<1x1x8x512xf32> to vector<8x512xf32>
    %17 = arith.mulf %14, %16 : vector<8x512xf32>
    %18 = arith.addf %13, %17 : vector<8x512xf32>
    %c1_i32 = arith.constant 1 : i32
    %19 = tpu.dynamic_rotate %0 by %c1_i32 dim 1 : vector<8x512xf32>, i32 -> vector<8x512xf32>
    %c0_14 = arith.constant 0 : index
    %c3 = arith.constant 3 : index
    %c0_15 = arith.constant 0 : index
    %c0_16 = arith.constant 0 : index
    %20 = vector.load %arg1[%c0_14, %c3, %c0_15, %c0_16] : memref<5x9x8x512xf32, #tpu.memory_space<vmem>>, vector<1x1x8x512xf32>
    %21 = vector.shape_cast %20 : vector<1x1x8x512xf32> to vector<8x512xf32>
    %22 = arith.mulf %19, %21 : vector<8x512xf32>
    %23 = arith.addf %18, %22 : vector<8x512xf32>
    %c511_i32 = arith.constant 511 : i32
    %24 = tpu.dynamic_rotate %0 by %c511_i32 dim 1 : vector<8x512xf32>, i32 -> vector<8x512xf32>
    %c0_17 = arith.constant 0 : index
    %c5 = arith.constant 5 : index
    %c0_18 = arith.constant 0 : index
    %c0_19 = arith.constant 0 : index
    %25 = vector.load %arg1[%c0_17, %c5, %c0_18, %c0_19] : memref<5x9x8x512xf32, #tpu.memory_space<vmem>>, vector<1x1x8x512xf32>
    %26 = vector.shape_cast %25 : vector<1x1x8x512xf32> to vector<8x512xf32>
    %27 = arith.mulf %24, %26 : vector<8x512xf32>
    %28 = arith.addf %23, %27 : vector<8x512xf32>
    %c497_i32 = arith.constant 497 : i32
    %29 = tpu.dynamic_rotate %0 by %c497_i32 dim 1 : vector<8x512xf32>, i32 -> vector<8x512xf32>
    %c0_20 = arith.constant 0 : index
    %c6 = arith.constant 6 : index
    %c0_21 = arith.constant 0 : index
    %c0_22 = arith.constant 0 : index
    %30 = vector.load %arg1[%c0_20, %c6, %c0_21, %c0_22] : memref<5x9x8x512xf32, #tpu.memory_space<vmem>>, vector<1x1x8x512xf32>
    %31 = vector.shape_cast %30 : vector<1x1x8x512xf32> to vector<8x512xf32>
    %32 = arith.mulf %29, %31 : vector<8x512xf32>
    %33 = arith.addf %28, %32 : vector<8x512xf32>
    %c496_i32 = arith.constant 496 : i32
    %34 = tpu.dynamic_rotate %0 by %c496_i32 dim 1 : vector<8x512xf32>, i32 -> vector<8x512xf32>
    %c0_23 = arith.constant 0 : index
    %c7 = arith.constant 7 : index
    %c0_24 = arith.constant 0 : index
    %c0_25 = arith.constant 0 : index
    %35 = vector.load %arg1[%c0_23, %c7, %c0_24, %c0_25] : memref<5x9x8x512xf32, #tpu.memory_space<vmem>>, vector<1x1x8x512xf32>
    %36 = vector.shape_cast %35 : vector<1x1x8x512xf32> to vector<8x512xf32>
    %37 = arith.mulf %34, %36 : vector<8x512xf32>
    %38 = arith.addf %33, %37 : vector<8x512xf32>
    %c495_i32 = arith.constant 495 : i32
    %39 = tpu.dynamic_rotate %0 by %c495_i32 dim 1 : vector<8x512xf32>, i32 -> vector<8x512xf32>
    %c0_26 = arith.constant 0 : index
    %c8 = arith.constant 8 : index
    %c0_27 = arith.constant 0 : index
    %c0_28 = arith.constant 0 : index
    %40 = vector.load %arg1[%c0_26, %c8, %c0_27, %c0_28] : memref<5x9x8x512xf32, #tpu.memory_space<vmem>>, vector<1x1x8x512xf32>
    %41 = vector.shape_cast %40 : vector<1x1x8x512xf32> to vector<8x512xf32>
    %42 = arith.mulf %39, %41 : vector<8x512xf32>
    %43 = arith.addf %38, %42 : vector<8x512xf32>
    %c0_29 = arith.constant 0 : index
    %c0_30 = arith.constant 0 : index
    %c0_31 = arith.constant 0 : index
    %44 = vector.load %arg2[%c0_29, %c0_30, %c0_31] : memref<5x8x128xf32, #tpu.memory_space<vmem>>, vector<1x8x128xf32>
    %45 = vector.shape_cast %44 : vector<1x8x128xf32> to vector<8x128xf32>
    %cst = arith.constant 0.000000e+00 : f32
    %46 = vector.broadcast %cst : f32 to vector<8x512xf32>
    %47 = vector.extract_strided_slice %45 {offsets = [0, 0], sizes = [8, 1], strides = [1, 1]} : vector<8x128xf32> to vector<8x1xf32>
    %48 = vector.extract_strided_slice %43 {offsets = [0, 0], sizes = [1, 512], strides = [1, 1]} : vector<8x512xf32> to vector<1x512xf32>
    %49 = vector.broadcast %47 : vector<8x1xf32> to vector<8x512xf32>
    %50 = vector.broadcast %48 : vector<1x512xf32> to vector<8x512xf32>
    %51 = arith.mulf %49, %50 : vector<8x512xf32>
    %52 = arith.addf %46, %51 : vector<8x512xf32>
    %53 = vector.extract_strided_slice %45 {offsets = [0, 1], sizes = [8, 1], strides = [1, 1]} : vector<8x128xf32> to vector<8x1xf32>
    %54 = vector.extract_strided_slice %43 {offsets = [1, 0], sizes = [1, 512], strides = [1, 1]} : vector<8x512xf32> to vector<1x512xf32>
    %55 = vector.broadcast %53 : vector<8x1xf32> to vector<8x512xf32>
    %56 = vector.broadcast %54 : vector<1x512xf32> to vector<8x512xf32>
    %57 = arith.mulf %55, %56 : vector<8x512xf32>
    %58 = arith.addf %52, %57 : vector<8x512xf32>
    %59 = vector.extract_strided_slice %45 {offsets = [0, 2], sizes = [8, 1], strides = [1, 1]} : vector<8x128xf32> to vector<8x1xf32>
    %60 = vector.extract_strided_slice %43 {offsets = [2, 0], sizes = [1, 512], strides = [1, 1]} : vector<8x512xf32> to vector<1x512xf32>
    %61 = vector.broadcast %59 : vector<8x1xf32> to vector<8x512xf32>
    %62 = vector.broadcast %60 : vector<1x512xf32> to vector<8x512xf32>
    %63 = arith.mulf %61, %62 : vector<8x512xf32>
    %64 = arith.addf %58, %63 : vector<8x512xf32>
    %65 = vector.extract_strided_slice %45 {offsets = [0, 3], sizes = [8, 1], strides = [1, 1]} : vector<8x128xf32> to vector<8x1xf32>
    %66 = vector.extract_strided_slice %43 {offsets = [3, 0], sizes = [1, 512], strides = [1, 1]} : vector<8x512xf32> to vector<1x512xf32>
    %67 = vector.broadcast %65 : vector<8x1xf32> to vector<8x512xf32>
    %68 = vector.broadcast %66 : vector<1x512xf32> to vector<8x512xf32>
    %69 = arith.mulf %67, %68 : vector<8x512xf32>
    %70 = arith.addf %64, %69 : vector<8x512xf32>
    %71 = vector.extract_strided_slice %45 {offsets = [0, 4], sizes = [8, 1], strides = [1, 1]} : vector<8x128xf32> to vector<8x1xf32>
    %72 = vector.extract_strided_slice %43 {offsets = [4, 0], sizes = [1, 512], strides = [1, 1]} : vector<8x512xf32> to vector<1x512xf32>
    %73 = vector.broadcast %71 : vector<8x1xf32> to vector<8x512xf32>
    %74 = vector.broadcast %72 : vector<1x512xf32> to vector<8x512xf32>
    %75 = arith.mulf %73, %74 : vector<8x512xf32>
    %76 = arith.addf %70, %75 : vector<8x512xf32>
    %77 = vector.extract_strided_slice %45 {offsets = [0, 5], sizes = [8, 1], strides = [1, 1]} : vector<8x128xf32> to vector<8x1xf32>
    %78 = vector.extract_strided_slice %43 {offsets = [5, 0], sizes = [1, 512], strides = [1, 1]} : vector<8x512xf32> to vector<1x512xf32>
    %79 = vector.broadcast %77 : vector<8x1xf32> to vector<8x512xf32>
    %80 = vector.broadcast %78 : vector<1x512xf32> to vector<8x512xf32>
    %81 = arith.mulf %79, %80 : vector<8x512xf32>
    %82 = arith.addf %76, %81 : vector<8x512xf32>
    %83 = vector.extract_strided_slice %45 {offsets = [0, 6], sizes = [8, 1], strides = [1, 1]} : vector<8x128xf32> to vector<8x1xf32>
    %84 = vector.extract_strided_slice %43 {offsets = [6, 0], sizes = [1, 512], strides = [1, 1]} : vector<8x512xf32> to vector<1x512xf32>
    %85 = vector.broadcast %83 : vector<8x1xf32> to vector<8x512xf32>
    %86 = vector.broadcast %84 : vector<1x512xf32> to vector<8x512xf32>
    %87 = arith.mulf %85, %86 : vector<8x512xf32>
    %88 = arith.addf %82, %87 : vector<8x512xf32>
    %89 = vector.extract_strided_slice %45 {offsets = [0, 7], sizes = [8, 1], strides = [1, 1]} : vector<8x128xf32> to vector<8x1xf32>
    %90 = vector.extract_strided_slice %43 {offsets = [7, 0], sizes = [1, 512], strides = [1, 1]} : vector<8x512xf32> to vector<1x512xf32>
    %91 = vector.broadcast %89 : vector<8x1xf32> to vector<8x512xf32>
    %92 = vector.broadcast %90 : vector<1x512xf32> to vector<8x512xf32>
    %93 = arith.mulf %91, %92 : vector<8x512xf32>
    %94 = arith.addf %88, %93 : vector<8x512xf32>
    %95 = vector.extract_strided_slice %45 {offsets = [0, 8], sizes = [8, 1], strides = [1, 1]} : vector<8x128xf32> to vector<8x1xf32>
    %96 = vector.broadcast %95 : vector<8x1xf32> to vector<8x512xf32>
    %97 = arith.addf %94, %96 : vector<8x512xf32>
    %c1_32 = arith.constant 1 : index
    %c4_33 = arith.constant 4 : index
    %c0_34 = arith.constant 0 : index
    %c0_35 = arith.constant 0 : index
    %98 = vector.load %arg1[%c1_32, %c4_33, %c0_34, %c0_35] : memref<5x9x8x512xf32, #tpu.memory_space<vmem>>, vector<1x1x8x512xf32>
    %99 = vector.shape_cast %98 : vector<1x1x8x512xf32> to vector<8x512xf32>
    %100 = arith.mulf %97, %99 : vector<8x512xf32>
    %c17_i32_36 = arith.constant 17 : i32
    %101 = tpu.dynamic_rotate %97 by %c17_i32_36 dim 1 : vector<8x512xf32>, i32 -> vector<8x512xf32>
    %c1_37 = arith.constant 1 : index
    %c0_38 = arith.constant 0 : index
    %c0_39 = arith.constant 0 : index
    %c0_40 = arith.constant 0 : index
    %102 = vector.load %arg1[%c1_37, %c0_38, %c0_39, %c0_40] : memref<5x9x8x512xf32, #tpu.memory_space<vmem>>, vector<1x1x8x512xf32>
    %103 = vector.shape_cast %102 : vector<1x1x8x512xf32> to vector<8x512xf32>
    %104 = arith.mulf %101, %103 : vector<8x512xf32>
    %105 = arith.addf %100, %104 : vector<8x512xf32>
    %c16_i32_41 = arith.constant 16 : i32
    %106 = tpu.dynamic_rotate %97 by %c16_i32_41 dim 1 : vector<8x512xf32>, i32 -> vector<8x512xf32>
    %c1_42 = arith.constant 1 : index
    %c1_43 = arith.constant 1 : index
    %c0_44 = arith.constant 0 : index
    %c0_45 = arith.constant 0 : index
    %107 = vector.load %arg1[%c1_42, %c1_43, %c0_44, %c0_45] : memref<5x9x8x512xf32, #tpu.memory_space<vmem>>, vector<1x1x8x512xf32>
    %108 = vector.shape_cast %107 : vector<1x1x8x512xf32> to vector<8x512xf32>
    %109 = arith.mulf %106, %108 : vector<8x512xf32>
    %110 = arith.addf %105, %109 : vector<8x512xf32>
    %c15_i32_46 = arith.constant 15 : i32
    %111 = tpu.dynamic_rotate %97 by %c15_i32_46 dim 1 : vector<8x512xf32>, i32 -> vector<8x512xf32>
    %c1_47 = arith.constant 1 : index
    %c2_48 = arith.constant 2 : index
    %c0_49 = arith.constant 0 : index
    %c0_50 = arith.constant 0 : index
    %112 = vector.load %arg1[%c1_47, %c2_48, %c0_49, %c0_50] : memref<5x9x8x512xf32, #tpu.memory_space<vmem>>, vector<1x1x8x512xf32>
    %113 = vector.shape_cast %112 : vector<1x1x8x512xf32> to vector<8x512xf32>
    %114 = arith.mulf %111, %113 : vector<8x512xf32>
    %115 = arith.addf %110, %114 : vector<8x512xf32>
    %c1_i32_51 = arith.constant 1 : i32
    %116 = tpu.dynamic_rotate %97 by %c1_i32_51 dim 1 : vector<8x512xf32>, i32 -> vector<8x512xf32>
    %c1_52 = arith.constant 1 : index
    %c3_53 = arith.constant 3 : index
    %c0_54 = arith.constant 0 : index
    %c0_55 = arith.constant 0 : index
    %117 = vector.load %arg1[%c1_52, %c3_53, %c0_54, %c0_55] : memref<5x9x8x512xf32, #tpu.memory_space<vmem>>, vector<1x1x8x512xf32>
    %118 = vector.shape_cast %117 : vector<1x1x8x512xf32> to vector<8x512xf32>
    %119 = arith.mulf %116, %118 : vector<8x512xf32>
    %120 = arith.addf %115, %119 : vector<8x512xf32>
    %c511_i32_56 = arith.constant 511 : i32
    %121 = tpu.dynamic_rotate %97 by %c511_i32_56 dim 1 : vector<8x512xf32>, i32 -> vector<8x512xf32>
    %c1_57 = arith.constant 1 : index
    %c5_58 = arith.constant 5 : index
    %c0_59 = arith.constant 0 : index
    %c0_60 = arith.constant 0 : index
    %122 = vector.load %arg1[%c1_57, %c5_58, %c0_59, %c0_60] : memref<5x9x8x512xf32, #tpu.memory_space<vmem>>, vector<1x1x8x512xf32>
    %123 = vector.shape_cast %122 : vector<1x1x8x512xf32> to vector<8x512xf32>
    %124 = arith.mulf %121, %123 : vector<8x512xf32>
    %125 = arith.addf %120, %124 : vector<8x512xf32>
    %c497_i32_61 = arith.constant 497 : i32
    %126 = tpu.dynamic_rotate %97 by %c497_i32_61 dim 1 : vector<8x512xf32>, i32 -> vector<8x512xf32>
    %c1_62 = arith.constant 1 : index
    %c6_63 = arith.constant 6 : index
    %c0_64 = arith.constant 0 : index
    %c0_65 = arith.constant 0 : index
    %127 = vector.load %arg1[%c1_62, %c6_63, %c0_64, %c0_65] : memref<5x9x8x512xf32, #tpu.memory_space<vmem>>, vector<1x1x8x512xf32>
    %128 = vector.shape_cast %127 : vector<1x1x8x512xf32> to vector<8x512xf32>
    %129 = arith.mulf %126, %128 : vector<8x512xf32>
    %130 = arith.addf %125, %129 : vector<8x512xf32>
    %c496_i32_66 = arith.constant 496 : i32
    %131 = tpu.dynamic_rotate %97 by %c496_i32_66 dim 1 : vector<8x512xf32>, i32 -> vector<8x512xf32>
    %c1_67 = arith.constant 1 : index
    %c7_68 = arith.constant 7 : index
    %c0_69 = arith.constant 0 : index
    %c0_70 = arith.constant 0 : index
    %132 = vector.load %arg1[%c1_67, %c7_68, %c0_69, %c0_70] : memref<5x9x8x512xf32, #tpu.memory_space<vmem>>, vector<1x1x8x512xf32>
    %133 = vector.shape_cast %132 : vector<1x1x8x512xf32> to vector<8x512xf32>
    %134 = arith.mulf %131, %133 : vector<8x512xf32>
    %135 = arith.addf %130, %134 : vector<8x512xf32>
    %c495_i32_71 = arith.constant 495 : i32
    %136 = tpu.dynamic_rotate %97 by %c495_i32_71 dim 1 : vector<8x512xf32>, i32 -> vector<8x512xf32>
    %c1_72 = arith.constant 1 : index
    %c8_73 = arith.constant 8 : index
    %c0_74 = arith.constant 0 : index
    %c0_75 = arith.constant 0 : index
    %137 = vector.load %arg1[%c1_72, %c8_73, %c0_74, %c0_75] : memref<5x9x8x512xf32, #tpu.memory_space<vmem>>, vector<1x1x8x512xf32>
    %138 = vector.shape_cast %137 : vector<1x1x8x512xf32> to vector<8x512xf32>
    %139 = arith.mulf %136, %138 : vector<8x512xf32>
    %140 = arith.addf %135, %139 : vector<8x512xf32>
    %c1_76 = arith.constant 1 : index
    %c0_77 = arith.constant 0 : index
    %c0_78 = arith.constant 0 : index
    %141 = vector.load %arg2[%c1_76, %c0_77, %c0_78] : memref<5x8x128xf32, #tpu.memory_space<vmem>>, vector<1x8x128xf32>
    %142 = vector.shape_cast %141 : vector<1x8x128xf32> to vector<8x128xf32>
    %cst_79 = arith.constant 0.000000e+00 : f32
    %143 = vector.broadcast %cst_79 : f32 to vector<8x512xf32>
    %144 = vector.extract_strided_slice %142 {offsets = [0, 0], sizes = [8, 1], strides = [1, 1]} : vector<8x128xf32> to vector<8x1xf32>
    %145 = vector.extract_strided_slice %140 {offsets = [0, 0], sizes = [1, 512], strides = [1, 1]} : vector<8x512xf32> to vector<1x512xf32>
    %146 = vector.broadcast %144 : vector<8x1xf32> to vector<8x512xf32>
    %147 = vector.broadcast %145 : vector<1x512xf32> to vector<8x512xf32>
    %148 = arith.mulf %146, %147 : vector<8x512xf32>
    %149 = arith.addf %143, %148 : vector<8x512xf32>
    %150 = vector.extract_strided_slice %142 {offsets = [0, 1], sizes = [8, 1], strides = [1, 1]} : vector<8x128xf32> to vector<8x1xf32>
    %151 = vector.extract_strided_slice %140 {offsets = [1, 0], sizes = [1, 512], strides = [1, 1]} : vector<8x512xf32> to vector<1x512xf32>
    %152 = vector.broadcast %150 : vector<8x1xf32> to vector<8x512xf32>
    %153 = vector.broadcast %151 : vector<1x512xf32> to vector<8x512xf32>
    %154 = arith.mulf %152, %153 : vector<8x512xf32>
    %155 = arith.addf %149, %154 : vector<8x512xf32>
    %156 = vector.extract_strided_slice %142 {offsets = [0, 2], sizes = [8, 1], strides = [1, 1]} : vector<8x128xf32> to vector<8x1xf32>
    %157 = vector.extract_strided_slice %140 {offsets = [2, 0], sizes = [1, 512], strides = [1, 1]} : vector<8x512xf32> to vector<1x512xf32>
    %158 = vector.broadcast %156 : vector<8x1xf32> to vector<8x512xf32>
    %159 = vector.broadcast %157 : vector<1x512xf32> to vector<8x512xf32>
    %160 = arith.mulf %158, %159 : vector<8x512xf32>
    %161 = arith.addf %155, %160 : vector<8x512xf32>
    %162 = vector.extract_strided_slice %142 {offsets = [0, 3], sizes = [8, 1], strides = [1, 1]} : vector<8x128xf32> to vector<8x1xf32>
    %163 = vector.extract_strided_slice %140 {offsets = [3, 0], sizes = [1, 512], strides = [1, 1]} : vector<8x512xf32> to vector<1x512xf32>
    %164 = vector.broadcast %162 : vector<8x1xf32> to vector<8x512xf32>
    %165 = vector.broadcast %163 : vector<1x512xf32> to vector<8x512xf32>
    %166 = arith.mulf %164, %165 : vector<8x512xf32>
    %167 = arith.addf %161, %166 : vector<8x512xf32>
    %168 = vector.extract_strided_slice %142 {offsets = [0, 4], sizes = [8, 1], strides = [1, 1]} : vector<8x128xf32> to vector<8x1xf32>
    %169 = vector.extract_strided_slice %140 {offsets = [4, 0], sizes = [1, 512], strides = [1, 1]} : vector<8x512xf32> to vector<1x512xf32>
    %170 = vector.broadcast %168 : vector<8x1xf32> to vector<8x512xf32>
    %171 = vector.broadcast %169 : vector<1x512xf32> to vector<8x512xf32>
    %172 = arith.mulf %170, %171 : vector<8x512xf32>
    %173 = arith.addf %167, %172 : vector<8x512xf32>
    %174 = vector.extract_strided_slice %142 {offsets = [0, 5], sizes = [8, 1], strides = [1, 1]} : vector<8x128xf32> to vector<8x1xf32>
    %175 = vector.extract_strided_slice %140 {offsets = [5, 0], sizes = [1, 512], strides = [1, 1]} : vector<8x512xf32> to vector<1x512xf32>
    %176 = vector.broadcast %174 : vector<8x1xf32> to vector<8x512xf32>
    %177 = vector.broadcast %175 : vector<1x512xf32> to vector<8x512xf32>
    %178 = arith.mulf %176, %177 : vector<8x512xf32>
    %179 = arith.addf %173, %178 : vector<8x512xf32>
    %180 = vector.extract_strided_slice %142 {offsets = [0, 6], sizes = [8, 1], strides = [1, 1]} : vector<8x128xf32> to vector<8x1xf32>
    %181 = vector.extract_strided_slice %140 {offsets = [6, 0], sizes = [1, 512], strides = [1, 1]} : vector<8x512xf32> to vector<1x512xf32>
    %182 = vector.broadcast %180 : vector<8x1xf32> to vector<8x512xf32>
    %183 = vector.broadcast %181 : vector<1x512xf32> to vector<8x512xf32>
    %184 = arith.mulf %182, %183 : vector<8x512xf32>
    %185 = arith.addf %179, %184 : vector<8x512xf32>
    %186 = vector.extract_strided_slice %142 {offsets = [0, 7], sizes = [8, 1], strides = [1, 1]} : vector<8x128xf32> to vector<8x1xf32>
    %187 = vector.extract_strided_slice %140 {offsets = [7, 0], sizes = [1, 512], strides = [1, 1]} : vector<8x512xf32> to vector<1x512xf32>
    %188 = vector.broadcast %186 : vector<8x1xf32> to vector<8x512xf32>
    %189 = vector.broadcast %187 : vector<1x512xf32> to vector<8x512xf32>
    %190 = arith.mulf %188, %189 : vector<8x512xf32>
    %191 = arith.addf %185, %190 : vector<8x512xf32>
    %192 = vector.extract_strided_slice %142 {offsets = [0, 8], sizes = [8, 1], strides = [1, 1]} : vector<8x128xf32> to vector<8x1xf32>
    %193 = vector.broadcast %192 : vector<8x1xf32> to vector<8x512xf32>
    %194 = arith.addf %191, %193 : vector<8x512xf32>
    %c2_80 = arith.constant 2 : index
    %c4_81 = arith.constant 4 : index
    %c0_82 = arith.constant 0 : index
    %c0_83 = arith.constant 0 : index
    %195 = vector.load %arg1[%c2_80, %c4_81, %c0_82, %c0_83] : memref<5x9x8x512xf32, #tpu.memory_space<vmem>>, vector<1x1x8x512xf32>
    %196 = vector.shape_cast %195 : vector<1x1x8x512xf32> to vector<8x512xf32>
    %197 = arith.mulf %194, %196 : vector<8x512xf32>
    %c17_i32_84 = arith.constant 17 : i32
    %198 = tpu.dynamic_rotate %194 by %c17_i32_84 dim 1 : vector<8x512xf32>, i32 -> vector<8x512xf32>
    %c2_85 = arith.constant 2 : index
    %c0_86 = arith.constant 0 : index
    %c0_87 = arith.constant 0 : index
    %c0_88 = arith.constant 0 : index
    %199 = vector.load %arg1[%c2_85, %c0_86, %c0_87, %c0_88] : memref<5x9x8x512xf32, #tpu.memory_space<vmem>>, vector<1x1x8x512xf32>
    %200 = vector.shape_cast %199 : vector<1x1x8x512xf32> to vector<8x512xf32>
    %201 = arith.mulf %198, %200 : vector<8x512xf32>
    %202 = arith.addf %197, %201 : vector<8x512xf32>
    %c16_i32_89 = arith.constant 16 : i32
    %203 = tpu.dynamic_rotate %194 by %c16_i32_89 dim 1 : vector<8x512xf32>, i32 -> vector<8x512xf32>
    %c2_90 = arith.constant 2 : index
    %c1_91 = arith.constant 1 : index
    %c0_92 = arith.constant 0 : index
    %c0_93 = arith.constant 0 : index
    %204 = vector.load %arg1[%c2_90, %c1_91, %c0_92, %c0_93] : memref<5x9x8x512xf32, #tpu.memory_space<vmem>>, vector<1x1x8x512xf32>
    %205 = vector.shape_cast %204 : vector<1x1x8x512xf32> to vector<8x512xf32>
    %206 = arith.mulf %203, %205 : vector<8x512xf32>
    %207 = arith.addf %202, %206 : vector<8x512xf32>
    %c15_i32_94 = arith.constant 15 : i32
    %208 = tpu.dynamic_rotate %194 by %c15_i32_94 dim 1 : vector<8x512xf32>, i32 -> vector<8x512xf32>
    %c2_95 = arith.constant 2 : index
    %c2_96 = arith.constant 2 : index
    %c0_97 = arith.constant 0 : index
    %c0_98 = arith.constant 0 : index
    %209 = vector.load %arg1[%c2_95, %c2_96, %c0_97, %c0_98] : memref<5x9x8x512xf32, #tpu.memory_space<vmem>>, vector<1x1x8x512xf32>
    %210 = vector.shape_cast %209 : vector<1x1x8x512xf32> to vector<8x512xf32>
    %211 = arith.mulf %208, %210 : vector<8x512xf32>
    %212 = arith.addf %207, %211 : vector<8x512xf32>
    %c1_i32_99 = arith.constant 1 : i32
    %213 = tpu.dynamic_rotate %194 by %c1_i32_99 dim 1 : vector<8x512xf32>, i32 -> vector<8x512xf32>
    %c2_100 = arith.constant 2 : index
    %c3_101 = arith.constant 3 : index
    %c0_102 = arith.constant 0 : index
    %c0_103 = arith.constant 0 : index
    %214 = vector.load %arg1[%c2_100, %c3_101, %c0_102, %c0_103] : memref<5x9x8x512xf32, #tpu.memory_space<vmem>>, vector<1x1x8x512xf32>
    %215 = vector.shape_cast %214 : vector<1x1x8x512xf32> to vector<8x512xf32>
    %216 = arith.mulf %213, %215 : vector<8x512xf32>
    %217 = arith.addf %212, %216 : vector<8x512xf32>
    %c511_i32_104 = arith.constant 511 : i32
    %218 = tpu.dynamic_rotate %194 by %c511_i32_104 dim 1 : vector<8x512xf32>, i32 -> vector<8x512xf32>
    %c2_105 = arith.constant 2 : index
    %c5_106 = arith.constant 5 : index
    %c0_107 = arith.constant 0 : index
    %c0_108 = arith.constant 0 : index
    %219 = vector.load %arg1[%c2_105, %c5_106, %c0_107, %c0_108] : memref<5x9x8x512xf32, #tpu.memory_space<vmem>>, vector<1x1x8x512xf32>
    %220 = vector.shape_cast %219 : vector<1x1x8x512xf32> to vector<8x512xf32>
    %221 = arith.mulf %218, %220 : vector<8x512xf32>
    %222 = arith.addf %217, %221 : vector<8x512xf32>
    %c497_i32_109 = arith.constant 497 : i32
    %223 = tpu.dynamic_rotate %194 by %c497_i32_109 dim 1 : vector<8x512xf32>, i32 -> vector<8x512xf32>
    %c2_110 = arith.constant 2 : index
    %c6_111 = arith.constant 6 : index
    %c0_112 = arith.constant 0 : index
    %c0_113 = arith.constant 0 : index
    %224 = vector.load %arg1[%c2_110, %c6_111, %c0_112, %c0_113] : memref<5x9x8x512xf32, #tpu.memory_space<vmem>>, vector<1x1x8x512xf32>
    %225 = vector.shape_cast %224 : vector<1x1x8x512xf32> to vector<8x512xf32>
    %226 = arith.mulf %223, %225 : vector<8x512xf32>
    %227 = arith.addf %222, %226 : vector<8x512xf32>
    %c496_i32_114 = arith.constant 496 : i32
    %228 = tpu.dynamic_rotate %194 by %c496_i32_114 dim 1 : vector<8x512xf32>, i32 -> vector<8x512xf32>
    %c2_115 = arith.constant 2 : index
    %c7_116 = arith.constant 7 : index
    %c0_117 = arith.constant 0 : index
    %c0_118 = arith.constant 0 : index
    %229 = vector.load %arg1[%c2_115, %c7_116, %c0_117, %c0_118] : memref<5x9x8x512xf32, #tpu.memory_space<vmem>>, vector<1x1x8x512xf32>
    %230 = vector.shape_cast %229 : vector<1x1x8x512xf32> to vector<8x512xf32>
    %231 = arith.mulf %228, %230 : vector<8x512xf32>
    %232 = arith.addf %227, %231 : vector<8x512xf32>
    %c495_i32_119 = arith.constant 495 : i32
    %233 = tpu.dynamic_rotate %194 by %c495_i32_119 dim 1 : vector<8x512xf32>, i32 -> vector<8x512xf32>
    %c2_120 = arith.constant 2 : index
    %c8_121 = arith.constant 8 : index
    %c0_122 = arith.constant 0 : index
    %c0_123 = arith.constant 0 : index
    %234 = vector.load %arg1[%c2_120, %c8_121, %c0_122, %c0_123] : memref<5x9x8x512xf32, #tpu.memory_space<vmem>>, vector<1x1x8x512xf32>
    %235 = vector.shape_cast %234 : vector<1x1x8x512xf32> to vector<8x512xf32>
    %236 = arith.mulf %233, %235 : vector<8x512xf32>
    %237 = arith.addf %232, %236 : vector<8x512xf32>
    %c2_124 = arith.constant 2 : index
    %c0_125 = arith.constant 0 : index
    %c0_126 = arith.constant 0 : index
    %238 = vector.load %arg2[%c2_124, %c0_125, %c0_126] : memref<5x8x128xf32, #tpu.memory_space<vmem>>, vector<1x8x128xf32>
    %239 = vector.shape_cast %238 : vector<1x8x128xf32> to vector<8x128xf32>
    %cst_127 = arith.constant 0.000000e+00 : f32
    %240 = vector.broadcast %cst_127 : f32 to vector<8x512xf32>
    %241 = vector.extract_strided_slice %239 {offsets = [0, 0], sizes = [8, 1], strides = [1, 1]} : vector<8x128xf32> to vector<8x1xf32>
    %242 = vector.extract_strided_slice %237 {offsets = [0, 0], sizes = [1, 512], strides = [1, 1]} : vector<8x512xf32> to vector<1x512xf32>
    %243 = vector.broadcast %241 : vector<8x1xf32> to vector<8x512xf32>
    %244 = vector.broadcast %242 : vector<1x512xf32> to vector<8x512xf32>
    %245 = arith.mulf %243, %244 : vector<8x512xf32>
    %246 = arith.addf %240, %245 : vector<8x512xf32>
    %247 = vector.extract_strided_slice %239 {offsets = [0, 1], sizes = [8, 1], strides = [1, 1]} : vector<8x128xf32> to vector<8x1xf32>
    %248 = vector.extract_strided_slice %237 {offsets = [1, 0], sizes = [1, 512], strides = [1, 1]} : vector<8x512xf32> to vector<1x512xf32>
    %249 = vector.broadcast %247 : vector<8x1xf32> to vector<8x512xf32>
    %250 = vector.broadcast %248 : vector<1x512xf32> to vector<8x512xf32>
    %251 = arith.mulf %249, %250 : vector<8x512xf32>
    %252 = arith.addf %246, %251 : vector<8x512xf32>
    %253 = vector.extract_strided_slice %239 {offsets = [0, 2], sizes = [8, 1], strides = [1, 1]} : vector<8x128xf32> to vector<8x1xf32>
    %254 = vector.extract_strided_slice %237 {offsets = [2, 0], sizes = [1, 512], strides = [1, 1]} : vector<8x512xf32> to vector<1x512xf32>
    %255 = vector.broadcast %253 : vector<8x1xf32> to vector<8x512xf32>
    %256 = vector.broadcast %254 : vector<1x512xf32> to vector<8x512xf32>
    %257 = arith.mulf %255, %256 : vector<8x512xf32>
    %258 = arith.addf %252, %257 : vector<8x512xf32>
    %259 = vector.extract_strided_slice %239 {offsets = [0, 3], sizes = [8, 1], strides = [1, 1]} : vector<8x128xf32> to vector<8x1xf32>
    %260 = vector.extract_strided_slice %237 {offsets = [3, 0], sizes = [1, 512], strides = [1, 1]} : vector<8x512xf32> to vector<1x512xf32>
    %261 = vector.broadcast %259 : vector<8x1xf32> to vector<8x512xf32>
    %262 = vector.broadcast %260 : vector<1x512xf32> to vector<8x512xf32>
    %263 = arith.mulf %261, %262 : vector<8x512xf32>
    %264 = arith.addf %258, %263 : vector<8x512xf32>
    %265 = vector.extract_strided_slice %239 {offsets = [0, 4], sizes = [8, 1], strides = [1, 1]} : vector<8x128xf32> to vector<8x1xf32>
    %266 = vector.extract_strided_slice %237 {offsets = [4, 0], sizes = [1, 512], strides = [1, 1]} : vector<8x512xf32> to vector<1x512xf32>
    %267 = vector.broadcast %265 : vector<8x1xf32> to vector<8x512xf32>
    %268 = vector.broadcast %266 : vector<1x512xf32> to vector<8x512xf32>
    %269 = arith.mulf %267, %268 : vector<8x512xf32>
    %270 = arith.addf %264, %269 : vector<8x512xf32>
    %271 = vector.extract_strided_slice %239 {offsets = [0, 5], sizes = [8, 1], strides = [1, 1]} : vector<8x128xf32> to vector<8x1xf32>
    %272 = vector.extract_strided_slice %237 {offsets = [5, 0], sizes = [1, 512], strides = [1, 1]} : vector<8x512xf32> to vector<1x512xf32>
    %273 = vector.broadcast %271 : vector<8x1xf32> to vector<8x512xf32>
    %274 = vector.broadcast %272 : vector<1x512xf32> to vector<8x512xf32>
    %275 = arith.mulf %273, %274 : vector<8x512xf32>
    %276 = arith.addf %270, %275 : vector<8x512xf32>
    %277 = vector.extract_strided_slice %239 {offsets = [0, 6], sizes = [8, 1], strides = [1, 1]} : vector<8x128xf32> to vector<8x1xf32>
    %278 = vector.extract_strided_slice %237 {offsets = [6, 0], sizes = [1, 512], strides = [1, 1]} : vector<8x512xf32> to vector<1x512xf32>
    %279 = vector.broadcast %277 : vector<8x1xf32> to vector<8x512xf32>
    %280 = vector.broadcast %278 : vector<1x512xf32> to vector<8x512xf32>
    %281 = arith.mulf %279, %280 : vector<8x512xf32>
    %282 = arith.addf %276, %281 : vector<8x512xf32>
    %283 = vector.extract_strided_slice %239 {offsets = [0, 7], sizes = [8, 1], strides = [1, 1]} : vector<8x128xf32> to vector<8x1xf32>
    %284 = vector.extract_strided_slice %237 {offsets = [7, 0], sizes = [1, 512], strides = [1, 1]} : vector<8x512xf32> to vector<1x512xf32>
    %285 = vector.broadcast %283 : vector<8x1xf32> to vector<8x512xf32>
    %286 = vector.broadcast %284 : vector<1x512xf32> to vector<8x512xf32>
    %287 = arith.mulf %285, %286 : vector<8x512xf32>
    %288 = arith.addf %282, %287 : vector<8x512xf32>
    %289 = vector.extract_strided_slice %239 {offsets = [0, 8], sizes = [8, 1], strides = [1, 1]} : vector<8x128xf32> to vector<8x1xf32>
    %290 = vector.broadcast %289 : vector<8x1xf32> to vector<8x512xf32>
    %291 = arith.addf %288, %290 : vector<8x512xf32>
    %c3_128 = arith.constant 3 : index
    %c4_129 = arith.constant 4 : index
    %c0_130 = arith.constant 0 : index
    %c0_131 = arith.constant 0 : index
    %292 = vector.load %arg1[%c3_128, %c4_129, %c0_130, %c0_131] : memref<5x9x8x512xf32, #tpu.memory_space<vmem>>, vector<1x1x8x512xf32>
    %293 = vector.shape_cast %292 : vector<1x1x8x512xf32> to vector<8x512xf32>
    %294 = arith.mulf %291, %293 : vector<8x512xf32>
    %c17_i32_132 = arith.constant 17 : i32
    %295 = tpu.dynamic_rotate %291 by %c17_i32_132 dim 1 : vector<8x512xf32>, i32 -> vector<8x512xf32>
    %c3_133 = arith.constant 3 : index
    %c0_134 = arith.constant 0 : index
    %c0_135 = arith.constant 0 : index
    %c0_136 = arith.constant 0 : index
    %296 = vector.load %arg1[%c3_133, %c0_134, %c0_135, %c0_136] : memref<5x9x8x512xf32, #tpu.memory_space<vmem>>, vector<1x1x8x512xf32>
    %297 = vector.shape_cast %296 : vector<1x1x8x512xf32> to vector<8x512xf32>
    %298 = arith.mulf %295, %297 : vector<8x512xf32>
    %299 = arith.addf %294, %298 : vector<8x512xf32>
    %c16_i32_137 = arith.constant 16 : i32
    %300 = tpu.dynamic_rotate %291 by %c16_i32_137 dim 1 : vector<8x512xf32>, i32 -> vector<8x512xf32>
    %c3_138 = arith.constant 3 : index
    %c1_139 = arith.constant 1 : index
    %c0_140 = arith.constant 0 : index
    %c0_141 = arith.constant 0 : index
    %301 = vector.load %arg1[%c3_138, %c1_139, %c0_140, %c0_141] : memref<5x9x8x512xf32, #tpu.memory_space<vmem>>, vector<1x1x8x512xf32>
    %302 = vector.shape_cast %301 : vector<1x1x8x512xf32> to vector<8x512xf32>
    %303 = arith.mulf %300, %302 : vector<8x512xf32>
    %304 = arith.addf %299, %303 : vector<8x512xf32>
    %c15_i32_142 = arith.constant 15 : i32
    %305 = tpu.dynamic_rotate %291 by %c15_i32_142 dim 1 : vector<8x512xf32>, i32 -> vector<8x512xf32>
    %c3_143 = arith.constant 3 : index
    %c2_144 = arith.constant 2 : index
    %c0_145 = arith.constant 0 : index
    %c0_146 = arith.constant 0 : index
    %306 = vector.load %arg1[%c3_143, %c2_144, %c0_145, %c0_146] : memref<5x9x8x512xf32, #tpu.memory_space<vmem>>, vector<1x1x8x512xf32>
    %307 = vector.shape_cast %306 : vector<1x1x8x512xf32> to vector<8x512xf32>
    %308 = arith.mulf %305, %307 : vector<8x512xf32>
    %309 = arith.addf %304, %308 : vector<8x512xf32>
    %c1_i32_147 = arith.constant 1 : i32
    %310 = tpu.dynamic_rotate %291 by %c1_i32_147 dim 1 : vector<8x512xf32>, i32 -> vector<8x512xf32>
    %c3_148 = arith.constant 3 : index
    %c3_149 = arith.constant 3 : index
    %c0_150 = arith.constant 0 : index
    %c0_151 = arith.constant 0 : index
    %311 = vector.load %arg1[%c3_148, %c3_149, %c0_150, %c0_151] : memref<5x9x8x512xf32, #tpu.memory_space<vmem>>, vector<1x1x8x512xf32>
    %312 = vector.shape_cast %311 : vector<1x1x8x512xf32> to vector<8x512xf32>
    %313 = arith.mulf %310, %312 : vector<8x512xf32>
    %314 = arith.addf %309, %313 : vector<8x512xf32>
    %c511_i32_152 = arith.constant 511 : i32
    %315 = tpu.dynamic_rotate %291 by %c511_i32_152 dim 1 : vector<8x512xf32>, i32 -> vector<8x512xf32>
    %c3_153 = arith.constant 3 : index
    %c5_154 = arith.constant 5 : index
    %c0_155 = arith.constant 0 : index
    %c0_156 = arith.constant 0 : index
    %316 = vector.load %arg1[%c3_153, %c5_154, %c0_155, %c0_156] : memref<5x9x8x512xf32, #tpu.memory_space<vmem>>, vector<1x1x8x512xf32>
    %317 = vector.shape_cast %316 : vector<1x1x8x512xf32> to vector<8x512xf32>
    %318 = arith.mulf %315, %317 : vector<8x512xf32>
    %319 = arith.addf %314, %318 : vector<8x512xf32>
    %c497_i32_157 = arith.constant 497 : i32
    %320 = tpu.dynamic_rotate %291 by %c497_i32_157 dim 1 : vector<8x512xf32>, i32 -> vector<8x512xf32>
    %c3_158 = arith.constant 3 : index
    %c6_159 = arith.constant 6 : index
    %c0_160 = arith.constant 0 : index
    %c0_161 = arith.constant 0 : index
    %321 = vector.load %arg1[%c3_158, %c6_159, %c0_160, %c0_161] : memref<5x9x8x512xf32, #tpu.memory_space<vmem>>, vector<1x1x8x512xf32>
    %322 = vector.shape_cast %321 : vector<1x1x8x512xf32> to vector<8x512xf32>
    %323 = arith.mulf %320, %322 : vector<8x512xf32>
    %324 = arith.addf %319, %323 : vector<8x512xf32>
    %c496_i32_162 = arith.constant 496 : i32
    %325 = tpu.dynamic_rotate %291 by %c496_i32_162 dim 1 : vector<8x512xf32>, i32 -> vector<8x512xf32>
    %c3_163 = arith.constant 3 : index
    %c7_164 = arith.constant 7 : index
    %c0_165 = arith.constant 0 : index
    %c0_166 = arith.constant 0 : index
    %326 = vector.load %arg1[%c3_163, %c7_164, %c0_165, %c0_166] : memref<5x9x8x512xf32, #tpu.memory_space<vmem>>, vector<1x1x8x512xf32>
    %327 = vector.shape_cast %326 : vector<1x1x8x512xf32> to vector<8x512xf32>
    %328 = arith.mulf %325, %327 : vector<8x512xf32>
    %329 = arith.addf %324, %328 : vector<8x512xf32>
    %c495_i32_167 = arith.constant 495 : i32
    %330 = tpu.dynamic_rotate %291 by %c495_i32_167 dim 1 : vector<8x512xf32>, i32 -> vector<8x512xf32>
    %c3_168 = arith.constant 3 : index
    %c8_169 = arith.constant 8 : index
    %c0_170 = arith.constant 0 : index
    %c0_171 = arith.constant 0 : index
    %331 = vector.load %arg1[%c3_168, %c8_169, %c0_170, %c0_171] : memref<5x9x8x512xf32, #tpu.memory_space<vmem>>, vector<1x1x8x512xf32>
    %332 = vector.shape_cast %331 : vector<1x1x8x512xf32> to vector<8x512xf32>
    %333 = arith.mulf %330, %332 : vector<8x512xf32>
    %334 = arith.addf %329, %333 : vector<8x512xf32>
    %c3_172 = arith.constant 3 : index
    %c0_173 = arith.constant 0 : index
    %c0_174 = arith.constant 0 : index
    %335 = vector.load %arg2[%c3_172, %c0_173, %c0_174] : memref<5x8x128xf32, #tpu.memory_space<vmem>>, vector<1x8x128xf32>
    %336 = vector.shape_cast %335 : vector<1x8x128xf32> to vector<8x128xf32>
    %cst_175 = arith.constant 0.000000e+00 : f32
    %337 = vector.broadcast %cst_175 : f32 to vector<8x512xf32>
    %338 = vector.extract_strided_slice %336 {offsets = [0, 0], sizes = [8, 1], strides = [1, 1]} : vector<8x128xf32> to vector<8x1xf32>
    %339 = vector.extract_strided_slice %334 {offsets = [0, 0], sizes = [1, 512], strides = [1, 1]} : vector<8x512xf32> to vector<1x512xf32>
    %340 = vector.broadcast %338 : vector<8x1xf32> to vector<8x512xf32>
    %341 = vector.broadcast %339 : vector<1x512xf32> to vector<8x512xf32>
    %342 = arith.mulf %340, %341 : vector<8x512xf32>
    %343 = arith.addf %337, %342 : vector<8x512xf32>
    %344 = vector.extract_strided_slice %336 {offsets = [0, 1], sizes = [8, 1], strides = [1, 1]} : vector<8x128xf32> to vector<8x1xf32>
    %345 = vector.extract_strided_slice %334 {offsets = [1, 0], sizes = [1, 512], strides = [1, 1]} : vector<8x512xf32> to vector<1x512xf32>
    %346 = vector.broadcast %344 : vector<8x1xf32> to vector<8x512xf32>
    %347 = vector.broadcast %345 : vector<1x512xf32> to vector<8x512xf32>
    %348 = arith.mulf %346, %347 : vector<8x512xf32>
    %349 = arith.addf %343, %348 : vector<8x512xf32>
    %350 = vector.extract_strided_slice %336 {offsets = [0, 2], sizes = [8, 1], strides = [1, 1]} : vector<8x128xf32> to vector<8x1xf32>
    %351 = vector.extract_strided_slice %334 {offsets = [2, 0], sizes = [1, 512], strides = [1, 1]} : vector<8x512xf32> to vector<1x512xf32>
    %352 = vector.broadcast %350 : vector<8x1xf32> to vector<8x512xf32>
    %353 = vector.broadcast %351 : vector<1x512xf32> to vector<8x512xf32>
    %354 = arith.mulf %352, %353 : vector<8x512xf32>
    %355 = arith.addf %349, %354 : vector<8x512xf32>
    %356 = vector.extract_strided_slice %336 {offsets = [0, 3], sizes = [8, 1], strides = [1, 1]} : vector<8x128xf32> to vector<8x1xf32>
    %357 = vector.extract_strided_slice %334 {offsets = [3, 0], sizes = [1, 512], strides = [1, 1]} : vector<8x512xf32> to vector<1x512xf32>
    %358 = vector.broadcast %356 : vector<8x1xf32> to vector<8x512xf32>
    %359 = vector.broadcast %357 : vector<1x512xf32> to vector<8x512xf32>
    %360 = arith.mulf %358, %359 : vector<8x512xf32>
    %361 = arith.addf %355, %360 : vector<8x512xf32>
    %362 = vector.extract_strided_slice %336 {offsets = [0, 4], sizes = [8, 1], strides = [1, 1]} : vector<8x128xf32> to vector<8x1xf32>
    %363 = vector.extract_strided_slice %334 {offsets = [4, 0], sizes = [1, 512], strides = [1, 1]} : vector<8x512xf32> to vector<1x512xf32>
    %364 = vector.broadcast %362 : vector<8x1xf32> to vector<8x512xf32>
    %365 = vector.broadcast %363 : vector<1x512xf32> to vector<8x512xf32>
    %366 = arith.mulf %364, %365 : vector<8x512xf32>
    %367 = arith.addf %361, %366 : vector<8x512xf32>
    %368 = vector.extract_strided_slice %336 {offsets = [0, 5], sizes = [8, 1], strides = [1, 1]} : vector<8x128xf32> to vector<8x1xf32>
    %369 = vector.extract_strided_slice %334 {offsets = [5, 0], sizes = [1, 512], strides = [1, 1]} : vector<8x512xf32> to vector<1x512xf32>
    %370 = vector.broadcast %368 : vector<8x1xf32> to vector<8x512xf32>
    %371 = vector.broadcast %369 : vector<1x512xf32> to vector<8x512xf32>
    %372 = arith.mulf %370, %371 : vector<8x512xf32>
    %373 = arith.addf %367, %372 : vector<8x512xf32>
    %374 = vector.extract_strided_slice %336 {offsets = [0, 6], sizes = [8, 1], strides = [1, 1]} : vector<8x128xf32> to vector<8x1xf32>
    %375 = vector.extract_strided_slice %334 {offsets = [6, 0], sizes = [1, 512], strides = [1, 1]} : vector<8x512xf32> to vector<1x512xf32>
    %376 = vector.broadcast %374 : vector<8x1xf32> to vector<8x512xf32>
    %377 = vector.broadcast %375 : vector<1x512xf32> to vector<8x512xf32>
    %378 = arith.mulf %376, %377 : vector<8x512xf32>
    %379 = arith.addf %373, %378 : vector<8x512xf32>
    %380 = vector.extract_strided_slice %336 {offsets = [0, 7], sizes = [8, 1], strides = [1, 1]} : vector<8x128xf32> to vector<8x1xf32>
    %381 = vector.extract_strided_slice %334 {offsets = [7, 0], sizes = [1, 512], strides = [1, 1]} : vector<8x512xf32> to vector<1x512xf32>
    %382 = vector.broadcast %380 : vector<8x1xf32> to vector<8x512xf32>
    %383 = vector.broadcast %381 : vector<1x512xf32> to vector<8x512xf32>
    %384 = arith.mulf %382, %383 : vector<8x512xf32>
    %385 = arith.addf %379, %384 : vector<8x512xf32>
    %386 = vector.extract_strided_slice %336 {offsets = [0, 8], sizes = [8, 1], strides = [1, 1]} : vector<8x128xf32> to vector<8x1xf32>
    %387 = vector.broadcast %386 : vector<8x1xf32> to vector<8x512xf32>
    %388 = arith.addf %385, %387 : vector<8x512xf32>
    %c4_176 = arith.constant 4 : index
    %c4_177 = arith.constant 4 : index
    %c0_178 = arith.constant 0 : index
    %c0_179 = arith.constant 0 : index
    %389 = vector.load %arg1[%c4_176, %c4_177, %c0_178, %c0_179] : memref<5x9x8x512xf32, #tpu.memory_space<vmem>>, vector<1x1x8x512xf32>
    %390 = vector.shape_cast %389 : vector<1x1x8x512xf32> to vector<8x512xf32>
    %391 = arith.mulf %388, %390 : vector<8x512xf32>
    %c17_i32_180 = arith.constant 17 : i32
    %392 = tpu.dynamic_rotate %388 by %c17_i32_180 dim 1 : vector<8x512xf32>, i32 -> vector<8x512xf32>
    %c4_181 = arith.constant 4 : index
    %c0_182 = arith.constant 0 : index
    %c0_183 = arith.constant 0 : index
    %c0_184 = arith.constant 0 : index
    %393 = vector.load %arg1[%c4_181, %c0_182, %c0_183, %c0_184] : memref<5x9x8x512xf32, #tpu.memory_space<vmem>>, vector<1x1x8x512xf32>
    %394 = vector.shape_cast %393 : vector<1x1x8x512xf32> to vector<8x512xf32>
    %395 = arith.mulf %392, %394 : vector<8x512xf32>
    %396 = arith.addf %391, %395 : vector<8x512xf32>
    %c16_i32_185 = arith.constant 16 : i32
    %397 = tpu.dynamic_rotate %388 by %c16_i32_185 dim 1 : vector<8x512xf32>, i32 -> vector<8x512xf32>
    %c4_186 = arith.constant 4 : index
    %c1_187 = arith.constant 1 : index
    %c0_188 = arith.constant 0 : index
    %c0_189 = arith.constant 0 : index
    %398 = vector.load %arg1[%c4_186, %c1_187, %c0_188, %c0_189] : memref<5x9x8x512xf32, #tpu.memory_space<vmem>>, vector<1x1x8x512xf32>
    %399 = vector.shape_cast %398 : vector<1x1x8x512xf32> to vector<8x512xf32>
    %400 = arith.mulf %397, %399 : vector<8x512xf32>
    %401 = arith.addf %396, %400 : vector<8x512xf32>
    %c15_i32_190 = arith.constant 15 : i32
    %402 = tpu.dynamic_rotate %388 by %c15_i32_190 dim 1 : vector<8x512xf32>, i32 -> vector<8x512xf32>
    %c4_191 = arith.constant 4 : index
    %c2_192 = arith.constant 2 : index
    %c0_193 = arith.constant 0 : index
    %c0_194 = arith.constant 0 : index
    %403 = vector.load %arg1[%c4_191, %c2_192, %c0_193, %c0_194] : memref<5x9x8x512xf32, #tpu.memory_space<vmem>>, vector<1x1x8x512xf32>
    %404 = vector.shape_cast %403 : vector<1x1x8x512xf32> to vector<8x512xf32>
    %405 = arith.mulf %402, %404 : vector<8x512xf32>
    %406 = arith.addf %401, %405 : vector<8x512xf32>
    %c1_i32_195 = arith.constant 1 : i32
    %407 = tpu.dynamic_rotate %388 by %c1_i32_195 dim 1 : vector<8x512xf32>, i32 -> vector<8x512xf32>
    %c4_196 = arith.constant 4 : index
    %c3_197 = arith.constant 3 : index
    %c0_198 = arith.constant 0 : index
    %c0_199 = arith.constant 0 : index
    %408 = vector.load %arg1[%c4_196, %c3_197, %c0_198, %c0_199] : memref<5x9x8x512xf32, #tpu.memory_space<vmem>>, vector<1x1x8x512xf32>
    %409 = vector.shape_cast %408 : vector<1x1x8x512xf32> to vector<8x512xf32>
    %410 = arith.mulf %407, %409 : vector<8x512xf32>
    %411 = arith.addf %406, %410 : vector<8x512xf32>
    %c511_i32_200 = arith.constant 511 : i32
    %412 = tpu.dynamic_rotate %388 by %c511_i32_200 dim 1 : vector<8x512xf32>, i32 -> vector<8x512xf32>
    %c4_201 = arith.constant 4 : index
    %c5_202 = arith.constant 5 : index
    %c0_203 = arith.constant 0 : index
    %c0_204 = arith.constant 0 : index
    %413 = vector.load %arg1[%c4_201, %c5_202, %c0_203, %c0_204] : memref<5x9x8x512xf32, #tpu.memory_space<vmem>>, vector<1x1x8x512xf32>
    %414 = vector.shape_cast %413 : vector<1x1x8x512xf32> to vector<8x512xf32>
    %415 = arith.mulf %412, %414 : vector<8x512xf32>
    %416 = arith.addf %411, %415 : vector<8x512xf32>
    %c497_i32_205 = arith.constant 497 : i32
    %417 = tpu.dynamic_rotate %388 by %c497_i32_205 dim 1 : vector<8x512xf32>, i32 -> vector<8x512xf32>
    %c4_206 = arith.constant 4 : index
    %c6_207 = arith.constant 6 : index
    %c0_208 = arith.constant 0 : index
    %c0_209 = arith.constant 0 : index
    %418 = vector.load %arg1[%c4_206, %c6_207, %c0_208, %c0_209] : memref<5x9x8x512xf32, #tpu.memory_space<vmem>>, vector<1x1x8x512xf32>
    %419 = vector.shape_cast %418 : vector<1x1x8x512xf32> to vector<8x512xf32>
    %420 = arith.mulf %417, %419 : vector<8x512xf32>
    %421 = arith.addf %416, %420 : vector<8x512xf32>
    %c496_i32_210 = arith.constant 496 : i32
    %422 = tpu.dynamic_rotate %388 by %c496_i32_210 dim 1 : vector<8x512xf32>, i32 -> vector<8x512xf32>
    %c4_211 = arith.constant 4 : index
    %c7_212 = arith.constant 7 : index
    %c0_213 = arith.constant 0 : index
    %c0_214 = arith.constant 0 : index
    %423 = vector.load %arg1[%c4_211, %c7_212, %c0_213, %c0_214] : memref<5x9x8x512xf32, #tpu.memory_space<vmem>>, vector<1x1x8x512xf32>
    %424 = vector.shape_cast %423 : vector<1x1x8x512xf32> to vector<8x512xf32>
    %425 = arith.mulf %422, %424 : vector<8x512xf32>
    %426 = arith.addf %421, %425 : vector<8x512xf32>
    %c495_i32_215 = arith.constant 495 : i32
    %427 = tpu.dynamic_rotate %388 by %c495_i32_215 dim 1 : vector<8x512xf32>, i32 -> vector<8x512xf32>
    %c4_216 = arith.constant 4 : index
    %c8_217 = arith.constant 8 : index
    %c0_218 = arith.constant 0 : index
    %c0_219 = arith.constant 0 : index
    %428 = vector.load %arg1[%c4_216, %c8_217, %c0_218, %c0_219] : memref<5x9x8x512xf32, #tpu.memory_space<vmem>>, vector<1x1x8x512xf32>
    %429 = vector.shape_cast %428 : vector<1x1x8x512xf32> to vector<8x512xf32>
    %430 = arith.mulf %427, %429 : vector<8x512xf32>
    %431 = arith.addf %426, %430 : vector<8x512xf32>
    %c4_220 = arith.constant 4 : index
    %c0_221 = arith.constant 0 : index
    %c0_222 = arith.constant 0 : index
    %432 = vector.load %arg2[%c4_220, %c0_221, %c0_222] : memref<5x8x128xf32, #tpu.memory_space<vmem>>, vector<1x8x128xf32>
    %433 = vector.shape_cast %432 : vector<1x8x128xf32> to vector<8x128xf32>
    %cst_223 = arith.constant 0.000000e+00 : f32
    %434 = vector.broadcast %cst_223 : f32 to vector<8x512xf32>
    %435 = vector.extract_strided_slice %433 {offsets = [0, 0], sizes = [8, 1], strides = [1, 1]} : vector<8x128xf32> to vector<8x1xf32>
    %436 = vector.extract_strided_slice %431 {offsets = [0, 0], sizes = [1, 512], strides = [1, 1]} : vector<8x512xf32> to vector<1x512xf32>
    %437 = vector.broadcast %435 : vector<8x1xf32> to vector<8x512xf32>
    %438 = vector.broadcast %436 : vector<1x512xf32> to vector<8x512xf32>
    %439 = arith.mulf %437, %438 : vector<8x512xf32>
    %440 = arith.addf %434, %439 : vector<8x512xf32>
    %441 = vector.extract_strided_slice %433 {offsets = [0, 1], sizes = [8, 1], strides = [1, 1]} : vector<8x128xf32> to vector<8x1xf32>
    %442 = vector.extract_strided_slice %431 {offsets = [1, 0], sizes = [1, 512], strides = [1, 1]} : vector<8x512xf32> to vector<1x512xf32>
    %443 = vector.broadcast %441 : vector<8x1xf32> to vector<8x512xf32>
    %444 = vector.broadcast %442 : vector<1x512xf32> to vector<8x512xf32>
    %445 = arith.mulf %443, %444 : vector<8x512xf32>
    %446 = arith.addf %440, %445 : vector<8x512xf32>
    %447 = vector.extract_strided_slice %433 {offsets = [0, 2], sizes = [8, 1], strides = [1, 1]} : vector<8x128xf32> to vector<8x1xf32>
    %448 = vector.extract_strided_slice %431 {offsets = [2, 0], sizes = [1, 512], strides = [1, 1]} : vector<8x512xf32> to vector<1x512xf32>
    %449 = vector.broadcast %447 : vector<8x1xf32> to vector<8x512xf32>
    %450 = vector.broadcast %448 : vector<1x512xf32> to vector<8x512xf32>
    %451 = arith.mulf %449, %450 : vector<8x512xf32>
    %452 = arith.addf %446, %451 : vector<8x512xf32>
    %453 = vector.extract_strided_slice %433 {offsets = [0, 3], sizes = [8, 1], strides = [1, 1]} : vector<8x128xf32> to vector<8x1xf32>
    %454 = vector.extract_strided_slice %431 {offsets = [3, 0], sizes = [1, 512], strides = [1, 1]} : vector<8x512xf32> to vector<1x512xf32>
    %455 = vector.broadcast %453 : vector<8x1xf32> to vector<8x512xf32>
    %456 = vector.broadcast %454 : vector<1x512xf32> to vector<8x512xf32>
    %457 = arith.mulf %455, %456 : vector<8x512xf32>
    %458 = arith.addf %452, %457 : vector<8x512xf32>
    %459 = vector.extract_strided_slice %433 {offsets = [0, 4], sizes = [8, 1], strides = [1, 1]} : vector<8x128xf32> to vector<8x1xf32>
    %460 = vector.extract_strided_slice %431 {offsets = [4, 0], sizes = [1, 512], strides = [1, 1]} : vector<8x512xf32> to vector<1x512xf32>
    %461 = vector.broadcast %459 : vector<8x1xf32> to vector<8x512xf32>
    %462 = vector.broadcast %460 : vector<1x512xf32> to vector<8x512xf32>
    %463 = arith.mulf %461, %462 : vector<8x512xf32>
    %464 = arith.addf %458, %463 : vector<8x512xf32>
    %465 = vector.extract_strided_slice %433 {offsets = [0, 5], sizes = [8, 1], strides = [1, 1]} : vector<8x128xf32> to vector<8x1xf32>
    %466 = vector.extract_strided_slice %431 {offsets = [5, 0], sizes = [1, 512], strides = [1, 1]} : vector<8x512xf32> to vector<1x512xf32>
    %467 = vector.broadcast %465 : vector<8x1xf32> to vector<8x512xf32>
    %468 = vector.broadcast %466 : vector<1x512xf32> to vector<8x512xf32>
    %469 = arith.mulf %467, %468 : vector<8x512xf32>
    %470 = arith.addf %464, %469 : vector<8x512xf32>
    %471 = vector.extract_strided_slice %433 {offsets = [0, 6], sizes = [8, 1], strides = [1, 1]} : vector<8x128xf32> to vector<8x1xf32>
    %472 = vector.extract_strided_slice %431 {offsets = [6, 0], sizes = [1, 512], strides = [1, 1]} : vector<8x512xf32> to vector<1x512xf32>
    %473 = vector.broadcast %471 : vector<8x1xf32> to vector<8x512xf32>
    %474 = vector.broadcast %472 : vector<1x512xf32> to vector<8x512xf32>
    %475 = arith.mulf %473, %474 : vector<8x512xf32>
    %476 = arith.addf %470, %475 : vector<8x512xf32>
    %477 = vector.extract_strided_slice %433 {offsets = [0, 7], sizes = [8, 1], strides = [1, 1]} : vector<8x128xf32> to vector<8x1xf32>
    %478 = vector.extract_strided_slice %431 {offsets = [7, 0], sizes = [1, 512], strides = [1, 1]} : vector<8x512xf32> to vector<1x512xf32>
    %479 = vector.broadcast %477 : vector<8x1xf32> to vector<8x512xf32>
    %480 = vector.broadcast %478 : vector<1x512xf32> to vector<8x512xf32>
    %481 = arith.mulf %479, %480 : vector<8x512xf32>
    %482 = arith.addf %476, %481 : vector<8x512xf32>
    %483 = vector.extract_strided_slice %433 {offsets = [0, 8], sizes = [8, 1], strides = [1, 1]} : vector<8x128xf32> to vector<8x1xf32>
    %484 = vector.broadcast %483 : vector<8x1xf32> to vector<8x512xf32>
    %485 = arith.addf %482, %484 : vector<8x512xf32>
    %c0_224 = arith.constant 0 : index
    %c0_225 = arith.constant 0 : index
    %486 = vector.load %arg3[%c0_224, %c0_225] : memref<8x512xf32, #tpu.memory_space<vmem>>, vector<8x512xf32>
    tpu.vector_store %arg3[%c0_224, %c0_225], %485 {strides = array<i32>} : memref<8x512xf32, #tpu.memory_space<vmem>>, vector<8x512xf32>,
    return
  }
}

</mosaic_0001>

<bundles_post_ra>
// kernel: tpu_custom_call.1
= control target key start
LH: loop header
LB: loop body
LE: loop exit
PB: predicated region body
PF: predicated region fallthrough
CT: control target
= control target key end

     0   :  { %8 = vsyncpa [#allocation3], 0  ;;  %s3426_s0 = inlined_call_operand.hbm [shape: f32[8,512], index: 0, kind: input, shape index: {}]   ;;  %s3427_s1 = inlined_call_operand.hbm [shape: f32[5,9,8,512], index: 1, kind: input, shape index: {}]   ;;  %s3428_s2 = inlined_call_operand.hbm [shape: f32[5,8,128], index: 2, kind: input, shape index: {}]   ;;  %s3429_s3 = inlined_call_operand.hbm [shape: f32[8,512], index: 3, kind: output, shape index: {}]  }
   0x1   :  { %9 = vsyncpa [#allocation6], 0  ;;  %s26_s14 = sshll.u32 %s3427_s1, 4  ;;  %s27_s14 = int_to_ptr.hbm [resolvable:$true] %s26_s14 }
   0x2   :  { %10 = vsyncpa [#allocation4], 0  ;;  %s2007_s15 = smov [#allocation5]   ;;  %s16_s19 = sshll.u32 %s3426_s0, 4  ;;  %s17_s19 = int_to_ptr.hbm [resolvable:$true] %s16_s19 }
   0x3   :  { %s28_s16 = sshll.u32 %s2007_s15, 4  ;;  %s2008_s20 = smov 512   ;;  %s29_s16 = int_to_ptr.vmem [resolvable:$true] %s28_s16 }
   0x4   :  { %s2009_s21 = smov 32   ;;  %s2010_s22 = smov [#allocation2]  }
   0x5   :  { %34 = dma.hbm_to_vmem [thread:$0]  %s27_s14, 23040, %s29_s16, [#allocation6], %s2008_s20, %s2008_s20, %s2009_s21  }
   0x6   :  { %s18_s23 = sshll.u32 %s2010_s22, 4  ;;  %s39_s26 = sshll.u32 %s3428_s2, 4  ;;  %s19_s23 = int_to_ptr.vmem [resolvable:$true] %s18_s23  ;;  %s40_s26 = int_to_ptr.hbm [resolvable:$true] %s39_s26 }
   0x7   :  { %21 = dma.hbm_to_vmem [thread:$0]  %s17_s19, 512, %s19_s23, [#allocation3]  }
   0x8   :  { %s2011_s1 = smov [#allocation7]   ;;  %s2012_s28 = smov 128  }
   0x9   :  { %s41_s27 = sshll.u32 %s2011_s1, 4  ;;  %s2013_s29 = smov 8   ;;  %s42_s27 = int_to_ptr.vmem [resolvable:$true] %s41_s27 }
   0xa   :  { %47 = dma.hbm_to_vmem [thread:$0]  %s40_s26, 640, %s42_s27, [#allocation6], %s2012_s28, %s2012_s28, %s2013_s29  }
   0xb   :  { %2001 = dma.done.wait [#allocation3], 512  }
   0xc   :  { %2002 = vsyncadd [#allocation3], 4294966784 }
   0xd   :  { %2003 = dma.done.wait [#allocation6], 23680  }
   0xe   :  { %2004 = vsyncadd [#allocation6], 4294943616  ;;  %v2061_v0 = vld [vmem:[#allocation2 + $0x10] sm:$0xff]  ;;  %v2063_v1 = vld [vmem:[#allocation2] sm:$0xff]  ;;  %s2014_s0 = smov 17   ;;  %s2015_s2 = smov 16   ;;  %v81_v33 = vlaneseq }
   0xf   :  { %77 = vrot.lane.b32.xlu1 %v2061_v0, %s2014_s0  ;;  %73 = vrot.lane.b32.xlu0 %v2063_v1, %s2014_s0  ;;  %v2071_v2 = vld [vmem:[#allocation2 + $0x18] sm:$0xff]  ;;  %v2073_v3 = vld [vmem:[#allocation2 + $0x8] sm:$0xff]  ;;  %s2016_s30 = smov 15   ;;  %s2017_s4 = smov 1   ;;  %v2020_v4 = vmov 0   ;;  %v2021_v5 = vmov 2  }
  0x10   :  { %100 = vrot.lane.b32.xlu2 %v2063_v1, %s2015_s2  ;;  %s2018_s5 = smov 127   ;;  %s2019_s6 = smov 113   ;;  %1861 = vset.pattern.permute.xlu1 %v2021_v5  ;;  %v2022_v6 = vmov 1   ;;  %v282_v7 = vld [vmem:[#allocation7] sm:$0xff]  ;;  %v2025_v8 = vmov 3   ;;  %v2026_v10 = vmov 4  }
  0x11   :  { %1859 = vset.pattern.permute.xlu2 %v2020_v4  ;;  %1860 = vset.pattern.permute.xlu0 %v2022_v6  ;;  %s2023_s7 = smov 112   ;;  %s2024_s8 = smov 111   ;;  %v2027_v11 = vmov 6   ;;  %v2028_v12 = vmov 5   ;;  %v3430_v14 = vmov 7   ;;  %v2030_v15 = vmov 8  }
  0x12   :  { %v2167_v35 = vand.u32 127, %v81_v33  ;;  %v65_v38 = vld [vmem:[#allocation5 + $0x80] sm:$0xff]  ;;  %v66_v41 = vld [vmem:[#allocation5 + $0x88] sm:$0xff]  ;;  %v68_v44 = vld [vmem:[#allocation5 + $0x98] sm:$0xff]  ;;  %s2031_s9 = smov [#allocation8]   ;;  %s1823_s13 = sshll.u32 %s3429_s3, 4  ;;  %s1824_s13 = int_to_ptr.hbm [resolvable:$true] %s1823_s13 }
  0x13   :  { %v88_v39 = vld [vmem:[#allocation5] sm:$0xff]  ;;  %v89_v42 = vld [vmem:[#allocation5 + $0x8] sm:$0xff]  ;;  %v67_v45 = vld [vmem:[#allocation5 + $0x90] sm:$0xff]  ;;  %v69_v50 = vmul.f32 %v65_v38, %v2063_v1  ;;  %v70_v55 = vmul.f32 %v66_v41, %v2073_v3  ;;  %v72_v59 = vmul.f32 %v68_v44, %v2071_v2  ;;  %s1821_s10 = sshll.u32 %s2031_s9, 4  ;;  %s1822_s10 = int_to_ptr.vmem [resolvable:$true] %s1821_s10 }
  0x14   :  { %vm83_vm0 = vcmp.lt.s32.totalorder %v2167_v35, 17  ;;  %vm108_vm1 = vcmp.lt.s32.totalorder %v2167_v35, 16  ;;  %v114_v46 = vld [vmem:[#allocation5 + $0x20] sm:$0xff]  ;;  %vm134_vm2 = vcmp.lt.s32.totalorder %v2167_v35, 15  ;;  %v91_v49 = vld [vmem:[#allocation5 + $0x18] sm:$0xff]  ;;  %v90_v56 = vld [vmem:[#allocation5 + $0x10] sm:$0xff]  ;;  %v71_v60 = vmul.f32 %v67_v45, %v2061_v0 }
  0x15   :  { %v117_v62 = vld [vmem:[#allocation5 + $0x38] sm:$0xff]  ;;  %v141_v38 = vld [vmem:[#allocation5 + $0x48] sm:$0xff]  ;;  %v142_v41 = vld [vmem:[#allocation5 + $0x50] sm:$0xff]  ;;  %vm160_vm3 = vcmp.lt.s32.totalorder %v2167_v35, 1  ;;  %vm212_vm4 = vcmp.lt.s32.totalorder %v2167_v35, 113  ;;  %vm186_vm5 = vcmp.lt.s32.totalorder %v2167_v35, 127 }
  0x16   :  { %vm238_vm6 = vcmp.lt.s32.totalorder %v2167_v35, 112  ;;  %vm264_vm7 = vcmp.lt.s32.totalorder %v2167_v35, 111 }
  0x17   :  { %79 = vrot.lane.b32.xlu1 %v2071_v2, %s2014_s0  ;;  %75 = vrot.lane.b32.xlu0 %v2073_v3, %s2014_s0 }
  0x18   :  { %102 = vrot.lane.b32.xlu2 %v2073_v3, %s2015_s2 }
  0x1f   :  { %106 = vrot.lane.b32.xlu1 %v2071_v2, %s2015_s2  ;;  %104 = vrot.lane.b32.xlu0 %v2061_v0, %s2015_s2 }
  0x20   :  { %126 = vrot.lane.b32.xlu2 %v2063_v1, %s2016_s30 }
  0x27   :  { %130 = vrot.lane.b32.xlu1 %v2061_v0, %s2016_s30  ;;  %128 = vrot.lane.b32.xlu0 %v2073_v3, %s2016_s30 }
  0x28   :  { %132 = vrot.lane.b32.xlu2 %v2071_v2, %s2016_s30 }
  0x2f   :  { %154 = vrot.lane.b32.xlu1 %v2073_v3, %s2017_s4  ;;  %152 = vrot.lane.b32.xlu0 %v2063_v1, %s2017_s4 }
  0x30   :  { %156 = vrot.lane.b32.xlu2 %v2061_v0, %s2017_s4 }
  0x37   :  { %178 = vrot.lane.b32.xlu1 %v2063_v1, %s2018_s5  ;;  %158 = vrot.lane.b32.xlu0 %v2071_v2, %s2017_s4 }
  0x38   :  { %180 = vrot.lane.b32.xlu2 %v2073_v3, %s2018_s5 }
  0x3f   :  { %184 = vrot.lane.b32.xlu1 %v2071_v2, %s2018_s5  ;;  %182 = vrot.lane.b32.xlu0 %v2061_v0, %s2018_s5 }
  0x40   :  { %204 = vrot.lane.b32.xlu2 %v2063_v1, %s2019_s6 }
  0x47   :  { %208 = vrot.lane.b32.xlu1 %v2061_v0, %s2019_s6  ;;  %206 = vrot.lane.b32.xlu0 %v2073_v3, %s2019_s6 }
  0x48   :  { %210 = vrot.lane.b32.xlu2 %v2071_v2, %s2019_s6 }
  0x4f   :  { %232 = vrot.lane.b32.xlu1 %v2073_v3, %s2023_s7  ;;  %230 = vrot.lane.b32.xlu0 %v2063_v1, %s2023_s7 }
  0x50   :  { %234 = vrot.lane.b32.xlu2 %v2061_v0, %s2023_s7 }
  0x57   :  { %256 = vrot.lane.b32.xlu1 %v2063_v1, %s2024_s8  ;;  %236 = vrot.lane.b32.xlu0 %v2071_v2, %s2023_s7  ;;  %v115_v1 = vld [vmem:[#allocation5 + $0x28] sm:$0xff] }
  0x58   :  { %258 = vrot.lane.b32.xlu2 %v2073_v3, %s2024_s8 }
  0x5f   :  { %262 = vrot.lane.b32.xlu1 %v2071_v2, %s2024_s8  ;;  %260 = vrot.lane.b32.xlu0 %v2061_v0, %s2024_s8  ;;  %v116_v2 = vld [vmem:[#allocation5 + $0x30] sm:$0xff] }
  0x60   :  { %285 = vperm.xlu2 %1859, %v282_v7  }
  0x67   :  { %317 = vperm.xlu1 %1861, %v282_v7   ;;  %301 = vperm.xlu0 %1860, %v282_v7  }
  0x68   :  { %1862 = vset.pattern.permute.xlu2 %v2025_v8 }
  0x69   :  { %333 = vperm.xlu2 %1862, %v282_v7  }
  0x6a   :  { %v2137_v9 = vpop.permute.xlu2 %100 }
  0x6f   :  { %1863 = vset.pattern.permute.xlu1 %v2026_v10  ;;  %1865 = vset.pattern.permute.xlu0 %v2027_v11 }
  0x70   :  { %349 = vperm.xlu1 %1863, %v282_v7   ;;  %381 = vperm.xlu0 %1865, %v282_v7  }
  0x71   :  { %1864 = vset.pattern.permute.xlu2 %v2028_v12 }
  0x72   :  { %365 = vperm.xlu2 %1864, %v282_v7   ;;  %v2142_v13 = vpop.permute.xlu2 %102 }
  0x73   :  { %v111_v3 = vsel %vm108_vm1, %v2137_v9, %v2142_v13 }
  0x78   :  { %1866 = vset.pattern.permute.xlu1 %v3430_v14  ;;  %1868 = vset.pattern.permute.xlu0 %v2020_v4 }
  0x79   :  { %397 = vperm.xlu1 %1866, %v282_v7  }
  0x7a   :  { %1867 = vset.pattern.permute.xlu2 %v2030_v15  ;;  %v2147_v16 = vpop.permute.xlu2 %126 }
  0x7b   :  { %413 = vperm.xlu2 %1867, %v282_v7   ;;  %v140_v7 = vld [vmem:[#allocation5 + $0x40] sm:$0xff] }
  0x81   :  { %v78_v17 = vpop.permute.xlu1 %77  ;;  %v74_v18 = vpop.permute.xlu0 %73  ;;  %1869 = vset.pattern.permute.xlu1 %v2022_v6 }
  0x82   :  { %v133_v19 = vpop.permute.xlu2 %132 }
  0x83   :  { %1870 = vset.pattern.permute.xlu2 %v2021_v5 }
  0x89   :  { %v80_v20 = vpop.permute.xlu1 %79  ;;  %v76_v21 = vpop.permute.xlu0 %75 }
  0x8a   :  { %v2151_v22 = vpop.permute.xlu2 %156  ;;  %v87_v40 = vsel %vm83_vm0, %v80_v20, %v74_v18  ;;  %v86_v43 = vsel %vm83_vm0, %v74_v18, %v76_v21  ;;  %v84_v51 = vsel %vm83_vm0, %v78_v17, %v80_v20  ;;  %v85_v57 = vsel %vm83_vm0, %v76_v21, %v78_v17 }
  0x8b   :  { %v92_v52 = vmul.f32 %v88_v39, %v87_v40  ;;  %v93_v58 = vmul.f32 %v89_v42, %v86_v43  ;;  %v138_v17 = vsel %vm134_vm2, %v133_v19, %v2147_v16  ;;  %v95_v18 = vmul.f32 %v91_v49, %v84_v51  ;;  %v167_v51 = vld [vmem:[#allocation5 + $0x68] sm:$0xff] }
  0x8c   :  { %v94_v21 = vmul.f32 %v90_v56, %v85_v57  ;;  %v168_v57 = vld [vmem:[#allocation5 + $0x70] sm:$0xff] }
  0x8d   :  { %v96_v20 = vadd.f32 %v92_v52, %v69_v50  ;;  %v97_v39 = vadd.f32 %v93_v58, %v70_v55  ;;  %v99_v45 = vadd.f32 %v95_v18, %v72_v59 }
  0x8e   :  { %v98_v49 = vadd.f32 %v94_v21, %v71_v60  ;;  %v169_v60 = vld [vmem:[#allocation5 + $0x78] sm:$0xff] }
  0x91   :  { %v107_v23 = vpop.permute.xlu1 %106  ;;  %v105_v24 = vpop.permute.xlu0 %104 }
  0x92   :  { %v2153_v27 = vpop.permute.xlu2 %180  ;;  %v112_v47 = vsel %vm108_vm1, %v107_v23, %v2137_v9  ;;  %v109_v63 = vsel %vm108_vm1, %v105_v24, %v107_v23  ;;  %v110_v0 = vsel %vm108_vm1, %v2142_v13, %v105_v24  ;;  %v143_v23 = vld [vmem:[#allocation5 + $0x58] sm:$0xff]  ;;  %v119_v13 = vmul.f32 %v115_v1, %v111_v3 }
  0x93   :  { %v118_v61 = vmul.f32 %v114_v46, %v112_v47  ;;  %v121_v40 = vmul.f32 %v117_v62, %v109_v63  ;;  %v144_v24 = vmul.f32 %v140_v7, %v138_v17  ;;  %v120_v44 = vmul.f32 %v116_v2, %v110_v0  ;;  %v166_v47 = vld [vmem:[#allocation5 + $0x60] sm:$0xff]  ;;  %v221_v17 = vld [vmem:[#allocation5 + $0xd8] sm:$0xff] }
  0x94   :  { %v123_v56 = vadd.f32 %v119_v13, %v97_v39  ;;  %v195_v0 = vld [vmem:[#allocation5 + $0xb8] sm:$0xff] }
  0x95   :  { %v122_v43 = vadd.f32 %v118_v61, %v96_v20  ;;  %v125_v55 = vadd.f32 %v121_v40, %v99_v45  ;;  %v124_v59 = vadd.f32 %v120_v44, %v98_v49 }
  0x97   :  { %v148_v61 = vadd.f32 %v144_v24, %v122_v43  ;;  %v219_v24 = vld [vmem:[#allocation5 + $0xc8] sm:$0xff]  ;;  %v244_v43 = vld [vmem:[#allocation5 + $0xe0] sm:$0xff] }
  0x99   :  { %v131_v25 = vpop.permute.xlu1 %130  ;;  %v129_v26 = vpop.permute.xlu0 %128 }
  0x9a   :  { %v2159_v30 = vpop.permute.xlu2 %204  ;;  %v135_v33 = vsel %vm134_vm2, %v131_v25, %v133_v19  ;;  %v137_v9 = vsel %vm134_vm2, %v2147_v16, %v129_v26  ;;  %v136_v42 = vsel %vm134_vm2, %v129_v26, %v131_v25 }
  0x9b   :  { %v147_v46 = vmul.f32 %v143_v23, %v135_v33  ;;  %v145_v19 = vmul.f32 %v141_v38, %v137_v9  ;;  %v146_v50 = vmul.f32 %v142_v41, %v136_v42  ;;  %v193_v23 = vld [vmem:[#allocation5 + $0xa8] sm:$0xff]  ;;  %v218_v38 = vld [vmem:[#allocation5 + $0xc0] sm:$0xff]  ;;  %v194_v41 = vld [vmem:[#allocation5 + $0xb0] sm:$0xff] }
  0x9d   :  { %v151_v1 = vadd.f32 %v147_v46, %v125_v55  ;;  %v149_v3 = vadd.f32 %v145_v19, %v123_v56  ;;  %v150_v18 = vadd.f32 %v146_v50, %v124_v59  ;;  %v220_v46 = vld [vmem:[#allocation5 + $0xd0] sm:$0xff]  ;;  %v245_v50 = vld [vmem:[#allocation5 + $0xe8] sm:$0xff] }
  0xa1   :  { %v2155_v28 = vpop.permute.xlu1 %154  ;;  %v2157_v29 = vpop.permute.xlu0 %152 }
  0xa2   :  { %v2165_v34 = vpop.permute.xlu2 %210  ;;  %v163_v25 = vsel %vm160_vm3, %v2157_v29, %v2155_v28  ;;  %v162_v58 = vsel %vm160_vm3, %v2155_v28, %v2151_v22 }
  0xa3   :  { %v171_v7 = vmul.f32 %v167_v51, %v163_v25  ;;  %v216_v28 = vsel %vm212_vm4, %v2165_v34, %v2159_v30  ;;  %v172_v2 = vmul.f32 %v168_v57, %v162_v58  ;;  %v270_v51 = vld [vmem:[#allocation5 + $0x100] sm:$0xff]  ;;  %v246_v58 = vld [vmem:[#allocation5 + $0xf0] sm:$0xff] }
  0xa4   :  { %v225_v39 = vmul.f32 %v221_v17, %v216_v28 }
  0xa5   :  { %v175_v42 = vadd.f32 %v171_v7, %v149_v3 }
  0xa9   :  { %v2161_v31 = vpop.permute.xlu1 %178  ;;  %v2163_v32 = vpop.permute.xlu0 %158 }
  0xaa   :  { %v2182_v48 = vpop.permute.xlu2 %234  ;;  %v164_v16 = vsel %vm160_vm3, %v2163_v32, %v2157_v29  ;;  %v161_v29 = vsel %vm160_vm3, %v2151_v22, %v2163_v32  ;;  %v192_v32 = vld [vmem:[#allocation5 + $0xa0] sm:$0xff]  ;;  %v189_v20 = vsel %vm186_vm5, %v2161_v31, %v2153_v27 }
  0xab   :  { %v170_v62 = vmul.f32 %v166_v47, %v164_v16  ;;  %v173_v21 = vmul.f32 %v169_v60, %v161_v29  ;;  %v196_v44 = vmul.f32 %v192_v32, %v189_v20 }
  0xad   :  { %v174_v40 = vadd.f32 %v170_v62, %v148_v61  ;;  %v177_v16 = vadd.f32 %v173_v21, %v151_v1  ;;  %v247_v61 = vld [vmem:[#allocation5 + $0xf8] sm:$0xff] }
  0xaf   :  { %v200_v55 = vadd.f32 %v196_v44, %v174_v40 }
  0xb1   :  { %v2169_v36 = vpop.permute.xlu1 %184  ;;  %v2171_v37 = vpop.permute.xlu0 %182 }
  0xb2   :  { %v2237_v63 = vpop.permute.xlu2 %258  ;;  %v190_v22 = vsel %vm186_vm5, %v2169_v36, %v2161_v31  ;;  %v188_v33 = vsel %vm186_vm5, %v2153_v27, %v2171_v37  ;;  %v187_v31 = vsel %vm186_vm5, %v2171_v37, %v2169_v36 }
  0xb3   :  { %v199_v13 = vmul.f32 %v195_v0, %v190_v22  ;;  %v197_v45 = vmul.f32 %v193_v23, %v188_v33  ;;  %v198_v49 = vmul.f32 %v194_v41, %v187_v31 }
  0xb5   :  { %v203_v59 = vadd.f32 %v199_v13, %v177_v16  ;;  %v201_v29 = vadd.f32 %v197_v45, %v175_v42 }
  0xb7   :  { %v229_v33 = vadd.f32 %v225_v39, %v203_v59 }
  0xb9   :  { %v2188_v53 = vpop.permute.xlu1 %208  ;;  %v2190_v54 = vpop.permute.xlu0 %206 }
  0xba   :  { %v215_v9 = vsel %vm212_vm4, %v2159_v30, %v2190_v54  ;;  %v214_v27 = vsel %vm212_vm4, %v2190_v54, %v2188_v53  ;;  %v213_v36 = vsel %vm212_vm4, %v2188_v53, %v2165_v34  ;;  %v176_v53 = vadd.f32 %v172_v2, %v150_v18  ;;  %v286_v1 = vpop.permute.xlu2 %285  ;;  %v271_v18 = vld [vmem:[#allocation5 + $0x108] sm:$0xff]  ;;  %v272_v2 = vld [vmem:[#allocation5 + $0x110] sm:$0xff] }
  0xbb   :  { %v222_v37 = vmul.f32 %v218_v38, %v215_v9  ;;  %v223_v56 = vmul.f32 %v219_v24, %v214_v27  ;;  %v224_v60 = vmul.f32 %v220_v46, %v213_v36 }
  0xbc   :  { %v202_v17 = vadd.f32 %v198_v49, %v176_v53 }
  0xbd   :  { %v226_v62 = vadd.f32 %v222_v37, %v200_v55  ;;  %v227_v0 = vadd.f32 %v223_v56, %v201_v29 }
  0xbe   :  { %v228_v20 = vadd.f32 %v224_v60, %v202_v17 }
  0xc1   :  { %v233_v26 = vpop.permute.xlu1 %232  ;;  %v2226_v52 = vpop.permute.xlu0 %230 }
  0xc2   :  { %v241_v30 = vsel %vm238_vm6, %v2226_v52, %v233_v26  ;;  %v240_v54 = vsel %vm238_vm6, %v233_v26, %v2182_v48 }
  0xc3   :  { %v248_v57 = vmul.f32 %v244_v43, %v241_v30  ;;  %v249_v3 = vmul.f32 %v245_v50, %v240_v54  ;;  %v334_v45 = vpop.permute.xlu2 %333 }
  0xc5   :  { %v252_v22 = vadd.f32 %v248_v57, %v226_v62  ;;  %v253_v21 = vadd.f32 %v249_v3, %v227_v0 }
  0xc9   :  { %v257_v19 = vpop.permute.xlu1 %256  ;;  %v237_v47 = vpop.permute.xlu0 %236 }
  0xca   :  { %v267_v25 = vsel %vm264_vm7, %v257_v19, %v2237_v63  ;;  %v239_v34 = vsel %vm238_vm6, %v2182_v48, %v237_v47  ;;  %v242_v26 = vsel %vm238_vm6, %v237_v47, %v2226_v52  ;;  %v273_v48 = vld [vmem:[#allocation5 + $0x118] sm:$0xff] }
  0xcb   :  { %v274_v7 = vmul.f32 %v270_v51, %v267_v25  ;;  %v250_v28 = vmul.f32 %v246_v58, %v239_v34  ;;  %v251_v32 = vmul.f32 %v247_v61, %v242_v26 }
  0xcd   :  { %v2288_v23 = vadd.f32 %v274_v7, %v252_v22  ;;  %v254_v9 = vadd.f32 %v250_v28, %v228_v20  ;;  %v255_v42 = vadd.f32 %v251_v32, %v229_v33 }
  0xcf   :  { %v288_v44 = vperm.slane %v2288_v23, 0  ;;  %v320_v46 = vperm.slane %v2288_v23, 2  ;;  %v304_v25 = vperm.slane %v2288_v23, 1  ;;  %v336_v58 = vperm.slane %v2288_v23, 3 }
  0xd0   :  { %v368_v0 = vperm.slane %v2288_v23, 5 }
  0xd1   :  { %v263_v38 = vpop.permute.xlu1 %262  ;;  %v261_v52 = vpop.permute.xlu0 %260  ;;  %v292_v57 = vmul.f32 %v288_v44, %v286_v1 }
  0xd2   :  { %v268_v40 = vsel %vm264_vm7, %v263_v38, %v257_v19  ;;  %v265_v41 = vsel %vm264_vm7, %v261_v52, %v263_v38  ;;  %v266_v31 = vsel %vm264_vm7, %v2237_v63, %v261_v52  ;;  %v366_v52 = vpop.permute.xlu2 %365 }
  0xd3   :  { %v277_v13 = vmul.f32 %v273_v48, %v268_v40  ;;  %v275_v24 = vmul.f32 %v271_v18, %v266_v31  ;;  %v276_v27 = vmul.f32 %v272_v2, %v265_v41  ;;  %v340_v18 = vmul.f32 %v336_v58, %v334_v45 }
  0xd4   :  { %v352_v2 = vperm.slane %v2288_v23, 4 }
  0xd5   :  { %v2297_v43 = vadd.f32 %v277_v13, %v255_v42  ;;  %v2299_v39 = vadd.f32 %v275_v24, %v253_v21  ;;  %v2301_v30 = vadd.f32 %v276_v27, %v254_v9 }
  0xd7   :  { %v289_v36 = vperm.slane %v2299_v39, 0  ;;  %v290_v37 = vperm.slane %v2301_v30, 0  ;;  %v291_v63 = vperm.slane %v2297_v43, 0  ;;  %v305_v19 = vperm.slane %v2299_v39, 1 }
  0xd8   :  { %v306_v47 = vperm.slane %v2301_v30, 1  ;;  %v321_v49 = vperm.slane %v2299_v39, 2  ;;  %v307_v54 = vperm.slane %v2297_v43, 1  ;;  %v322_v55 = vperm.slane %v2301_v30, 2 }
  0xd9   :  { %v318_v16 = vpop.permute.xlu1 %317  ;;  %v293_v50 = vmul.f32 %v289_v36, %v286_v1  ;;  %v302_v51 = vpop.permute.xlu0 %301  ;;  %v323_v56 = vperm.slane %v2297_v43, 2  ;;  %v294_v34 = vmul.f32 %v290_v37, %v286_v1  ;;  %v337_v60 = vperm.slane %v2299_v39, 3 }
  0xda   :  { %v308_v53 = vmul.f32 %v304_v25, %v302_v51  ;;  %v309_v59 = vmul.f32 %v305_v19, %v302_v51  ;;  %v295_v61 = vmul.f32 %v291_v63, %v286_v1  ;;  %v310_v26 = vmul.f32 %v306_v47, %v302_v51 }
  0xdb   :  { %v311_v29 = vmul.f32 %v307_v54, %v302_v51  ;;  %v338_v62 = vperm.slane %v2301_v30, 3  ;;  %v324_v3 = vmul.f32 %v320_v46, %v318_v16  ;;  %v325_v7 = vmul.f32 %v321_v49, %v318_v16 }
  0xdc   :  { %v312_v17 = vadd.f32 %v308_v53, %v292_v57  ;;  %v313_v28 = vadd.f32 %v309_v59, %v293_v50  ;;  %v326_v22 = vmul.f32 %v322_v55, %v318_v16  ;;  %v314_v32 = vadd.f32 %v310_v26, %v294_v34 }
  0xdd   :  { %v327_v21 = vmul.f32 %v323_v56, %v318_v16  ;;  %v315_v33 = vadd.f32 %v311_v29, %v295_v61  ;;  %v341_v38 = vmul.f32 %v337_v60, %v334_v45  ;;  %v342_v9 = vmul.f32 %v338_v62, %v334_v45 }
  0xde   :  { %v328_v20 = vadd.f32 %v324_v3, %v312_v17  ;;  %v329_v48 = vadd.f32 %v325_v7, %v313_v28  ;;  %v330_v1 = vadd.f32 %v326_v22, %v314_v32  ;;  %v353_v40 = vperm.slane %v2299_v39, 4 }
  0xdf   :  { %v354_v41 = vperm.slane %v2301_v30, 4  ;;  %v369_v31 = vperm.slane %v2299_v39, 5  ;;  %v339_v13 = vperm.slane %v2297_v43, 3  ;;  %v370_v44 = vperm.slane %v2301_v30, 5 }
  0xe0   :  { %v344_v24 = vadd.f32 %v340_v18, %v328_v20  ;;  %v345_v27 = vadd.f32 %v341_v38, %v329_v48  ;;  %v346_v46 = vadd.f32 %v342_v9, %v330_v1  ;;  %v372_v19 = vmul.f32 %v368_v0, %v366_v52  ;;  %v414_v1 = vpop.permute.xlu2 %413 }
  0xe1   :  { %v331_v47 = vadd.f32 %v327_v21, %v315_v33  ;;  %v355_v16 = vperm.slane %v2297_v43, 4  ;;  %v373_v51 = vmul.f32 %v369_v31, %v366_v52  ;;  %v343_v25 = vmul.f32 %v339_v13, %v334_v45 }
  0xe2   :  { %v350_v42 = vpop.permute.xlu1 %349  ;;  %v374_v55 = vmul.f32 %v370_v44, %v366_v52  ;;  %v382_v56 = vpop.permute.xlu0 %381  ;;  %v384_v57 = vperm.slane %v2288_v23, 6  ;;  %v385_v53 = vperm.slane %v2299_v39, 6  ;;  %v386_v61 = vperm.slane %v2301_v30, 6  ;;  %v630_v44 = vld [vmem:[#allocation7 + $0x8] sm:$0xff] }
  0xe3   :  { %v356_v36 = vmul.f32 %v352_v2, %v350_v42  ;;  %v357_v37 = vmul.f32 %v353_v40, %v350_v42  ;;  %v358_v63 = vmul.f32 %v354_v41, %v350_v42  ;;  %v359_v58 = vmul.f32 %v355_v16, %v350_v42 }
  0xe4   :  { %v347_v26 = vadd.f32 %v343_v25, %v331_v47  ;;  %v371_v29 = vperm.slane %v2297_v43, 5  ;;  %v388_v62 = vmul.f32 %v384_v57, %v382_v56  ;;  %v389_v3 = vmul.f32 %v385_v53, %v382_v56 }
  0xe5   :  { %v360_v49 = vadd.f32 %v356_v36, %v344_v24  ;;  %v361_v50 = vadd.f32 %v357_v37, %v345_v27  ;;  %v362_v54 = vadd.f32 %v358_v63, %v346_v46  ;;  %v390_v7 = vmul.f32 %v386_v61, %v382_v56 }
  0xe6   :  { %v400_v45 = vperm.slane %v2288_v23, 7  ;;  %v401_v17 = vperm.slane %v2299_v39, 7  ;;  %v402_v28 = vperm.slane %v2301_v30, 7  ;;  %v363_v0 = vadd.f32 %v359_v58, %v347_v26 }
  0xe7   :  { %v377_v34 = vadd.f32 %v373_v51, %v361_v50  ;;  %v376_v59 = vadd.f32 %v372_v19, %v360_v49  ;;  %v378_v60 = vadd.f32 %v374_v55, %v362_v54  ;;  %v375_v33 = vmul.f32 %v371_v29, %v366_v52 }
  0xe8   :  { %v387_v23 = vperm.slane %v2297_v43, 6  ;;  %v403_v39 = vperm.slane %v2297_v43, 7 }
  0xe9   :  { %v392_v22 = vadd.f32 %v388_v62, %v376_v59  ;;  %v393_v32 = vadd.f32 %v389_v3, %v377_v34  ;;  %v394_v48 = vadd.f32 %v390_v7, %v378_v60  ;;  %v379_v41 = vadd.f32 %v375_v33, %v363_v0  ;;  %v423_v3 = vld [vmem:[#allocation5 + $0x1b0] sm:$0xff]  ;;  %v442_v7 = vld [vmem:[#allocation5 + $0x120] sm:$0xff]  ;;  %v445_v0 = vld [vmem:[#allocation5 + $0x138] sm:$0xff] }
  0xea   :  { %v391_v13 = vmul.f32 %v387_v23, %v382_v56  ;;  %v468_v33 = vld [vmem:[#allocation5 + $0x148] sm:$0xff] }
  0xeb   :  { %v398_v20 = vpop.permute.xlu1 %397 }
  0xec   :  { %v404_v18 = vmul.f32 %v400_v45, %v398_v20  ;;  %v405_v2 = vmul.f32 %v401_v17, %v398_v20  ;;  %v406_v21 = vmul.f32 %v402_v28, %v398_v20  ;;  %v407_v24 = vmul.f32 %v403_v39, %v398_v20  ;;  %v443_v17 = vld [vmem:[#allocation5 + $0x128] sm:$0xff]  ;;  %v421_v20 = vld [vmem:[#allocation5 + $0x1a0] sm:$0xff] }
  0xed   :  { %v395_v52 = vadd.f32 %v391_v13, %v379_v41  ;;  %v470_v13 = vld [vmem:[#allocation5 + $0x158] sm:$0xff] }
  0xee   :  { %v408_v38 = vadd.f32 %v404_v18, %v392_v22  ;;  %v409_v9 = vadd.f32 %v405_v2, %v393_v32  ;;  %v410_v40 = vadd.f32 %v406_v21, %v394_v48  ;;  %v422_v32 = vld [vmem:[#allocation5 + $0x1a8] sm:$0xff]  ;;  %v424_v48 = vld [vmem:[#allocation5 + $0x1b8] sm:$0xff]  ;;  %v444_v18 = vld [vmem:[#allocation5 + $0x130] sm:$0xff] }
  0xef   :  { %v411_v27 = vadd.f32 %v407_v24, %v395_v52 }
  0xf0   :  { %v2335_v31 = vadd.f32 %v414_v1, %v408_v38  ;;  %v2337_v30 = vadd.f32 %v414_v1, %v409_v9  ;;  %v2339_v42 = vadd.f32 %v414_v1, %v410_v40  ;;  %v467_v40 = vld [vmem:[#allocation5 + $0x140] sm:$0xff] }
  0xf1   :  { %v2347_v43 = vadd.f32 %v414_v1, %v411_v27 }
  0xf2   :  { %433 = vrot.lane.b32.xlu0 %v2339_v42, %s2014_s0  ;;  %431 = vrot.lane.b32.xlu2 %v2337_v30, %s2014_s0  ;;  %v427_v2 = vmul.f32 %v423_v3, %v2339_v42  ;;  %v426_v24 = vmul.f32 %v422_v32, %v2337_v30  ;;  %v425_v27 = vmul.f32 %v421_v20, %v2335_v31 }
  0xf3   :  { %429 = vrot.lane.b32.xlu1 %v2335_v31, %s2014_s0  ;;  %v428_v52 = vmul.f32 %v424_v48, %v2347_v43  ;;  %v493_v48 = vld [vmem:[#allocation5 + $0x168] sm:$0xff] }
  0xfa   :  { %456 = vrot.lane.b32.xlu0 %v2337_v30, %s2015_s2  ;;  %454 = vrot.lane.b32.xlu2 %v2335_v31, %s2015_s2 }
  0xfb   :  { %435 = vrot.lane.b32.xlu1 %v2347_v43, %s2014_s0 }
 0x102   :  { %479 = vrot.lane.b32.xlu0 %v2335_v31, %s2016_s30  ;;  %460 = vrot.lane.b32.xlu2 %v2347_v43, %s2015_s2 }
 0x103   :  { %458 = vrot.lane.b32.xlu1 %v2339_v42, %s2015_s2 }
 0x10a   :  { %485 = vrot.lane.b32.xlu0 %v2347_v43, %s2016_s30  ;;  %483 = vrot.lane.b32.xlu2 %v2339_v42, %s2016_s30 }
 0x10b   :  { %481 = vrot.lane.b32.xlu1 %v2337_v30, %s2016_s30 }
 0x112   :  { %508 = vrot.lane.b32.xlu0 %v2339_v42, %s2017_s4  ;;  %506 = vrot.lane.b32.xlu2 %v2337_v30, %s2017_s4 }
 0x113   :  { %504 = vrot.lane.b32.xlu1 %v2335_v31, %s2017_s4 }
 0x11a   :  { %531 = vrot.lane.b32.xlu0 %v2337_v30, %s2018_s5  ;;  %529 = vrot.lane.b32.xlu2 %v2335_v31, %s2018_s5 }
 0x11b   :  { %510 = vrot.lane.b32.xlu1 %v2347_v43, %s2017_s4 }
 0x122   :  { %554 = vrot.lane.b32.xlu0 %v2335_v31, %s2019_s6  ;;  %535 = vrot.lane.b32.xlu2 %v2347_v43, %s2018_s5 }
 0x123   :  { %533 = vrot.lane.b32.xlu1 %v2339_v42, %s2018_s5 }
 0x12a   :  { %560 = vrot.lane.b32.xlu0 %v2347_v43, %s2019_s6  ;;  %558 = vrot.lane.b32.xlu2 %v2339_v42, %s2019_s6 }
 0x12b   :  { %556 = vrot.lane.b32.xlu1 %v2337_v30, %s2019_s6 }
 0x132   :  { %583 = vrot.lane.b32.xlu0 %v2339_v42, %s2023_s7  ;;  %581 = vrot.lane.b32.xlu2 %v2337_v30, %s2023_s7 }
 0x133   :  { %579 = vrot.lane.b32.xlu1 %v2335_v31, %s2023_s7 }
 0x13a   :  { %606 = vrot.lane.b32.xlu0 %v2337_v30, %s2024_s8  ;;  %604 = vrot.lane.b32.xlu2 %v2335_v31, %s2024_s8 }
 0x13b   :  { %585 = vrot.lane.b32.xlu1 %v2347_v43, %s2023_s7 }
 0x142   :  { %633 = vperm.xlu0 %1868, %v630_v44   ;;  %610 = vrot.lane.b32.xlu2 %v2347_v43, %s2024_s8 }
 0x143   :  { %608 = vrot.lane.b32.xlu1 %v2339_v42, %s2024_s8 }
 0x14a   :  { %1873 = vset.pattern.permute.xlu0 %v2028_v12  ;;  %665 = vperm.xlu2 %1870, %v630_v44  }
 0x14b   :  { %649 = vperm.xlu1 %1869, %v630_v44   ;;  %713 = vperm.xlu0 %1873, %v630_v44  }
 0x14c   :  { %v432_v46 = vpop.permute.xlu2 %431 }
 0x152   :  { %1872 = vset.pattern.permute.xlu2 %v2026_v10 }
 0x153   :  { %1871 = vset.pattern.permute.xlu1 %v2025_v8  ;;  %697 = vperm.xlu2 %1872, %v630_v44  }
 0x154   :  { %681 = vperm.xlu1 %1871, %v630_v44   ;;  %1879 = vset.pattern.permute.xlu0 %v2021_v5  ;;  %v455_v36 = vpop.permute.xlu2 %454 }
 0x15b   :  { %1875 = vset.pattern.permute.xlu2 %v3430_v14 }
 0x15c   :  { %1874 = vset.pattern.permute.xlu1 %v2027_v11  ;;  %745 = vperm.xlu2 %1875, %v630_v44   ;;  %v461_v63 = vpop.permute.xlu2 %460 }
 0x15d   :  { %729 = vperm.xlu1 %1874, %v630_v44   ;;  %v465_v41 = vsel %vm108_vm1, %v461_v63, %v455_v36 }
 0x15e   :  { %v471_v43 = vmul.f32 %v467_v40, %v465_v41 }
 0x164   :  { %v434_v37 = vpop.permute.xlu0 %433  ;;  %1878 = vset.pattern.permute.xlu2 %v2022_v6  ;;  %v484_v49 = vpop.permute.xlu2 %483 }
 0x165   :  { %1876 = vset.pattern.permute.xlu1 %v2030_v15  ;;  %v430_v19 = vpop.permute.xlu1 %429  ;;  %v438_v21 = vsel %vm83_vm0, %v432_v46, %v434_v37 }
 0x166   :  { %761 = vperm.xlu1 %1876, %v630_v44   ;;  %v439_v28 = vsel %vm83_vm0, %v430_v19, %v432_v46  ;;  %v469_v44 = vld [vmem:[#allocation5 + $0x150] sm:$0xff] }
 0x167   :  { %v447_v23 = vmul.f32 %v443_v17, %v439_v28 }
 0x169   :  { %v451_v17 = vadd.f32 %v447_v23, %v426_v24  ;;  %v518_v23 = vld [vmem:[#allocation5 + $0x188] sm:$0xff]  ;;  %v520_v24 = vld [vmem:[#allocation5 + $0x198] sm:$0xff] }
 0x16c   :  { %v457_v47 = vpop.permute.xlu0 %456  ;;  %v2418_v51 = vpop.permute.xlu2 %506 }
 0x16d   :  { %v436_v16 = vpop.permute.xlu1 %435  ;;  %v464_v1 = vsel %vm108_vm1, %v455_v36, %v457_v47  ;;  %v495_v36 = vld [vmem:[#allocation5 + $0x178] sm:$0xff] }
 0x16e   :  { %1877 = vset.pattern.permute.xlu1 %v2020_v4  ;;  %v440_v45 = vsel %vm83_vm0, %v436_v16, %v430_v19  ;;  %v437_v22 = vsel %vm83_vm0, %v434_v37, %v436_v16  ;;  %v448_v37 = vmul.f32 %v444_v18, %v438_v21  ;;  %v472_v19 = vmul.f32 %v468_v33, %v464_v1  ;;  %v492_v16 = vld [vmem:[#allocation5 + $0x160] sm:$0xff]  ;;  %v519_v21 = vld [vmem:[#allocation5 + $0x190] sm:$0xff] }
 0x16f   :  { %v446_v38 = vmul.f32 %v442_v7, %v440_v45  ;;  %v449_v39 = vmul.f32 %v445_v0, %v437_v22  ;;  %v494_v45 = vld [vmem:[#allocation5 + $0x170] sm:$0xff]  ;;  %v517_v22 = vld [vmem:[#allocation5 + $0x180] sm:$0xff] }
 0x170   :  { %v452_v33 = vadd.f32 %v448_v37, %v427_v2  ;;  %v476_v1 = vadd.f32 %v472_v19, %v451_v17 }
 0x171   :  { %v450_v7 = vadd.f32 %v446_v38, %v425_v27  ;;  %v453_v28 = vadd.f32 %v449_v39, %v428_v52 }
 0x173   :  { %v475_v41 = vadd.f32 %v471_v43, %v450_v7  ;;  %v567_v43 = vld [vmem:[#allocation5 + $0x1e0] sm:$0xff]  ;;  %v568_v7 = vld [vmem:[#allocation5 + $0x1e8] sm:$0xff] }
 0x174   :  { %v2416_v50 = vpop.permute.xlu0 %479  ;;  %v2420_v56 = vpop.permute.xlu2 %529 }
 0x175   :  { %v459_v54 = vpop.permute.xlu1 %458 }
 0x176   :  { %v462_v42 = vsel %vm108_vm1, %v459_v54, %v461_v63  ;;  %v463_v46 = vsel %vm108_vm1, %v457_v47, %v459_v54 }
 0x177   :  { %v474_v31 = vmul.f32 %v470_v13, %v462_v42  ;;  %v473_v0 = vmul.f32 %v469_v44, %v463_v46 }
 0x179   :  { %v478_v40 = vadd.f32 %v474_v31, %v453_v28  ;;  %v477_v42 = vadd.f32 %v473_v0, %v452_v33  ;;  %v569_v28 = vld [vmem:[#allocation5 + $0x1f0] sm:$0xff] }
 0x17c   :  { %v486_v25 = vpop.permute.xlu0 %485  ;;  %v2428_v53 = vpop.permute.xlu2 %535 }
 0x17d   :  { %v482_v55 = vpop.permute.xlu1 %481  ;;  %v487_v3 = vsel %vm134_vm2, %v484_v49, %v486_v25  ;;  %v490_v63 = vsel %vm134_vm2, %v486_v25, %v2416_v50  ;;  %v540_v44 = vsel %vm186_vm5, %v2428_v53, %v2420_v56 }
 0x17e   :  { %v488_v47 = vsel %vm134_vm2, %v482_v55, %v484_v49  ;;  %v496_v32 = vmul.f32 %v492_v16, %v490_v63  ;;  %v499_v20 = vmul.f32 %v495_v36, %v487_v3  ;;  %v489_v18 = vsel %vm134_vm2, %v2416_v50, %v482_v55  ;;  %v542_v16 = vld [vmem:[#allocation5 + $0x1c0] sm:$0xff] }
 0x17f   :  { %v498_v38 = vmul.f32 %v494_v45, %v488_v47  ;;  %v497_v50 = vmul.f32 %v493_v48, %v489_v18  ;;  %v545_v48 = vld [vmem:[#allocation5 + $0x1d8] sm:$0xff] }
 0x180   :  { %v500_v52 = vadd.f32 %v496_v32, %v475_v41  ;;  %v503_v27 = vadd.f32 %v499_v20, %v478_v40  ;;  %v617_v41 = vld [vmem:[#allocation5 + $0x220] sm:$0xff] }
 0x181   :  { %v502_v37 = vadd.f32 %v498_v38, %v477_v42  ;;  %v501_v45 = vadd.f32 %v497_v50, %v476_v1 }
 0x184   :  { %v2422_v57 = vpop.permute.xlu0 %508  ;;  %v2436_v26 = vpop.permute.xlu2 %558 }
 0x185   :  { %v2424_v58 = vpop.permute.xlu1 %504  ;;  %v513_v49 = vsel %vm160_vm3, %v2418_v51, %v2422_v57 }
 0x186   :  { %v514_v39 = vsel %vm160_vm3, %v2424_v58, %v2418_v51  ;;  %v523_v55 = vmul.f32 %v519_v21, %v513_v49  ;;  %v543_v51 = vld [vmem:[#allocation5 + $0x1c8] sm:$0xff] }
 0x187   :  { %v522_v19 = vmul.f32 %v518_v23, %v514_v39 }
 0x188   :  { %v527_v47 = vadd.f32 %v523_v55, %v502_v37  ;;  %v2542_v55 = vld [vmem:[#allocation7 + $0x10] sm:$0xff] }
 0x189   :  { %v526_v18 = vadd.f32 %v522_v19, %v501_v45  ;;  %997 = vperm.xlu2 %1878, %v2542_v55   ;;  %981 = vperm.xlu1 %1877, %v2542_v55  }
 0x18c   :  { %v2426_v34 = vpop.permute.xlu0 %531  ;;  %v2453_v9 = vpop.permute.xlu2 %581 }
 0x18d   :  { %v2430_v59 = vpop.permute.xlu1 %510 }
 0x18e   :  { %v515_v25 = vsel %vm160_vm3, %v2430_v59, %v2424_v58  ;;  %v512_v2 = vsel %vm160_vm3, %v2422_v57, %v2430_v59  ;;  %v539_v57 = vsel %vm186_vm5, %v2420_v56, %v2426_v34  ;;  %v544_v59 = vld [vmem:[#allocation5 + $0x1d0] sm:$0xff] }
 0x18f   :  { %v521_v13 = vmul.f32 %v517_v22, %v515_v25  ;;  %v524_v3 = vmul.f32 %v520_v24, %v512_v2  ;;  %v546_v0 = vmul.f32 %v542_v16, %v539_v57  ;;  %v593_v25 = vld [vmem:[#allocation5 + $0x208] sm:$0xff] }
 0x191   :  { %v525_v63 = vadd.f32 %v521_v13, %v500_v52  ;;  %v528_v1 = vadd.f32 %v524_v3, %v503_v27  ;;  %v570_v13 = vld [vmem:[#allocation5 + $0x1f8] sm:$0xff]  ;;  %1880 = vset.pattern.permute.xlu1 %v2025_v8  ;;  %1881 = vset.pattern.permute.xlu2 %v2026_v10 }
 0x193   :  { %v550_v40 = vadd.f32 %v546_v0, %v525_v63 }
 0x194   :  { %v2432_v60 = vpop.permute.xlu0 %554  ;;  %v2498_v46 = vpop.permute.xlu2 %604 }
 0x195   :  { %v2434_v61 = vpop.permute.xlu1 %533 }
 0x196   :  { %v538_v58 = vsel %vm186_vm5, %v2426_v34, %v2434_v61  ;;  %v537_v36 = vsel %vm186_vm5, %v2434_v61, %v2428_v53 }
 0x197   :  { %v547_v17 = vmul.f32 %v543_v51, %v538_v58  ;;  %v548_v22 = vmul.f32 %v544_v59, %v537_v36  ;;  %v595_v58 = vld [vmem:[#allocation5 + $0x218] sm:$0xff] }
 0x199   :  { %v551_v39 = vadd.f32 %v547_v17, %v526_v18  ;;  %v552_v24 = vadd.f32 %v548_v22, %v527_v47 }
 0x19c   :  { %v2438_v29 = vpop.permute.xlu0 %560 }
 0x19d   :  { %v2440_v62 = vpop.permute.xlu1 %556  ;;  %v562_v53 = vsel %vm212_vm4, %v2436_v26, %v2438_v29 }
 0x19e   :  { %v563_v31 = vsel %vm212_vm4, %v2440_v62, %v2436_v26  ;;  %v564_v56 = vsel %vm212_vm4, %v2432_v60, %v2440_v62  ;;  %v592_v62 = vld [vmem:[#allocation5 + $0x200] sm:$0xff]  ;;  %v594_v26 = vld [vmem:[#allocation5 + $0x210] sm:$0xff]  ;;  %v573_v38 = vmul.f32 %v569_v28, %v562_v53  ;;  %v620_v28 = vld [vmem:[#allocation5 + $0x238] sm:$0xff] }
 0x19f   :  { %v571_v21 = vmul.f32 %v567_v43, %v564_v56  ;;  %v572_v49 = vmul.f32 %v568_v7, %v563_v31 }
 0x1a0   :  { %v577_v57 = vadd.f32 %v573_v38, %v552_v24 }
 0x1a1   :  { %v575_v52 = vadd.f32 %v571_v21, %v550_v40  ;;  %v576_v27 = vadd.f32 %v572_v49, %v551_v39 }
 0x1a4   :  { %v2469_v30 = vpop.permute.xlu0 %583 }
 0x1a5   :  { %v2473_v54 = vpop.permute.xlu1 %579  ;;  %v588_v32 = vsel %vm238_vm6, %v2453_v9, %v2469_v30 }
 0x1a6   :  { %v589_v20 = vsel %vm238_vm6, %v2473_v54, %v2453_v9  ;;  %v565_v9 = vsel %vm212_vm4, %v2438_v29, %v2432_v60  ;;  %v597_v42 = vmul.f32 %v593_v25, %v588_v32  ;;  %v618_v60 = vld [vmem:[#allocation5 + $0x228] sm:$0xff]  ;;  %v619_v29 = vld [vmem:[#allocation5 + $0x230] sm:$0xff] }
 0x1a7   :  { %v596_v50 = vmul.f32 %v592_v62, %v589_v20  ;;  %v574_v16 = vmul.f32 %v570_v13, %v565_v9 }
 0x1a8   :  { %v601_v36 = vadd.f32 %v597_v42, %v576_v27 }
 0x1a9   :  { %v600_v3 = vadd.f32 %v596_v50, %v575_v52 }
 0x1ac   :  { %v607_v61 = vpop.permute.xlu0 %606 }
 0x1ad   :  { %v586_v34 = vpop.permute.xlu1 %585  ;;  %v614_v23 = vsel %vm264_vm7, %v2498_v46, %v607_v61 }
 0x1ae   :  { %v587_v33 = vsel %vm238_vm6, %v2469_v30, %v586_v34  ;;  %v549_v30 = vmul.f32 %v545_v48, %v540_v44  ;;  %v621_v51 = vmul.f32 %v617_v41, %v614_v23  ;;  %v590_v37 = vsel %vm238_vm6, %v586_v34, %v2473_v54  ;;  %v611_v44 = vpop.permute.xlu2 %610 }
 0x1af   :  { %v598_v2 = vmul.f32 %v594_v26, %v587_v33  ;;  %v599_v7 = vmul.f32 %v595_v58, %v590_v37  ;;  %v615_v53 = vsel %vm264_vm7, %v611_v44, %v2498_v46 }
 0x1b0   :  { %v553_v19 = vadd.f32 %v549_v30, %v528_v1  ;;  %v2553_v54 = vadd.f32 %v621_v51, %v600_v3  ;;  %v624_v46 = vmul.f32 %v620_v28, %v615_v53 }
 0x1b1   :  { %v602_v31 = vadd.f32 %v598_v2, %v577_v57 }
 0x1b2   :  { %v578_v34 = vadd.f32 %v574_v16, %v553_v19  ;;  %v636_v25 = vperm.slane %v2553_v54, 0  ;;  %v652_v20 = vperm.slane %v2553_v54, 1  ;;  %v668_v23 = vperm.slane %v2553_v54, 2 }
 0x1b3   :  { %v700_v50 = vperm.slane %v2553_v54, 4  ;;  %v684_v27 = vperm.slane %v2553_v54, 3  ;;  %v716_v28 = vperm.slane %v2553_v54, 5 }
 0x1b4   :  { %v603_v0 = vadd.f32 %v599_v7, %v578_v34  ;;  %v634_v48 = vpop.permute.xlu0 %633 }
 0x1b5   :  { %v609_v59 = vpop.permute.xlu1 %608  ;;  %v640_v41 = vmul.f32 %v636_v25, %v634_v48  ;;  %v732_v25 = vperm.slane %v2553_v54, 6 }
 0x1b6   :  { %v612_v63 = vsel %vm264_vm7, %v609_v59, %v611_v44  ;;  %v613_v43 = vsel %vm264_vm7, %v607_v61, %v609_v59  ;;  %v666_v21 = vpop.permute.xlu2 %665  ;;  %v2570_v40 = vadd.f32 %v624_v46, %v603_v0 }
 0x1b7   :  { %v622_v56 = vmul.f32 %v618_v60, %v613_v43  ;;  %v623_v45 = vmul.f32 %v619_v29, %v612_v63  ;;  %v672_v52 = vmul.f32 %v668_v23, %v666_v21 }
 0x1b8   :  { %v639_v24 = vperm.slane %v2570_v40, 0  ;;  %v655_v51 = vperm.slane %v2570_v40, 1  ;;  %v671_v53 = vperm.slane %v2570_v40, 2 }
 0x1b9   :  { %v2555_v47 = vadd.f32 %v622_v56, %v601_v36  ;;  %v2557_v17 = vadd.f32 %v623_v45, %v602_v31 }
 0x1ba   :  { %v643_v34 = vmul.f32 %v639_v24, %v634_v48 }
 0x1bb   :  { %v637_v22 = vperm.slane %v2555_v47, 0  ;;  %v638_v61 = vperm.slane %v2557_v17, 0  ;;  %v653_v32 = vperm.slane %v2555_v47, 1  ;;  %v654_v62 = vperm.slane %v2557_v17, 1 }
 0x1bc   :  { %v669_v39 = vperm.slane %v2555_v47, 2  ;;  %v670_v13 = vperm.slane %v2557_v17, 2  ;;  %v685_v37 = vperm.slane %v2555_v47, 3  ;;  %v686_v60 = vperm.slane %v2557_v17, 3 }
 0x1bd   :  { %v650_v18 = vpop.permute.xlu1 %649  ;;  %v641_v49 = vmul.f32 %v637_v22, %v634_v48  ;;  %v642_v1 = vmul.f32 %v638_v61, %v634_v48  ;;  %v701_v19 = vperm.slane %v2555_v47, 4  ;;  %v702_v16 = vperm.slane %v2557_v17, 4 }
 0x1be   :  { %v656_v26 = vmul.f32 %v652_v20, %v650_v18  ;;  %v657_v33 = vmul.f32 %v653_v32, %v650_v18  ;;  %v658_v38 = vmul.f32 %v654_v62, %v650_v18  ;;  %v673_v2 = vmul.f32 %v669_v39, %v666_v21  ;;  %v698_v43 = vpop.permute.xlu2 %697  ;;  %v714_v20 = vpop.permute.xlu0 %713 }
 0x1bf   :  { %v674_v58 = vmul.f32 %v670_v13, %v666_v21  ;;  %v659_v7 = vmul.f32 %v655_v51, %v650_v18  ;;  %v704_v0 = vmul.f32 %v700_v50, %v698_v43  ;;  %v705_v22 = vmul.f32 %v701_v19, %v698_v43 }
 0x1c0   :  { %v660_v9 = vadd.f32 %v656_v26, %v640_v41  ;;  %v661_v42 = vadd.f32 %v657_v33, %v641_v49  ;;  %v662_v30 = vadd.f32 %v658_v38, %v642_v1  ;;  %v706_v61 = vmul.f32 %v702_v16, %v698_v43 }
 0x1c1   :  { %v703_v32 = vperm.slane %v2570_v40, 4  ;;  %v663_v62 = vadd.f32 %v659_v7, %v643_v34  ;;  %v717_v46 = vperm.slane %v2555_v47, 5  ;;  %v687_v18 = vperm.slane %v2570_v40, 3 }
 0x1c2   :  { %v677_v29 = vadd.f32 %v673_v2, %v661_v42  ;;  %v676_v44 = vadd.f32 %v672_v52, %v660_v9  ;;  %v678_v59 = vadd.f32 %v674_v58, %v662_v30  ;;  %v718_v49 = vperm.slane %v2557_v17, 5 }
 0x1c3   :  { %v675_v1 = vmul.f32 %v671_v53, %v666_v21  ;;  %v733_v41 = vperm.slane %v2555_v47, 6  ;;  %v734_v23 = vperm.slane %v2557_v17, 6  ;;  %v749_v39 = vperm.slane %v2555_v47, 7 }
 0x1c4   :  { %v720_v13 = vmul.f32 %v716_v28, %v714_v20  ;;  %v721_v9 = vmul.f32 %v717_v46, %v714_v20  ;;  %v722_v42 = vmul.f32 %v718_v49, %v714_v20  ;;  %v735_v7 = vperm.slane %v2570_v40, 6 }
 0x1c5   :  { %v679_v30 = vadd.f32 %v675_v1, %v663_v62 }
 0x1c6   :  { %v682_v57 = vpop.permute.xlu1 %681 }
 0x1c7   :  { %v688_v36 = vmul.f32 %v684_v27, %v682_v57  ;;  %v689_v3 = vmul.f32 %v685_v37, %v682_v57  ;;  %v690_v63 = vmul.f32 %v686_v60, %v682_v57  ;;  %v691_v38 = vmul.f32 %v687_v18, %v682_v57  ;;  %v746_v37 = vpop.permute.xlu2 %745 }
 0x1c8   :  { %v750_v27 = vperm.slane %v2557_v17, 7  ;;  %v707_v57 = vmul.f32 %v703_v32, %v698_v43  ;;  %v751_v43 = vperm.slane %v2570_v40, 7 }
 0x1c9   :  { %v692_v31 = vadd.f32 %v688_v36, %v676_v44  ;;  %v693_v56 = vadd.f32 %v689_v3, %v677_v29  ;;  %v694_v45 = vadd.f32 %v690_v63, %v678_v59  ;;  %v695_v60 = vadd.f32 %v691_v38, %v679_v30 }
 0x1ca   :  { %v748_v29 = vperm.slane %v2553_v54, 7  ;;  %v753_v59 = vmul.f32 %v749_v39, %v746_v37  ;;  %v754_v36 = vmul.f32 %v750_v27, %v746_v37  ;;  %v719_v3 = vperm.slane %v2570_v40, 5 }
 0x1cb   :  { %v708_v48 = vadd.f32 %v704_v0, %v692_v31  ;;  %v709_v26 = vadd.f32 %v705_v22, %v693_v56  ;;  %v710_v33 = vadd.f32 %v706_v61, %v694_v45  ;;  %v711_v63 = vadd.f32 %v707_v57, %v695_v60  ;;  %v790_v60 = vld [vmem:[#allocation5 + $0x240] sm:$0xff]  ;;  %v792_v57 = vld [vmem:[#allocation5 + $0x250] sm:$0xff] }
 0x1cc   :  { %v752_v44 = vmul.f32 %v748_v29, %v746_v37  ;;  %v723_v45 = vmul.f32 %v719_v3, %v714_v20  ;;  %v815_v3 = vld [vmem:[#allocation5 + $0x260] sm:$0xff] }
 0x1cd   :  { %v725_v51 = vadd.f32 %v721_v9, %v709_v26  ;;  %v726_v58 = vadd.f32 %v722_v42, %v710_v33  ;;  %v724_v21 = vadd.f32 %v720_v13, %v708_v48 }
 0x1ce   :  { %v727_v22 = vadd.f32 %v723_v45, %v711_v63  ;;  %v816_v45 = vld [vmem:[#allocation5 + $0x268] sm:$0xff] }
 0x1cf   :  { %v730_v50 = vpop.permute.xlu1 %729 }
 0x1d0   :  { %v736_v24 = vmul.f32 %v732_v25, %v730_v50  ;;  %v737_v2 = vmul.f32 %v733_v41, %v730_v50  ;;  %v738_v52 = vmul.f32 %v734_v23, %v730_v50  ;;  %v739_v34 = vmul.f32 %v735_v7, %v730_v50 }
 0x1d1   :  { %v755_v25 = vmul.f32 %v751_v43, %v746_v37 }
 0x1d2   :  { %v740_v19 = vadd.f32 %v736_v24, %v724_v21  ;;  %v741_v16 = vadd.f32 %v737_v2, %v725_v51  ;;  %v742_v47 = vadd.f32 %v738_v52, %v726_v58  ;;  %v743_v61 = vadd.f32 %v739_v34, %v727_v22  ;;  %v2712_v52 = vld [vmem:[#allocation7 + $0x18] sm:$0xff]  ;;  %v840_v22 = vld [vmem:[#allocation5 + $0x280] sm:$0xff] }
 0x1d4   :  { %v757_v17 = vadd.f32 %v753_v59, %v741_v16  ;;  %v758_v31 = vadd.f32 %v754_v36, %v742_v47  ;;  %v756_v56 = vadd.f32 %v752_v44, %v740_v19  ;;  %v759_v32 = vadd.f32 %v755_v25, %v743_v61  ;;  %v791_v19 = vld [vmem:[#allocation5 + $0x248] sm:$0xff]  ;;  %v769_v47 = vld [vmem:[#allocation5 + $0x2c0] sm:$0xff]  ;;  %v793_v59 = vld [vmem:[#allocation5 + $0x258] sm:$0xff] }
 0x1d5   :  { %v770_v44 = vld [vmem:[#allocation5 + $0x2c8] sm:$0xff] }
 0x1d8   :  { %v762_v28 = vpop.permute.xlu1 %761 }
 0x1d9   :  { %v2597_v53 = vadd.f32 %v762_v28, %v756_v56  ;;  %v2599_v54 = vadd.f32 %v762_v28, %v757_v17  ;;  %v2601_v0 = vadd.f32 %v762_v28, %v758_v31  ;;  %v2610_v62 = vadd.f32 %v762_v28, %v759_v32  ;;  %v771_v31 = vld [vmem:[#allocation5 + $0x2d0] sm:$0xff]  ;;  %v772_v56 = vld [vmem:[#allocation5 + $0x2d8] sm:$0xff] }
 0x1db   :  { %781 = vrot.lane.b32.xlu1 %v2601_v0, %s2014_s0  ;;  %779 = vrot.lane.b32.xlu0 %v2599_v54, %s2014_s0  ;;  %v773_v28 = vmul.f32 %v769_v47, %v2597_v53  ;;  %v774_v25 = vmul.f32 %v770_v44, %v2599_v54 }
 0x1dc   :  { %777 = vrot.lane.b32.xlu2 %v2597_v53, %s2014_s0 }
 0x1e3   :  { %804 = vrot.lane.b32.xlu1 %v2599_v54, %s2015_s2  ;;  %802 = vrot.lane.b32.xlu0 %v2597_v53, %s2015_s2  ;;  %v2671_v40 = vpop.permute.xlu2 %997 }
 0x1e4   :  { %783 = vrot.lane.b32.xlu2 %v2610_v62, %s2014_s0 }
 0x1eb   :  { %827 = vrot.lane.b32.xlu1 %v2597_v53, %s2016_s30  ;;  %808 = vrot.lane.b32.xlu0 %v2610_v62, %s2015_s2 }
 0x1ec   :  { %806 = vrot.lane.b32.xlu2 %v2601_v0, %s2015_s2 }
 0x1f3   :  { %833 = vrot.lane.b32.xlu1 %v2610_v62, %s2016_s30  ;;  %831 = vrot.lane.b32.xlu0 %v2601_v0, %s2016_s30 }
 0x1f4   :  { %829 = vrot.lane.b32.xlu2 %v2599_v54, %s2016_s30 }
 0x1fb   :  { %856 = vrot.lane.b32.xlu1 %v2601_v0, %s2017_s4  ;;  %854 = vrot.lane.b32.xlu0 %v2599_v54, %s2017_s4  ;;  %v2683_v18 = vpop.permute.xlu1 %981 }
 0x1fc   :  { %852 = vrot.lane.b32.xlu2 %v2597_v53, %s2017_s4 }
 0x203   :  { %879 = vrot.lane.b32.xlu1 %v2599_v54, %s2018_s5  ;;  %877 = vrot.lane.b32.xlu0 %v2597_v53, %s2018_s5 }
 0x204   :  { %858 = vrot.lane.b32.xlu2 %v2610_v62, %s2017_s4 }
 0x20b   :  { %902 = vrot.lane.b32.xlu1 %v2597_v53, %s2019_s6  ;;  %883 = vrot.lane.b32.xlu0 %v2610_v62, %s2018_s5 }
 0x20c   :  { %881 = vrot.lane.b32.xlu2 %v2601_v0, %s2018_s5 }
 0x213   :  { %908 = vrot.lane.b32.xlu1 %v2610_v62, %s2019_s6  ;;  %906 = vrot.lane.b32.xlu0 %v2601_v0, %s2019_s6 }
 0x214   :  { %904 = vrot.lane.b32.xlu2 %v2599_v54, %s2019_s6 }
 0x21b   :  { %931 = vrot.lane.b32.xlu1 %v2601_v0, %s2023_s7  ;;  %929 = vrot.lane.b32.xlu0 %v2599_v54, %s2023_s7 }
 0x21c   :  { %927 = vrot.lane.b32.xlu2 %v2597_v53, %s2023_s7 }
 0x223   :  { %954 = vrot.lane.b32.xlu1 %v2599_v54, %s2024_s8  ;;  %952 = vrot.lane.b32.xlu0 %v2597_v53, %s2024_s8 }
 0x224   :  { %933 = vrot.lane.b32.xlu2 %v2610_v62, %s2023_s7 }
 0x22b   :  { %1029 = vperm.xlu1 %1880, %v2542_v55   ;;  %958 = vrot.lane.b32.xlu0 %v2610_v62, %s2024_s8 }
 0x22c   :  { %956 = vrot.lane.b32.xlu2 %v2601_v0, %s2024_s8 }
 0x233   :  { %1882 = vset.pattern.permute.xlu1 %v2028_v12  ;;  %1013 = vperm.xlu0 %1879, %v2542_v55  }
 0x234   :  { %1061 = vperm.xlu1 %1882, %v2542_v55   ;;  %1045 = vperm.xlu2 %1881, %v2542_v55  }
 0x236   :  { %v778_v20 = vpop.permute.xlu2 %777 }
 0x23b   :  { %1884 = vset.pattern.permute.xlu0 %v3430_v14 }
 0x23c   :  { %1093 = vperm.xlu0 %1884, %v2542_v55   ;;  %1885 = vset.pattern.permute.xlu1 %v2030_v15 }
 0x23d   :  { %1109 = vperm.xlu1 %1885, %v2542_v55   ;;  %1883 = vset.pattern.permute.xlu2 %v2027_v11 }
 0x23e   :  { %v784_v46 = vpop.permute.xlu2 %783  ;;  %1077 = vperm.xlu2 %1883, %v2542_v55  }
 0x23f   :  { %v788_v29 = vsel %vm83_vm0, %v784_v46, %v778_v20 }
 0x240   :  { %v794_v7 = vmul.f32 %v790_v60, %v788_v29  ;;  %v818_v60 = vld [vmem:[#allocation5 + $0x278] sm:$0xff] }
 0x242   :  { %v798_v29 = vadd.f32 %v794_v7, %v773_v28  ;;  %v866_v7 = vld [vmem:[#allocation5 + $0x2a8] sm:$0xff] }
 0x244   :  { %1887 = vset.pattern.permute.xlu0 %v2022_v6 }
 0x245   :  { %1888 = vset.pattern.permute.xlu1 %v2021_v5  ;;  %1345 = vperm.xlu0 %1887, %v2712_v52  }
 0x246   :  { %v2687_v49 = vpop.permute.xlu2 %806  ;;  %1886 = vset.pattern.permute.xlu2 %v2020_v4  ;;  %1361 = vperm.xlu1 %1888, %v2712_v52  }
 0x247   :  { %1329 = vperm.xlu2 %1886, %v2712_v52  }
 0x24d   :  { %v780_v48 = vpop.permute.xlu0 %779  ;;  %v782_v26 = vpop.permute.xlu1 %781  ;;  %1892 = vset.pattern.permute.xlu0 %v2027_v11 }
 0x24e   :  { %v787_v33 = vsel %vm83_vm0, %v778_v20, %v780_v48  ;;  %v786_v1 = vsel %vm83_vm0, %v780_v48, %v782_v26  ;;  %v2694_v38 = vpop.permute.xlu2 %829  ;;  %1890 = vset.pattern.permute.xlu1 %v2026_v10  ;;  %1425 = vperm.xlu0 %1892, %v2712_v52   ;;  %v785_v36 = vsel %vm83_vm0, %v782_v26, %v784_v46  ;;  %v841_v20 = vld [vmem:[#allocation5 + $0x288] sm:$0xff] }
 0x24f   :  { %1889 = vset.pattern.permute.xlu2 %v2025_v8  ;;  %1393 = vperm.xlu1 %1890, %v2712_v52   ;;  %v795_v17 = vmul.f32 %v791_v19, %v787_v33  ;;  %v796_v43 = vmul.f32 %v792_v57, %v786_v1  ;;  %v797_v32 = vmul.f32 %v793_v59, %v785_v36  ;;  %v843_v59 = vld [vmem:[#allocation5 + $0x298] sm:$0xff] }
 0x250   :  { %1377 = vperm.xlu2 %1889, %v2712_v52   ;;  %v775_v33 = vmul.f32 %v771_v31, %v2601_v0  ;;  %v776_v1 = vmul.f32 %v772_v56, %v2610_v62  ;;  %v865_v0 = vld [vmem:[#allocation5 + $0x2a0] sm:$0xff]  ;;  %v842_v31 = vld [vmem:[#allocation5 + $0x290] sm:$0xff] }
 0x251   :  { %v799_v19 = vadd.f32 %v795_v17, %v774_v25 }
 0x252   :  { %v801_v36 = vadd.f32 %v797_v32, %v776_v1 }
 0x255   :  { %v2696_v55 = vpop.permute.xlu1 %804  ;;  %v803_v41 = vpop.permute.xlu0 %802 }
 0x256   :  { %v2698_v23 = vpop.permute.xlu2 %852  ;;  %v812_v34 = vsel %vm108_vm1, %v803_v41, %v2696_v55  ;;  %1895 = vset.pattern.permute.xlu0 %v2020_v4  ;;  %v811_v47 = vsel %vm108_vm1, %v2696_v55, %v2687_v49  ;;  %v800_v4 = vadd.f32 %v796_v43, %v775_v33 }
 0x257   :  { %1893 = vset.pattern.permute.xlu1 %v3430_v14 }
 0x258   :  { %1891 = vset.pattern.permute.xlu2 %v2028_v12  ;;  %1441 = vperm.xlu1 %1893, %v2712_v52  }
 0x259   :  { %1409 = vperm.xlu2 %1891, %v2712_v52  }
 0x25d   :  { %v828_v39 = vpop.permute.xlu1 %827  ;;  %v809_v13 = vpop.permute.xlu0 %808 }
 0x25e   :  { %v2700_v9 = vpop.permute.xlu2 %858  ;;  %v813_v63 = vsel %vm108_vm1, %v809_v13, %v803_v41  ;;  %v837_v46 = vsel %vm134_vm2, %v828_v39, %v2694_v38  ;;  %v820_v41 = vmul.f32 %v816_v45, %v812_v34  ;;  %v810_v54 = vsel %vm108_vm1, %v2687_v49, %v809_v13  ;;  %v868_v45 = vld [vmem:[#allocation5 + $0x2b8] sm:$0xff] }
 0x25f   :  { %v819_v48 = vmul.f32 %v815_v3, %v813_v63  ;;  %v845_v44 = vmul.f32 %v841_v20, %v837_v46  ;;  %v863_v62 = vsel %vm160_vm3, %v2700_v9, %v2698_v23  ;;  %v822_v3 = vmul.f32 %v818_v60, %v810_v54  ;;  %v915_v54 = vld [vmem:[#allocation5 + $0x300] sm:$0xff] }
 0x260   :  { %v824_v17 = vadd.f32 %v820_v41, %v799_v19  ;;  %v869_v28 = vmul.f32 %v865_v0, %v863_v62  ;;  %1896 = vset.pattern.permute.xlu1 %v2022_v6  ;;  %v916_v19 = vld [vmem:[#allocation5 + $0x308] sm:$0xff]  ;;  %v940_v0 = vld [vmem:[#allocation5 + $0x320] sm:$0xff] }
 0x261   :  { %v823_v63 = vadd.f32 %v819_v48, %v798_v29  ;;  %1894 = vset.pattern.permute.xlu2 %v2030_v15  ;;  %v867_v48 = vld [vmem:[#allocation5 + $0x2b0] sm:$0xff]  ;;  %v941_v62 = vld [vmem:[#allocation5 + $0x328] sm:$0xff] }
 0x262   :  { %v849_v25 = vadd.f32 %v845_v44, %v824_v17  ;;  %1457 = vperm.xlu2 %1894, %v2712_v52  }
 0x265   :  { %v2702_v42 = vpop.permute.xlu1 %833  ;;  %v2704_v50 = vpop.permute.xlu0 %831 }
 0x266   :  { %v2706_v30 = vpop.permute.xlu2 %881  ;;  %v838_v61 = vsel %vm134_vm2, %v2702_v42, %v828_v39  ;;  %v817_v39 = vld [vmem:[#allocation5 + $0x270] sm:$0xff]  ;;  %v835_v13 = vsel %vm134_vm2, %v2704_v50, %v2702_v42  ;;  %v836_v56 = vsel %vm134_vm2, %v2694_v38, %v2704_v50  ;;  %v890_v38 = vld [vmem:[#allocation5 + $0x2e0] sm:$0xff] }
 0x267   :  { %v844_v57 = vmul.f32 %v840_v22, %v838_v61  ;;  %v821_v55 = vmul.f32 %v817_v39, %v811_v47  ;;  %v847_v22 = vmul.f32 %v843_v59, %v835_v13  ;;  %v846_v20 = vmul.f32 %v842_v31, %v836_v56  ;;  %v917_v56 = vld [vmem:[#allocation5 + $0x310] sm:$0xff] }
 0x269   :  { %v848_v43 = vadd.f32 %v844_v57, %v823_v63 }
 0x26a   :  { %1897 = vset.pattern.permute.xlu2 %v2021_v5 }
 0x26b   :  { %v873_v39 = vadd.f32 %v869_v28, %v848_v43 }
 0x26d   :  { %v2708_v24 = vpop.permute.xlu1 %856  ;;  %v2710_v2 = vpop.permute.xlu0 %854 }
 0x26e   :  { %v2721_v58 = vpop.permute.xlu2 %904  ;;  %v862_v49 = vsel %vm160_vm3, %v2698_v23, %v2710_v2  ;;  %v860_v42 = vsel %vm160_vm3, %v2708_v24, %v2700_v9  ;;  %v891_v23 = vld [vmem:[#allocation5 + $0x2e8] sm:$0xff]  ;;  %v826_v9 = vadd.f32 %v822_v3, %v801_v36  ;;  %v861_v33 = vsel %vm160_vm3, %v2710_v2, %v2708_v24  ;;  %v892_v36 = vld [vmem:[#allocation5 + $0x2f0] sm:$0xff] }
 0x26f   :  { %v870_v32 = vmul.f32 %v866_v7, %v862_v49  ;;  %v872_v46 = vmul.f32 %v868_v45, %v860_v42  ;;  %v825_v2 = vadd.f32 %v821_v55, %v800_v4  ;;  %v871_v57 = vmul.f32 %v867_v48, %v861_v33  ;;  %v918_v55 = vld [vmem:[#allocation5 + $0x318] sm:$0xff] }
 0x270   :  { %v851_v52 = vadd.f32 %v847_v22, %v826_v9  ;;  %v966_v22 = vld [vmem:[#allocation5 + $0x348] sm:$0xff] }
 0x271   :  { %v874_v44 = vadd.f32 %v870_v32, %v849_v25  ;;  %v850_v63 = vadd.f32 %v846_v20, %v825_v2  ;;  %v942_v20 = vld [vmem:[#allocation5 + $0x330] sm:$0xff] }
 0x272   :  { %v876_v7 = vadd.f32 %v872_v46, %v851_v52 }
 0x275   :  { %v2717_v27 = vpop.permute.xlu1 %879  ;;  %v2719_v51 = vpop.permute.xlu0 %877 }
 0x276   :  { %v2735_v16 = vpop.permute.xlu2 %927  ;;  %v886_v61 = vsel %vm186_vm5, %v2717_v27, %v2706_v30  ;;  %v887_v50 = vsel %vm186_vm5, %v2719_v51, %v2717_v27  ;;  %v893_v27 = vld [vmem:[#allocation5 + $0x2f8] sm:$0xff] }
 0x277   :  { %v895_v60 = vmul.f32 %v891_v23, %v886_v61  ;;  %v894_v47 = vmul.f32 %v890_v38, %v887_v50  ;;  %v965_v23 = vld [vmem:[#allocation5 + $0x340] sm:$0xff] }
 0x279   :  { %v899_v49 = vadd.f32 %v895_v60, %v874_v44  ;;  %v898_v31 = vadd.f32 %v894_v47, %v873_v39  ;;  %v967_v47 = vld [vmem:[#allocation5 + $0x350] sm:$0xff] }
 0x27d   :  { %v2728_v21 = vpop.permute.xlu1 %902  ;;  %v2730_v37 = vpop.permute.xlu0 %883 }
 0x27e   :  { %v2790_v34 = vpop.permute.xlu2 %933  ;;  %v912_v6 = vsel %vm212_vm4, %v2728_v21, %v2721_v58  ;;  %v888_v29 = vsel %vm186_vm5, %v2730_v37, %v2719_v51 }
 0x27f   :  { %v919_v13 = vmul.f32 %v915_v54, %v912_v6  ;;  %v897_v4 = vmul.f32 %v893_v27, %v888_v29  ;;  %v943_v6 = vld [vmem:[#allocation5 + $0x338] sm:$0xff]  ;;  %v938_v5 = vsel %vm238_vm6, %v2790_v34, %v2735_v16 }
 0x281   :  { %v923_v61 = vadd.f32 %v919_v13, %v898_v31  ;;  %v901_v25 = vadd.f32 %v897_v4, %v876_v7 }
 0x285   :  { %v2756_v53 = vpop.permute.xlu1 %908  ;;  %v2758_v26 = vpop.permute.xlu0 %906 }
 0x286   :  { %v911_v24 = vsel %vm212_vm4, %v2721_v58, %v2758_v26  ;;  %v885_v58 = vsel %vm186_vm5, %v2706_v30, %v2730_v37  ;;  %v913_v17 = vsel %vm212_vm4, %v2756_v53, %v2728_v21  ;;  %v910_v45 = vsel %vm212_vm4, %v2758_v26, %v2756_v53  ;;  %v957_v43 = vpop.permute.xlu2 %956 }
 0x287   :  { %v920_v3 = vmul.f32 %v916_v19, %v911_v24  ;;  %v875_v37 = vadd.f32 %v871_v57, %v850_v63  ;;  %v896_v28 = vmul.f32 %v892_v36, %v885_v58  ;;  %v922_v32 = vmul.f32 %v918_v55, %v913_v17  ;;  %v968_v57 = vld [vmem:[#allocation5 + $0x358] sm:$0xff] }
 0x288   :  { %v921_v9 = vmul.f32 %v917_v56, %v910_v45  ;;  %v947_v24 = vmul.f32 %v943_v6, %v938_v5 }
 0x289   :  { %v924_v38 = vadd.f32 %v920_v3, %v899_v49  ;;  %v900_v54 = vadd.f32 %v896_v28, %v875_v37  ;;  %v926_v27 = vadd.f32 %v922_v32, %v901_v25 }
 0x28b   :  { %v925_v2 = vadd.f32 %v921_v9, %v900_v54  ;;  %v951_v58 = vadd.f32 %v947_v24, %v926_v27 }
 0x28d   :  { %v932_v1 = vpop.permute.xlu1 %931  ;;  %v930_v41 = vpop.permute.xlu0 %929 }
 0x28e   :  { %v936_v59 = vsel %vm238_vm6, %v930_v41, %v932_v1  ;;  %v937_v51 = vsel %vm238_vm6, %v2735_v16, %v930_v41  ;;  %v935_v53 = vsel %vm238_vm6, %v932_v1, %v2790_v34  ;;  %v1046_v37 = vpop.permute.xlu2 %1045 }
 0x28f   :  { %v944_v42 = vmul.f32 %v940_v0, %v937_v51  ;;  %v945_v30 = vmul.f32 %v941_v62, %v936_v59  ;;  %v946_v29 = vmul.f32 %v942_v20, %v935_v53 }
 0x291   :  { %v948_v48 = vadd.f32 %v944_v42, %v923_v61  ;;  %v949_v33 = vadd.f32 %v945_v30, %v924_v38  ;;  %v950_v62 = vadd.f32 %v946_v29, %v925_v2 }
 0x295   :  { %v955_v50 = vpop.permute.xlu1 %954  ;;  %v953_v21 = vpop.permute.xlu0 %952 }
 0x296   :  { %v961_v26 = vsel %vm264_vm7, %v955_v50, %v957_v43  ;;  %v962_v46 = vsel %vm264_vm7, %v953_v21, %v955_v50 }
 0x297   :  { %v970_v41 = vmul.f32 %v966_v22, %v961_v26  ;;  %v969_v60 = vmul.f32 %v965_v23, %v962_v46 }
 0x299   :  { %v2848_v1 = vadd.f32 %v970_v41, %v949_v33  ;;  %v2850_v19 = vadd.f32 %v969_v60, %v948_v48 }
 0x29b   :  { %v1032_v52 = vperm.slane %v2850_v19, 3  ;;  %v1033_v39 = vperm.slane %v2848_v1, 3  ;;  %v984_v44 = vperm.slane %v2850_v19, 0  ;;  %v985_v0 = vperm.slane %v2848_v1, 0 }
 0x29c   :  { %v1000_v16 = vperm.slane %v2850_v19, 1  ;;  %v1001_v34 = vperm.slane %v2848_v1, 1  ;;  %v1081_v59 = vperm.slane %v2848_v1, 6  ;;  %v1080_v51 = vperm.slane %v2850_v19, 6 }
 0x29d   :  { %v1030_v13 = vpop.permute.xlu1 %1029  ;;  %v959_v36 = vpop.permute.xlu0 %958  ;;  %v1016_v63 = vperm.slane %v2850_v19, 2  ;;  %v1017_v7 = vperm.slane %v2848_v1, 2  ;;  %v988_v17 = vmul.f32 %v984_v44, %v2683_v18  ;;  %v989_v31 = vmul.f32 %v985_v0, %v2683_v18 }
 0x29e   :  { %v960_v4 = vsel %vm264_vm7, %v957_v43, %v959_v36  ;;  %v963_v3 = vsel %vm264_vm7, %v959_v36, %v953_v21  ;;  %v1036_v56 = vmul.f32 %v1032_v52, %v1030_v13  ;;  %v1037_v45 = vmul.f32 %v1033_v39, %v1030_v13 }
 0x29f   :  { %v971_v49 = vmul.f32 %v967_v47, %v960_v4  ;;  %v972_v55 = vmul.f32 %v968_v57, %v963_v3  ;;  %v1004_v42 = vmul.f32 %v1000_v16, %v2671_v40  ;;  %v1005_v30 = vmul.f32 %v1001_v34, %v2671_v40 }
 0x2a0   :  { %v1048_v22 = vperm.slane %v2850_v19, 4  ;;  %v1049_v23 = vperm.slane %v2848_v1, 4  ;;  %v1064_v32 = vperm.slane %v2850_v19, 5  ;;  %v1065_v38 = vperm.slane %v2848_v1, 5 }
 0x2a1   :  { %v2870_v28 = vadd.f32 %v971_v49, %v950_v62  ;;  %v2872_v43 = vadd.f32 %v972_v55, %v951_v58  ;;  %v1008_v61 = vadd.f32 %v1004_v42, %v988_v17  ;;  %v1009_v25 = vadd.f32 %v1005_v30, %v989_v31 }
 0x2a2   :  { %v1052_v39 = vmul.f32 %v1048_v22, %v1046_v37  ;;  %v1053_v47 = vmul.f32 %v1049_v23, %v1046_v37 }
 0x2a3   :  { %v986_v50 = vperm.slane %v2870_v28, 0  ;;  %v987_v21 = vperm.slane %v2872_v43, 0  ;;  %v1002_v9 = vperm.slane %v2870_v28, 1  ;;  %v1003_v20 = vperm.slane %v2872_v43, 1 }
 0x2a4   :  { %v1018_v53 = vperm.slane %v2870_v28, 2  ;;  %v1019_v26 = vperm.slane %v2872_v43, 2  ;;  %v1034_v46 = vperm.slane %v2870_v28, 3  ;;  %v1035_v48 = vperm.slane %v2872_v43, 3 }
 0x2a5   :  { %v1014_v33 = vpop.permute.xlu0 %1013  ;;  %v990_v41 = vmul.f32 %v986_v50, %v2683_v18  ;;  %v991_v60 = vmul.f32 %v987_v21, %v2683_v18  ;;  %v1006_v54 = vmul.f32 %v1002_v9, %v2671_v40  ;;  %v1007_v6 = vmul.f32 %v1003_v20, %v2671_v40 }
 0x2a6   :  { %v1020_v5 = vmul.f32 %v1016_v63, %v1014_v33  ;;  %v1021_v27 = vmul.f32 %v1017_v7, %v1014_v33  ;;  %v1022_v29 = vmul.f32 %v1018_v53, %v1014_v33  ;;  %v1023_v24 = vmul.f32 %v1019_v26, %v1014_v33  ;;  %v1062_v58 = vpop.permute.xlu1 %1061  ;;  %v1078_v7 = vpop.permute.xlu2 %1077 }
 0x2a7   :  { %v1010_v2 = vadd.f32 %v1006_v54, %v990_v41  ;;  %v1011_v52 = vadd.f32 %v1007_v6, %v991_v60  ;;  %v1050_v0 = vperm.slane %v2870_v28, 4  ;;  %v1051_v16 = vperm.slane %v2872_v43, 4 }
 0x2a8   :  { %v1024_v57 = vadd.f32 %v1020_v5, %v1008_v61  ;;  %v1025_v44 = vadd.f32 %v1021_v27, %v1009_v25  ;;  %v1038_v62 = vmul.f32 %v1034_v46, %v1030_v13  ;;  %v1039_v36 = vmul.f32 %v1035_v48, %v1030_v13 }
 0x2a9   :  { %v1026_v34 = vadd.f32 %v1022_v29, %v1010_v2  ;;  %v1027_v18 = vadd.f32 %v1023_v24, %v1011_v52  ;;  %v1066_v3 = vperm.slane %v2870_v28, 5  ;;  %v1067_v63 = vperm.slane %v2872_v43, 5 }
 0x2aa   :  { %v1040_v40 = vadd.f32 %v1036_v56, %v1024_v57  ;;  %v1041_v4 = vadd.f32 %v1037_v45, %v1025_v44  ;;  %v1054_v17 = vmul.f32 %v1050_v0, %v1046_v37  ;;  %v1055_v31 = vmul.f32 %v1051_v16, %v1046_v37 }
 0x2ab   :  { %v1042_v49 = vadd.f32 %v1038_v62, %v1026_v34  ;;  %v1043_v55 = vadd.f32 %v1039_v36, %v1027_v18  ;;  %v1068_v22 = vmul.f32 %v1064_v32, %v1062_v58  ;;  %v1069_v23 = vmul.f32 %v1065_v38, %v1062_v58 }
 0x2ac   :  { %v1056_v42 = vadd.f32 %v1052_v39, %v1040_v40  ;;  %v1057_v30 = vadd.f32 %v1053_v47, %v1041_v4  ;;  %v1096_v13 = vperm.slane %v2850_v19, 7  ;;  %v1097_v56 = vperm.slane %v2848_v1, 7 }
 0x2ad   :  { %v1058_v61 = vadd.f32 %v1054_v17, %v1042_v49  ;;  %v1059_v25 = vadd.f32 %v1055_v31, %v1043_v55  ;;  %v1084_v45 = vmul.f32 %v1080_v51, %v1078_v7  ;;  %v1071_v50 = vmul.f32 %v1067_v63, %v1062_v58 }
 0x2ae   :  { %v1072_v21 = vadd.f32 %v1068_v22, %v1056_v42  ;;  %v1073_v9 = vadd.f32 %v1069_v23, %v1057_v30  ;;  %v1094_v20 = vpop.permute.xlu0 %1093  ;;  %v1085_v37 = vmul.f32 %v1081_v59, %v1078_v7  ;;  %v1070_v53 = vmul.f32 %v1066_v3, %v1062_v58  ;;  %v2952_v44 = vpop.permute.xlu2 %1329 }
 0x2af   :  { %v1100_v26 = vmul.f32 %v1096_v13, %v1094_v20  ;;  %v1101_v32 = vmul.f32 %v1097_v56, %v1094_v20  ;;  %v1075_v38 = vadd.f32 %v1071_v50, %v1059_v25  ;;  %v1082_v46 = vperm.slane %v2870_v28, 6  ;;  %v1110_v51 = vpop.permute.xlu1 %1109 }
 0x2b0   :  { %v1083_v48 = vperm.slane %v2872_v43, 6  ;;  %v1074_v33 = vadd.f32 %v1070_v53, %v1058_v61  ;;  %v1088_v41 = vadd.f32 %v1084_v45, %v1072_v21  ;;  %v1089_v60 = vadd.f32 %v1085_v37, %v1073_v9 }
 0x2b1   :  { %v1099_v19 = vperm.slane %v2872_v43, 7  ;;  %v1086_v6 = vmul.f32 %v1082_v46, %v1078_v7  ;;  %v1098_v29 = vperm.slane %v2870_v28, 7 }
 0x2b2   :  { %v1087_v54 = vmul.f32 %v1083_v48, %v1078_v7  ;;  %v1104_v5 = vadd.f32 %v1100_v26, %v1088_v41  ;;  %v1105_v27 = vadd.f32 %v1101_v32, %v1089_v60  ;;  %v1138_v32 = vld [vmem:[#allocation5 + $0x360] sm:$0xff]  ;;  %v1139_v48 = vld [vmem:[#allocation5 + $0x368] sm:$0xff] }
 0x2b3   :  { %v1103_v1 = vmul.f32 %v1099_v19, %v1094_v20  ;;  %v1090_v24 = vadd.f32 %v1086_v6, %v1074_v33  ;;  %v1102_v47 = vmul.f32 %v1098_v29, %v1094_v20  ;;  %v1140_v33 = vld [vmem:[#allocation5 + $0x370] sm:$0xff]  ;;  %v1117_v60 = vld [vmem:[#allocation5 + $0x3e0] sm:$0xff]  ;;  %v1141_v19 = vld [vmem:[#allocation5 + $0x378] sm:$0xff] }
 0x2b4   :  { %v1091_v59 = vadd.f32 %v1087_v54, %v1075_v38  ;;  %v2904_v2 = vadd.f32 %v1110_v51, %v1104_v5  ;;  %v2906_v52 = vadd.f32 %v1110_v51, %v1105_v27  ;;  %v1118_v6 = vld [vmem:[#allocation5 + $0x3e8] sm:$0xff]  ;;  %v1119_v5 = vld [vmem:[#allocation5 + $0x3f0] sm:$0xff]  ;;  %v1120_v29 = vld [vmem:[#allocation5 + $0x3f8] sm:$0xff] }
 0x2b5   :  { %v1106_v57 = vadd.f32 %v1102_v47, %v1090_v24 }
 0x2b6   :  { %v1107_v39 = vadd.f32 %v1103_v1, %v1091_v59  ;;  %1127 = vrot.lane.b32.xlu1 %v2906_v52, %s2014_s0  ;;  %1125 = vrot.lane.b32.xlu2 %v2904_v2, %s2014_s0  ;;  %v2962_v0 = vpop.permute.xlu2 %1377  ;;  %v1121_v24 = vmul.f32 %v1117_v60, %v2904_v2 }
 0x2b7   :  { %v2916_v28 = vadd.f32 %v1110_v51, %v1106_v57  ;;  %v2988_v58 = vpop.permute.xlu0 %1345  ;;  %v1164_v57 = vld [vmem:[#allocation5 + $0x388] sm:$0xff] }
 0x2b8   :  { %v2912_v43 = vadd.f32 %v1110_v51, %v1107_v39  ;;  %v2984_v18 = vpop.permute.xlu1 %1361  ;;  %v1163_v51 = vld [vmem:[#allocation5 + $0x380] sm:$0xff] }
 0x2b9   :  { %v1123_v14 = vmul.f32 %v1119_v5, %v2916_v28  ;;  %v1189_v5 = vld [vmem:[#allocation5 + $0x3a8] sm:$0xff] }
 0x2ba   :  { %1131 = vrot.lane.b32.xlu0 %v2912_v43, %s2014_s0 }
 0x2be   :  { %1150 = vrot.lane.b32.xlu1 %v2904_v2, %s2015_s2  ;;  %1129 = vrot.lane.b32.xlu2 %v2916_v28, %s2014_s0  ;;  %v2970_v16 = vpop.permute.xlu2 %1409 }
 0x2c0   :  { %v2992_v63 = vpop.permute.xlu0 %1425 }
 0x2c1   :  { %v2986_v36 = vpop.permute.xlu1 %1393 }
 0x2c2   :  { %1154 = vrot.lane.b32.xlu0 %v2916_v28, %s2015_s2 }
 0x2c6   :  { %1156 = vrot.lane.b32.xlu1 %v2912_v43, %s2015_s2  ;;  %1152 = vrot.lane.b32.xlu2 %v2906_v52, %s2015_s2  ;;  %v2982_v34 = vpop.permute.xlu2 %1457 }
 0x2ca   :  { %1177 = vrot.lane.b32.xlu0 %v2906_v52, %s2016_s30  ;;  %v2990_v4 = vpop.permute.xlu1 %1441 }
 0x2ce   :  { %1179 = vrot.lane.b32.xlu1 %v2916_v28, %s2016_s30  ;;  %1175 = vrot.lane.b32.xlu2 %v2904_v2, %s2016_s30 }
 0x2d2   :  { %1200 = vrot.lane.b32.xlu0 %v2904_v2, %s2017_s4 }
 0x2d6   :  { %1202 = vrot.lane.b32.xlu1 %v2906_v52, %s2017_s4  ;;  %1181 = vrot.lane.b32.xlu2 %v2912_v43, %s2016_s30 }
 0x2da   :  { %1206 = vrot.lane.b32.xlu0 %v2912_v43, %s2017_s4 }
 0x2de   :  { %1225 = vrot.lane.b32.xlu1 %v2904_v2, %s2018_s5  ;;  %1204 = vrot.lane.b32.xlu2 %v2916_v28, %s2017_s4 }
 0x2e2   :  { %1229 = vrot.lane.b32.xlu0 %v2916_v28, %s2018_s5 }
 0x2e6   :  { %1231 = vrot.lane.b32.xlu1 %v2912_v43, %s2018_s5  ;;  %1227 = vrot.lane.b32.xlu2 %v2906_v52, %s2018_s5 }
 0x2ea   :  { %1252 = vrot.lane.b32.xlu0 %v2906_v52, %s2019_s6 }
 0x2ee   :  { %1254 = vrot.lane.b32.xlu1 %v2916_v28, %s2019_s6  ;;  %1250 = vrot.lane.b32.xlu2 %v2904_v2, %s2019_s6 }
 0x2f2   :  { %1275 = vrot.lane.b32.xlu0 %v2904_v2, %s2023_s7 }
 0x2f6   :  { %1277 = vrot.lane.b32.xlu1 %v2906_v52, %s2023_s7  ;;  %1256 = vrot.lane.b32.xlu2 %v2912_v43, %s2019_s6 }
 0x2fa   :  { %1281 = vrot.lane.b32.xlu0 %v2912_v43, %s2023_s7 }
 0x2fe   :  { %1300 = vrot.lane.b32.xlu1 %v2904_v2, %s2024_s8  ;;  %1279 = vrot.lane.b32.xlu2 %v2916_v28, %s2023_s7  ;;  %v1188_v2 = vld [vmem:[#allocation5 + $0x3a0] sm:$0xff] }
 0x302   :  { %1304 = vrot.lane.b32.xlu0 %v2916_v28, %s2024_s8  ;;  %v1213_v28 = vld [vmem:[#allocation5 + $0x3c0] sm:$0xff] }
 0x306   :  { %1306 = vrot.lane.b32.xlu1 %v2912_v43, %s2024_s8  ;;  %1302 = vrot.lane.b32.xlu2 %v2906_v52, %s2024_s8 }
 0x310   :  { %v1126_v62 = vpop.permute.xlu2 %1125 }
 0x318   :  { %v1130_v40 = vpop.permute.xlu2 %1129 }
 0x320   :  { %v1153_v3 = vpop.permute.xlu2 %1152 }
 0x328   :  { %v1128_v7 = vpop.permute.xlu1 %1127  ;;  %v2996_v55 = vpop.permute.xlu2 %1175 }
 0x329   :  { %v1134_v49 = vsel %vm83_vm0, %v1128_v7, %v1130_v40  ;;  %v1135_v41 = vsel %vm83_vm0, %v1126_v62, %v1128_v7 }
 0x32a   :  { %v1143_v1 = vmul.f32 %v1139_v48, %v1135_v41  ;;  %v1144_v59 = vmul.f32 %v1140_v33, %v1134_v49  ;;  %v1124_v49 = vmul.f32 %v1120_v29, %v2912_v43  ;;  %v1166_v48 = vld [vmem:[#allocation5 + $0x398] sm:$0xff] }
 0x32c   :  { %v1132_v17 = vpop.permute.xlu0 %1131  ;;  %v1148_v60 = vadd.f32 %v1144_v59, %v1123_v14  ;;  %v1214_v14 = vld [vmem:[#allocation5 + $0x3c8] sm:$0xff] }
 0x32d   :  { %v1133_v31 = vsel %vm83_vm0, %v1130_v40, %v1132_v17  ;;  %v1136_v38 = vsel %vm83_vm0, %v1132_v17, %v1126_v62  ;;  %v1165_v40 = vld [vmem:[#allocation5 + $0x390] sm:$0xff] }
 0x32e   :  { %v1142_v27 = vmul.f32 %v1138_v32, %v1136_v38  ;;  %v1145_v47 = vmul.f32 %v1141_v19, %v1133_v31  ;;  %v1122_v32 = vmul.f32 %v1118_v6, %v2906_v52 }
 0x330   :  { %v1151_v42 = vpop.permute.xlu1 %1150  ;;  %v3000_v22 = vpop.permute.xlu2 %1181  ;;  %v1146_v38 = vadd.f32 %v1142_v27, %v1121_v24  ;;  %v1147_v43 = vadd.f32 %v1143_v1, %v1122_v32  ;;  %v1149_v19 = vadd.f32 %v1145_v47, %v1124_v49  ;;  %v1191_v24 = vld [vmem:[#allocation5 + $0x3b8] sm:$0xff] }
 0x331   :  { %v1160_v62 = vsel %vm108_vm1, %v1151_v42, %v1153_v3  ;;  %v1186_v31 = vsel %vm134_vm2, %v3000_v22, %v2996_v55 }
 0x334   :  { %v1155_v30 = vpop.permute.xlu0 %1154 }
 0x335   :  { %v1159_v7 = vsel %vm108_vm1, %v1153_v3, %v1155_v30  ;;  %v1168_v3 = vmul.f32 %v1164_v57, %v1160_v62  ;;  %v1238_v57 = vld [vmem:[#allocation5 + $0x400] sm:$0xff] }
 0x336   :  { %v1169_v41 = vmul.f32 %v1165_v40, %v1159_v7  ;;  %v1215_v40 = vld [vmem:[#allocation5 + $0x3d0] sm:$0xff] }
 0x337   :  { %v1172_v62 = vadd.f32 %v1168_v3, %v1147_v43  ;;  %v1239_v43 = vld [vmem:[#allocation5 + $0x408] sm:$0xff] }
 0x338   :  { %v1157_v23 = vpop.permute.xlu1 %1156  ;;  %v3002_v25 = vpop.permute.xlu2 %1204 }
 0x339   :  { %v1161_v54 = vsel %vm108_vm1, %v1157_v23, %v1151_v42  ;;  %v1158_v42 = vsel %vm108_vm1, %v1155_v30, %v1157_v23  ;;  %v1190_v23 = vld [vmem:[#allocation5 + $0x3b0] sm:$0xff] }
 0x33a   :  { %v1167_v17 = vmul.f32 %v1163_v51, %v1161_v54  ;;  %v1192_v54 = vmul.f32 %v1188_v2, %v1186_v31  ;;  %v1170_v6 = vmul.f32 %v1166_v48, %v1158_v42 }
 0x33c   :  { %v1178_v61 = vpop.permute.xlu0 %1177  ;;  %v1171_v51 = vadd.f32 %v1167_v17, %v1146_v38  ;;  %v1263_v38 = vld [vmem:[#allocation5 + $0x420] sm:$0xff]  ;;  %v1174_v31 = vadd.f32 %v1170_v6, %v1149_v19  ;;  %v1241_v19 = vld [vmem:[#allocation5 + $0x418] sm:$0xff] }
 0x33d   :  { %v1185_v30 = vsel %vm134_vm2, %v2996_v55, %v1178_v61 }
 0x33e   :  { %v1193_v17 = vmul.f32 %v1189_v5, %v1185_v30  ;;  %v1196_v49 = vadd.f32 %v1192_v54, %v1171_v51  ;;  %v1240_v51 = vld [vmem:[#allocation5 + $0x410] sm:$0xff] }
 0x340   :  { %v1180_v13 = vpop.permute.xlu1 %1179  ;;  %v3004_v45 = vpop.permute.xlu2 %1227  ;;  %v1197_v30 = vadd.f32 %v1193_v17, %v1172_v62  ;;  %v1289_v17 = vld [vmem:[#allocation5 + $0x448] sm:$0xff] }
 0x341   :  { %v1184_v27 = vsel %vm134_vm2, %v1178_v61, %v1180_v13  ;;  %v1183_v1 = vsel %vm134_vm2, %v1180_v13, %v3000_v22  ;;  %v1173_v61 = vadd.f32 %v1169_v41, %v1148_v60  ;;  %v1216_v13 = vld [vmem:[#allocation5 + $0x3d8] sm:$0xff] }
 0x342   :  { %v1194_v32 = vmul.f32 %v1190_v23, %v1184_v27  ;;  %v1195_v48 = vmul.f32 %v1191_v24, %v1183_v1  ;;  %v1264_v27 = vld [vmem:[#allocation5 + $0x428] sm:$0xff] }
 0x344   :  { %v1201_v56 = vpop.permute.xlu0 %1200  ;;  %v1198_v23 = vadd.f32 %v1194_v32, %v1173_v61  ;;  %v1199_v24 = vadd.f32 %v1195_v48, %v1174_v31 }
 0x348   :  { %v3006_v50 = vpop.permute.xlu1 %1202  ;;  %v3012_v20 = vpop.permute.xlu2 %1250 }
 0x349   :  { %v1210_v59 = vsel %vm160_vm3, %v1201_v56, %v3006_v50  ;;  %v1209_v22 = vsel %vm160_vm3, %v3006_v50, %v3002_v25 }
 0x34a   :  { %v1218_v42 = vmul.f32 %v1214_v14, %v1210_v59  ;;  %v1219_v3 = vmul.f32 %v1215_v40, %v1209_v22  ;;  %v1265_v14 = vld [vmem:[#allocation5 + $0x430] sm:$0xff] }
 0x34c   :  { %v3008_v21 = vpop.permute.xlu0 %1206  ;;  %v1223_v62 = vadd.f32 %v1219_v3, %v1198_v23 }
 0x34d   :  { %v1211_v52 = vsel %vm160_vm3, %v3008_v21, %v1201_v56  ;;  %v1208_v56 = vsel %vm160_vm3, %v3002_v25, %v3008_v21 }
 0x34e   :  { %v1217_v47 = vmul.f32 %v1213_v28, %v1211_v52  ;;  %v1220_v41 = vmul.f32 %v1216_v13, %v1208_v56  ;;  %v1288_v52 = vld [vmem:[#allocation5 + $0x440] sm:$0xff] }
 0x350   :  { %v3010_v9 = vpop.permute.xlu1 %1225  ;;  %v3022_v46 = vpop.permute.xlu2 %1256  ;;  %v1221_v28 = vadd.f32 %v1217_v47, %v1196_v49  ;;  %v1222_v47 = vadd.f32 %v1218_v42, %v1197_v30  ;;  %v1224_v61 = vadd.f32 %v1220_v41, %v1199_v24  ;;  %v1290_v49 = vld [vmem:[#allocation5 + $0x450] sm:$0xff]  ;;  %v1291_v42 = vld [vmem:[#allocation5 + $0x458] sm:$0xff] }
 0x351   :  { %v1235_v55 = vsel %vm186_vm5, %v3010_v9, %v3004_v45  ;;  %v1261_v31 = vsel %vm212_vm4, %v3022_v46, %v3012_v20 }
 0x352   :  { %v1242_v50 = vmul.f32 %v1238_v57, %v1235_v55  ;;  %v1313_v55 = vld [vmem:[#allocation5 + $0x460] sm:$0xff] }
 0x354   :  { %v3014_v37 = vpop.permute.xlu0 %1229  ;;  %v1246_v1 = vadd.f32 %v1242_v50, %v1221_v28 }
 0x355   :  { %v1234_v60 = vsel %vm186_vm5, %v3004_v45, %v3014_v37 }
 0x358   :  { %v3016_v53 = vpop.permute.xlu1 %1231  ;;  %v1280_v29 = vpop.permute.xlu2 %1279 }
 0x359   :  { %v1233_v54 = vsel %vm186_vm5, %v3014_v37, %v3016_v53  ;;  %v1236_v6 = vsel %vm186_vm5, %v3016_v53, %v3010_v9  ;;  %v1243_v9 = vmul.f32 %v1239_v43, %v1234_v60 }
 0x35a   :  { %v1244_v53 = vmul.f32 %v1240_v51, %v1233_v54  ;;  %v1245_v57 = vmul.f32 %v1241_v19, %v1236_v6 }
 0x35b   :  { %v1247_v3 = vadd.f32 %v1243_v9, %v1222_v47 }
 0x35c   :  { %v3018_v26 = vpop.permute.xlu0 %1252  ;;  %v1248_v41 = vadd.f32 %v1244_v53, %v1223_v62  ;;  %v1249_v28 = vadd.f32 %v1245_v57, %v1224_v61  ;;  %v1316_v61 = vld [vmem:[#allocation5 + $0x478] sm:$0xff] }
 0x35d   :  { %v1260_v2 = vsel %vm212_vm4, %v3012_v20, %v3018_v26 }
 0x35e   :  { %v1267_v5 = vmul.f32 %v1263_v38, %v1260_v2  ;;  %v1266_v2 = vld [vmem:[#allocation5 + $0x438] sm:$0xff] }
 0x35f   :  { %v1270_v19 = vmul.f32 %v1266_v2, %v1261_v31 }
 0x360   :  { %v3029_v39 = vpop.permute.xlu1 %1254  ;;  %v1271_v40 = vadd.f32 %v1267_v5, %v1246_v1  ;;  %v1303_v13 = vpop.permute.xlu2 %1302 }
 0x361   :  { %v1259_v45 = vsel %vm212_vm4, %v3018_v26, %v3029_v39  ;;  %v1258_v37 = vsel %vm212_vm4, %v3029_v39, %v3022_v46 }
 0x362   :  { %v1268_v22 = vmul.f32 %v1264_v27, %v1259_v45  ;;  %v1269_v56 = vmul.f32 %v1265_v14, %v1258_v37  ;;  %v1315_v37 = vld [vmem:[#allocation5 + $0x470] sm:$0xff] }
 0x364   :  { %v3044_v33 = vpop.permute.xlu0 %1275  ;;  %v1272_v20 = vadd.f32 %v1268_v22, %v1247_v3  ;;  %v1273_v46 = vadd.f32 %v1269_v56, %v1248_v41 }
 0x368   :  { %v1278_v7 = vpop.permute.xlu1 %1277 }
 0x369   :  { %v1285_v25 = vsel %vm238_vm6, %v3044_v33, %v1278_v7  ;;  %v1284_v32 = vsel %vm238_vm6, %v1278_v7, %v1280_v29 }
 0x36a   :  { %v1292_v59 = vmul.f32 %v1288_v52, %v1285_v25  ;;  %v1293_v25 = vmul.f32 %v1289_v17, %v1284_v32 }
 0x36c   :  { %v1282_v21 = vpop.permute.xlu0 %1281  ;;  %v1296_v48 = vadd.f32 %v1292_v59, %v1271_v40  ;;  %v1297_v45 = vadd.f32 %v1293_v25, %v1272_v20 }
 0x36d   :  { %v1283_v39 = vsel %vm238_vm6, %v1280_v29, %v1282_v21  ;;  %v1286_v50 = vsel %vm238_vm6, %v1282_v21, %v3044_v33  ;;  %v1314_v29 = vld [vmem:[#allocation5 + $0x468] sm:$0xff]  ;;  %v1274_v21 = vadd.f32 %v1270_v19, %v1249_v28 }
 0x36e   :  { %v1294_v43 = vmul.f32 %v1290_v49, %v1283_v39  ;;  %v1295_v54 = vmul.f32 %v1291_v42, %v1286_v50 }
 0x370   :  { %v1301_v26 = vpop.permute.xlu1 %1300  ;;  %v1298_v24 = vadd.f32 %v1294_v43, %v1273_v46  ;;  %v1299_v47 = vadd.f32 %v1295_v54, %v1274_v21 }
 0x371   :  { %v1310_v38 = vsel %vm264_vm7, %v1301_v26, %v1303_v13 }
 0x372   :  { %v1317_v7 = vmul.f32 %v1313_v55, %v1310_v38 }
 0x374   :  { %v1305_v52 = vpop.permute.xlu0 %1304  ;;  %v1321_v60 = vadd.f32 %v1317_v7, %v1296_v48 }
 0x375   :  { %v1309_v51 = vsel %vm264_vm7, %v1303_v13, %v1305_v52 }
 0x376   :  { %v1332_v6 = vperm.slane %v1321_v60, 0  ;;  %v1348_v5 = vperm.slane %v1321_v60, 1  ;;  %v1364_v30 = vperm.slane %v1321_v60, 2  ;;  %v1318_v33 = vmul.f32 %v1314_v29, %v1309_v51 }
 0x377   :  { %v1380_v23 = vperm.slane %v1321_v60, 3  ;;  %v1396_v27 = vperm.slane %v1321_v60, 4  ;;  %v1412_v53 = vperm.slane %v1321_v60, 5  ;;  %v1428_v57 = vperm.slane %v1321_v60, 6 }
 0x378   :  { %v1336_v1 = vmul.f32 %v1332_v6, %v2952_v44  ;;  %v1352_v14 = vmul.f32 %v1348_v5, %v2988_v58  ;;  %v1307_v59 = vpop.permute.xlu1 %1306  ;;  %v1368_v9 = vmul.f32 %v1364_v30, %v2984_v18  ;;  %v1322_v62 = vadd.f32 %v1318_v33, %v1297_v45 }
 0x379   :  { %v1308_v40 = vsel %vm264_vm7, %v1305_v52, %v1307_v59  ;;  %v1311_v22 = vsel %vm264_vm7, %v1307_v59, %v1301_v26  ;;  %v1384_v13 = vmul.f32 %v1380_v23, %v2962_v0  ;;  %v1400_v56 = vmul.f32 %v1396_v27, %v2986_v36 }
 0x37a   :  { %v1356_v55 = vadd.f32 %v1352_v14, %v1336_v1  ;;  %v1444_v17 = vperm.slane %v1321_v60, 7  ;;  %v1319_v32 = vmul.f32 %v1315_v37, %v1308_v40  ;;  %v1333_v39 = vperm.slane %v1322_v62, 0 }
 0x37b   :  { %v1349_v38 = vperm.slane %v1322_v62, 1  ;;  %v1365_v2 = vperm.slane %v1322_v62, 2  ;;  %v1381_v31 = vperm.slane %v1322_v62, 3  ;;  %v1397_v48 = vperm.slane %v1322_v62, 4 }
 0x37c   :  { %v1372_v49 = vadd.f32 %v1368_v9, %v1356_v55  ;;  %v1413_v42 = vperm.slane %v1322_v62, 5  ;;  %v1320_v50 = vmul.f32 %v1316_v61, %v1311_v22  ;;  %v1337_v3 = vmul.f32 %v1333_v39, %v2952_v44 }
 0x37d   :  { %v1353_v41 = vmul.f32 %v1349_v38, %v2988_v58  ;;  %v1429_v26 = vperm.slane %v1322_v62, 6  ;;  %v1416_v28 = vmul.f32 %v1412_v53, %v2970_v16  ;;  %v1432_v29 = vmul.f32 %v1428_v57, %v2992_v63 }
 0x37e   :  { %v1388_v7 = vadd.f32 %v1384_v13, %v1372_v49  ;;  %v1448_v52 = vmul.f32 %v1444_v17, %v2990_v4  ;;  %v1369_v25 = vmul.f32 %v1365_v2, %v2984_v18  ;;  %v1385_v51 = vmul.f32 %v1381_v31, %v2962_v0 }
 0x37f   :  { %v1357_v60 = vadd.f32 %v1353_v41, %v1337_v3  ;;  %v3130_v19 = vadd.f32 %v1319_v32, %v1298_v24  ;;  %v1401_v20 = vmul.f32 %v1397_v48, %v2986_v36  ;;  %v1417_v46 = vmul.f32 %v1413_v42, %v2970_v16 }
 0x380   :  { %v1404_v43 = vadd.f32 %v1400_v56, %v1388_v7  ;;  %v1445_v54 = vperm.slane %v1322_v62, 7  ;;  %v1324_v6 = vadd.f32 %v1320_v50, %v1299_v47  ;;  %v1433_v33 = vmul.f32 %v1429_v26, %v2992_v63 }
 0x381   :  { %v1373_v30 = vadd.f32 %v1369_v25, %v1357_v60  ;;  %v1334_v21 = vperm.slane %v3130_v19, 0  ;;  %v1350_v27 = vperm.slane %v3130_v19, 1  ;;  %v1366_v1 = vperm.slane %v3130_v19, 2 }
 0x382   :  { %v1420_v5 = vadd.f32 %v1416_v28, %v1404_v43  ;;  %v1335_v23 = vperm.slane %v1324_v6, 0  ;;  %v1351_v45 = vperm.slane %v1324_v6, 1  ;;  %v1367_v59 = vperm.slane %v1324_v6, 2 }
 0x383   :  { %v1389_v14 = vadd.f32 %v1385_v51, %v1373_v30  ;;  %v1338_v37 = vmul.f32 %v1334_v21, %v2952_v44  ;;  %v1449_v9 = vmul.f32 %v1445_v54, %v2990_v4  ;;  %v1354_v53 = vmul.f32 %v1350_v27, %v2988_v58 }
 0x384   :  { %v1436_v24 = vadd.f32 %v1432_v29, %v1420_v5  ;;  %v1339_v47 = vmul.f32 %v1335_v23, %v2952_v44  ;;  %v1355_v57 = vmul.f32 %v1351_v45, %v2988_v58  ;;  %v1370_v62 = vmul.f32 %v1366_v1, %v2984_v18 }
 0x385   :  { %v1405_v55 = vadd.f32 %v1401_v20, %v1389_v14  ;;  %v1371_v61 = vmul.f32 %v1367_v59, %v2984_v18  ;;  %v1382_v40 = vperm.slane %v3130_v19, 3  ;;  %v1358_v22 = vadd.f32 %v1354_v53, %v1338_v37  ;;  %v1465_v14 = vld [vmem:[#allocation5 + $0x500] sm:$0xff] }
 0x386   :  { %v1359_v13 = vadd.f32 %v1355_v57, %v1339_v47  ;;  %v1383_v56 = vperm.slane %v1324_v6, 3  ;;  %v1398_v17 = vperm.slane %v3130_v19, 4  ;;  %v1452_v32 = vadd.f32 %v1448_v52, %v1436_v24  ;;  %v1511_v59 = vld [vmem:[#allocation5 + $0x4a0] sm:$0xff] }
 0x387   :  { %v1421_v49 = vadd.f32 %v1417_v46, %v1405_v55  ;;  %v1399_v39 = vperm.slane %v1324_v6, 4  ;;  %v1414_v44 = vperm.slane %v3130_v19, 5  ;;  %v1374_v38 = vadd.f32 %v1370_v62, %v1358_v22  ;;  %v1489_v55 = vld [vmem:[#allocation5 + $0x498] sm:$0xff] }
 0x388   :  { %v1375_v2 = vadd.f32 %v1371_v61, %v1359_v13  ;;  %v1386_v58 = vmul.f32 %v1382_v40, %v2962_v0  ;;  %v1387_v31 = vmul.f32 %v1383_v56, %v2962_v0  ;;  %v1402_v18 = vmul.f32 %v1398_v17, %v2986_v36  ;;  %v1466_v40 = vld [vmem:[#allocation5 + $0x508] sm:$0xff]  ;;  %v1468_v17 = vld [vmem:[#allocation5 + $0x518] sm:$0xff] }
 0x389   :  { %v1437_v48 = vadd.f32 %v1433_v33, %v1421_v49  ;;  %v1403_v42 = vmul.f32 %v1399_v39, %v2986_v36  ;;  %v1415_v50 = vperm.slane %v1324_v6, 5  ;;  %v1430_v41 = vperm.slane %v3130_v19, 6  ;;  %v1512_v49 = vld [vmem:[#allocation5 + $0x4a8] sm:$0xff] }
 0x38a   :  { %v1390_v7 = vadd.f32 %v1386_v58, %v1374_v38  ;;  %v1391_v3 = vadd.f32 %v1387_v31, %v1375_v2  ;;  %v1431_v26 = vperm.slane %v1324_v6, 6  ;;  %v1418_v29 = vmul.f32 %v1414_v44, %v2970_v16  ;;  %v1514_v2 = vld [vmem:[#allocation5 + $0x4b8] sm:$0xff] }
 0x38b   :  { %v1453_v28 = vadd.f32 %v1449_v9, %v1437_v48  ;;  %v1419_v52 = vmul.f32 %v1415_v50, %v2970_v16  ;;  %v1446_v0 = vperm.slane %v3130_v19, 7  ;;  %v1447_v60 = vperm.slane %v1324_v6, 7 }
 0x38c   :  { %v1406_v25 = vadd.f32 %v1402_v18, %v1390_v7  ;;  %v1407_v43 = vadd.f32 %v1403_v42, %v1391_v3  ;;  %v3157_v51 = vadd.f32 %v2982_v34, %v1452_v32  ;;  %v1434_v54 = vmul.f32 %v1430_v41, %v2992_v63 }
 0x38d   :  { %v3160_v36 = vadd.f32 %v2982_v34, %v1453_v28  ;;  %v1435_v5 = vmul.f32 %v1431_v26, %v2992_v63  ;;  %v1450_v6 = vmul.f32 %v1446_v0, %v2990_v4  ;;  %v1451_v30 = vmul.f32 %v1447_v60, %v2990_v4 }
 0x38e   :  { %v1422_v20 = vadd.f32 %v1418_v29, %v1406_v25  ;;  %v1423_v46 = vadd.f32 %v1419_v52, %v1407_v43  ;;  %1473 = vrot.lane.b32.xlu1 %v3157_v51, %s2014_s0  ;;  %v3431_v45 = vmov 7   ;;  %v1469_v53 = vmul.f32 %v1465_v14, %v3157_v51  ;;  %v1467_v14 = vld [vmem:[#allocation5 + $0x510] sm:$0xff] }
 0x38f   :  { %1475 = vrot.lane.b32.xlu2 %v3160_v36, %s2014_s0  ;;  %v1470_v44 = vmul.f32 %v1466_v40, %v3160_v36 }
 0x390   :  { %v1438_v16 = vadd.f32 %v1434_v54, %v1422_v20  ;;  %v1439_v19 = vadd.f32 %v1435_v5, %v1423_v46 }
 0x392   :  { %v1454_v33 = vadd.f32 %v1450_v6, %v1438_v16  ;;  %v1455_v21 = vadd.f32 %v1451_v30, %v1439_v19  ;;  %v1539_v19 = vld [vmem:[#allocation5 + $0x4d8] sm:$0xff] }
 0x394   :  { %v3171_v23 = vadd.f32 %v2982_v34, %v1454_v33  ;;  %v3174_v27 = vadd.f32 %v2982_v34, %v1455_v21  ;;  %v1674_v34 = vld [vmem:[#allocation7 + $0x20] sm:$0xff]  ;;  %v1488_v21 = vld [vmem:[#allocation5 + $0x490] sm:$0xff] }
 0x396   :  { %1477 = vrot.lane.b32.xlu0 %v3171_v23, %s2014_s0  ;;  %1479 = vrot.lane.b32.xlu1 %v3174_v27, %s2014_s0  ;;  %v1472_v58 = vmul.f32 %v1468_v17, %v3174_v27  ;;  %v1614_v17 = vld [vmem:[#allocation5 + $0x558] sm:$0xff] }
 0x397   :  { %1498 = vrot.lane.b32.xlu2 %v3157_v51, %s2015_s2 }
 0x39e   :  { %1500 = vrot.lane.b32.xlu0 %v3160_v36, %s2015_s2  ;;  %1502 = vrot.lane.b32.xlu1 %v3171_v23, %s2015_s2 }
 0x39f   :  { %1504 = vrot.lane.b32.xlu2 %v3174_v27, %s2015_s2 }
 0x3a6   :  { %1523 = vrot.lane.b32.xlu0 %v3157_v51, %s2016_s30  ;;  %1525 = vrot.lane.b32.xlu1 %v3160_v36, %s2016_s30 }
 0x3a7   :  { %1527 = vrot.lane.b32.xlu2 %v3171_v23, %s2016_s30 }
 0x3ae   :  { %1529 = vrot.lane.b32.xlu0 %v3174_v27, %s2016_s30  ;;  %1548 = vrot.lane.b32.xlu1 %v3157_v51, %s2017_s4 }
 0x3af   :  { %1550 = vrot.lane.b32.xlu2 %v3160_v36, %s2017_s4 }
 0x3b6   :  { %1552 = vrot.lane.b32.xlu0 %v3171_v23, %s2017_s4  ;;  %1554 = vrot.lane.b32.xlu1 %v3174_v27, %s2017_s4 }
 0x3b7   :  { %1573 = vrot.lane.b32.xlu2 %v3157_v51, %s2018_s5 }
 0x3be   :  { %1575 = vrot.lane.b32.xlu0 %v3160_v36, %s2018_s5  ;;  %1577 = vrot.lane.b32.xlu1 %v3171_v23, %s2018_s5 }
 0x3bf   :  { %1579 = vrot.lane.b32.xlu2 %v3174_v27, %s2018_s5 }
 0x3c6   :  { %1598 = vrot.lane.b32.xlu0 %v3157_v51, %s2019_s6  ;;  %1600 = vrot.lane.b32.xlu1 %v3160_v36, %s2019_s6 }
 0x3c7   :  { %1602 = vrot.lane.b32.xlu2 %v3171_v23, %s2019_s6 }
 0x3ce   :  { %1604 = vrot.lane.b32.xlu0 %v3174_v27, %s2019_s6  ;;  %1623 = vrot.lane.b32.xlu1 %v3157_v51, %s2023_s7 }
 0x3cf   :  { %1625 = vrot.lane.b32.xlu2 %v3160_v36, %s2023_s7 }
 0x3d6   :  { %1627 = vrot.lane.b32.xlu0 %v3171_v23, %s2023_s7  ;;  %1629 = vrot.lane.b32.xlu1 %v3174_v27, %s2023_s7 }
 0x3d7   :  { %1648 = vrot.lane.b32.xlu2 %v3157_v51, %s2024_s8 }
 0x3de   :  { %1650 = vrot.lane.b32.xlu0 %v3160_v36, %s2024_s8  ;;  %1693 = vperm.xlu1 %1896, %v1674_v34  }
 0x3df   :  { %1654 = vrot.lane.b32.xlu2 %v3174_v27, %s2024_s8 }
 0x3e6   :  { %1677 = vperm.xlu0 %1895, %v1674_v34   ;;  %1652 = vrot.lane.b32.xlu1 %v3171_v23, %s2024_s8 }
 0x3e7   :  { %1709 = vperm.xlu2 %1897, %v1674_v34   ;;  %1898 = vset.pattern.permute.xlu1 %v2025_v8 }
 0x3e9   :  { %v3237_v4 = vpop.permute.xlu2 %1475 }
 0x3ee   :  { %1900 = vset.pattern.permute.xlu0 %v2028_v12  ;;  %1725 = vperm.xlu1 %1898, %v1674_v34  }
 0x3ef   :  { %1757 = vperm.xlu0 %1900, %v1674_v34   ;;  %1899 = vset.pattern.permute.xlu2 %v2026_v10 }
 0x3f0   :  { %1741 = vperm.xlu2 %1899, %v1674_v34  }
 0x3f1   :  { %v1499_v63 = vpop.permute.xlu2 %1498 }
 0x3f6   :  { %1901 = vset.pattern.permute.xlu1 %v2027_v11  ;;  %v1486_v11 = vld [vmem:[#allocation5 + $0x480] sm:$0xff] }
 0x3f7   :  { %1904 = vset.pattern.permute.xlu0 %v2030_v15  ;;  %1773 = vperm.xlu1 %1901, %v1674_v34  }
 0x3f8   :  { %1902 = vset.pattern.permute.xlu2 %v3431_v45 }
 0x3f9   :  { %v1505_v1 = vpop.permute.xlu2 %1504  ;;  %1789 = vperm.xlu2 %1902, %v1674_v34  }
 0x3fa   :  { %v1509_v9 = vsel %vm108_vm1, %v1505_v1, %v1499_v63 }
 0x3fb   :  { %v1515_v61 = vmul.f32 %v1511_v59, %v1509_v9 }
 0x3ff   :  { %1903 = vset.pattern.permute.xlu1 %v2030_v15  ;;  %v1487_v15 = vld [vmem:[#allocation5 + $0x488] sm:$0xff] }
 0x400   :  { %1805 = vperm.xlu1 %1903, %v1674_v34   ;;  %v1474_v8 = vpop.permute.xlu1 %1473  ;;  %v1564_v34 = vld [vmem:[#allocation5 + $0x4f8] sm:$0xff] }
 0x401   :  { %v1483_v12 = vsel %vm83_vm0, %v1474_v8, %v3237_v4  ;;  %v3248_v10 = vpop.permute.xlu2 %1527 }
 0x402   :  { %v1491_v56 = vmul.f32 %v1487_v15, %v1483_v12  ;;  %v1471_v15 = vmul.f32 %v1467_v14, %v3171_v23  ;;  %v1588_v14 = vld [vmem:[#allocation5 + $0x530] sm:$0xff] }
 0x404   :  { %v1495_v18 = vadd.f32 %v1491_v56, %v1470_v44  ;;  %v1538_v44 = vld [vmem:[#allocation5 + $0x4d0] sm:$0xff] }
 0x408   :  { %v1478_v24 = vpop.permute.xlu0 %1477  ;;  %v1480_v37 = vpop.permute.xlu1 %1479 }
 0x409   :  { %v1484_v47 = vsel %vm83_vm0, %v1480_v37, %v1474_v8  ;;  %v1481_v62 = vsel %vm83_vm0, %v1478_v24, %v1480_v37  ;;  %v3257_v13 = vpop.permute.xlu2 %1550  ;;  %v1482_v27 = vsel %vm83_vm0, %v3237_v4, %v1478_v24  ;;  %v1561_v37 = vld [vmem:[#allocation5 + $0x4e0] sm:$0xff] }
 0x40a   :  { %v1490_v57 = vmul.f32 %v1486_v11, %v1484_v47  ;;  %v1493_v32 = vmul.f32 %v1489_v55, %v1481_v62  ;;  %v1492_v11 = vmul.f32 %v1488_v21, %v1482_v27  ;;  %v1513_v47 = vld [vmem:[#allocation5 + $0x4b0] sm:$0xff]  ;;  %v1589_v55 = vld [vmem:[#allocation5 + $0x538] sm:$0xff]  ;;  %v1587_v27 = vld [vmem:[#allocation5 + $0x528] sm:$0xff] }
 0x40b   :  { %v1563_v21 = vld [vmem:[#allocation5 + $0x4f0] sm:$0xff] }
 0x40c   :  { %v1494_v22 = vadd.f32 %v1490_v57, %v1469_v53  ;;  %v1497_v7 = vadd.f32 %v1493_v32, %v1472_v58  ;;  %v1537_v53 = vld [vmem:[#allocation5 + $0x4c8] sm:$0xff]  ;;  %v1496_v32 = vadd.f32 %v1492_v11, %v1471_v15 }
 0x40e   :  { %v3259_v39 = vadd.f32 %v1515_v61, %v1494_v22  ;;  %v1586_v22 = vld [vmem:[#allocation5 + $0x520] sm:$0xff] }
 0x410   :  { %v1501_v38 = vpop.permute.xlu0 %1500  ;;  %v1503_v48 = vpop.permute.xlu1 %1502 }
 0x411   :  { %v1508_v31 = vsel %vm108_vm1, %v1499_v63, %v1501_v38  ;;  %v1506_v50 = vsel %vm108_vm1, %v1503_v48, %v1505_v1  ;;  %v1574_v28 = vpop.permute.xlu2 %1573  ;;  %v1536_v1 = vld [vmem:[#allocation5 + $0x4c0] sm:$0xff]  ;;  %v1507_v4 = vsel %vm108_vm1, %v1501_v38, %v1503_v48 }
 0x412   :  { %v1516_v42 = vmul.f32 %v1512_v49, %v1508_v31  ;;  %v1518_v3 = vmul.f32 %v1514_v2, %v1506_v50  ;;  %v1517_v49 = vmul.f32 %v1513_v47, %v1507_v4  ;;  %v1612_v47 = vld [vmem:[#allocation5 + $0x548] sm:$0xff]  ;;  %v1664_v4 = vld [vmem:[#allocation5 + $0x598] sm:$0xff] }
 0x414   :  { %v3267_v41 = vadd.f32 %v1516_v42, %v1495_v18  ;;  %v1522_v26 = vadd.f32 %v1518_v3, %v1497_v7  ;;  %v1611_v42 = vld [vmem:[#allocation5 + $0x540] sm:$0xff]  ;;  %v1639_v3 = vld [vmem:[#allocation5 + $0x578] sm:$0xff] }
 0x418   :  { %v1524_v29 = vpop.permute.xlu0 %1523  ;;  %v1526_v52 = vpop.permute.xlu1 %1525 }
 0x419   :  { %v3269_v43 = vpop.permute.xlu2 %1579  ;;  %v1533_v57 = vsel %vm134_vm2, %v1524_v29, %v1526_v52  ;;  %v1532_v38 = vsel %vm134_vm2, %v1526_v52, %v3248_v10 }
 0x41a   :  { %v1584_v62 = vsel %vm186_vm5, %v3269_v43, %v1574_v28  ;;  %v1541_v31 = vmul.f32 %v1537_v53, %v1533_v57 }
 0x41b   :  { %v1593_v48 = vmul.f32 %v1589_v55, %v1584_v62 }
 0x420   :  { %v1530_v25 = vpop.permute.xlu0 %1529  ;;  %v1549_v0 = vpop.permute.xlu1 %1548 }
 0x421   :  { %v3271_v36 = vpop.permute.xlu2 %1602  ;;  %v1531_v6 = vsel %vm134_vm2, %v3248_v10, %v1530_v25  ;;  %v1534_v8 = vsel %vm134_vm2, %v1530_v25, %v1524_v29  ;;  %v1558_v10 = vsel %vm160_vm3, %v1549_v0, %v3257_v13 }
 0x422   :  { %v1543_v12 = vmul.f32 %v1539_v19, %v1531_v6  ;;  %v1540_v24 = vmul.f32 %v1536_v1, %v1534_v8  ;;  %v1636_v19 = vld [vmem:[#allocation5 + $0x560] sm:$0xff]  ;;  %v1521_v8 = vadd.f32 %v1517_v49, %v1496_v32 }
 0x424   :  { %v1547_v61 = vadd.f32 %v1543_v12, %v1522_v26  ;;  %v1544_v18 = vadd.f32 %v1540_v24, %v3259_v39  ;;  %v1542_v39 = vmul.f32 %v1538_v44, %v1532_v38  ;;  %v1545_v12 = vadd.f32 %v1541_v31, %v3267_v41  ;;  %v1661_v24 = vld [vmem:[#allocation5 + $0x580] sm:$0xff]  ;;  %v1638_v31 = vld [vmem:[#allocation5 + $0x570] sm:$0xff] }
 0x426   :  { %v1546_v15 = vadd.f32 %v1542_v39, %v1521_v8 }
 0x428   :  { %v1553_v60 = vpop.permute.xlu0 %1552  ;;  %v1555_v51 = vpop.permute.xlu1 %1554 }
 0x429   :  { %v3277_v54 = vpop.permute.xlu2 %1625  ;;  %v1556_v63 = vsel %vm160_vm3, %v1553_v60, %v1555_v51  ;;  %v1559_v59 = vsel %vm160_vm3, %v1555_v51, %v1549_v0  ;;  %v1557_v51 = vsel %vm160_vm3, %v3257_v13, %v1553_v60 }
 0x42a   :  { %v1568_v9 = vmul.f32 %v1564_v34, %v1556_v63  ;;  %v1565_v40 = vmul.f32 %v1561_v37, %v1559_v59  ;;  %v1567_v59 = vmul.f32 %v1563_v21, %v1557_v51  ;;  %v1663_v51 = vld [vmem:[#allocation5 + $0x590] sm:$0xff] }
 0x42c   :  { %v1572_v2 = vadd.f32 %v1568_v9, %v1547_v61  ;;  %v1571_v49 = vadd.f32 %v1567_v59, %v1546_v15 }
 0x42e   :  { %v1597_v63 = vadd.f32 %v1593_v48, %v1572_v2 }
 0x430   :  { %v3273_v20 = vpop.permute.xlu0 %1575  ;;  %v3275_v46 = vpop.permute.xlu1 %1577 }
 0x431   :  { %v3284_v30 = vpop.permute.xlu2 %1648  ;;  %v1583_v56 = vsel %vm186_vm5, %v1574_v28, %v3273_v20  ;;  %v1562_v28 = vld [vmem:[#allocation5 + $0x4e8] sm:$0xff]  ;;  %v1582_v0 = vsel %vm186_vm5, %v3273_v20, %v3275_v46 }
 0x432   :  { %v1590_v29 = vmul.f32 %v1586_v22, %v1583_v56  ;;  %v1566_v13 = vmul.f32 %v1562_v28, %v1558_v10  ;;  %v1591_v9 = vmul.f32 %v1587_v27, %v1582_v0 }
 0x434   :  { %v1570_v62 = vadd.f32 %v1566_v13, %v1545_v12 }
 0x436   :  { %v1595_v44 = vadd.f32 %v1591_v9, %v1570_v62 }
 0x438   :  { %v1599_v5 = vpop.permute.xlu0 %1598  ;;  %v3279_v16 = vpop.permute.xlu1 %1600 }
 0x439   :  { %v1608_v50 = vsel %vm212_vm4, %v1599_v5, %v3279_v16  ;;  %v3320_v7 = vpop.permute.xlu2 %1654  ;;  %v1607_v20 = vsel %vm212_vm4, %v3279_v16, %v3271_v36 }
 0x43a   :  { %v1615_v34 = vmul.f32 %v1611_v42, %v1608_v50  ;;  %v1659_v41 = vsel %vm264_vm7, %v3320_v7, %v3284_v30 }
 0x440   :  { %v3286_v33 = vpop.permute.xlu0 %1604  ;;  %v1624_v45 = vpop.permute.xlu1 %1623 }
 0x441   :  { %v1609_v23 = vsel %vm212_vm4, %v3286_v33, %v1599_v5  ;;  %v1569_v5 = vadd.f32 %v1565_v40, %v1544_v18  ;;  %v1633_v6 = vsel %vm238_vm6, %v1624_v45, %v3277_v54  ;;  %v3354_v16 = vpop.permute.xlu2 %1709  ;;  %v1637_v40 = vld [vmem:[#allocation5 + $0x568] sm:$0xff] }
 0x442   :  { %v1618_v52 = vmul.f32 %v1614_v17, %v1609_v23  ;;  %v1640_v37 = vmul.f32 %v1636_v19, %v1633_v6  ;;  %v1616_v23 = vmul.f32 %v1612_v47, %v1607_v20 }
 0x443   :  { %v1594_v60 = vadd.f32 %v1590_v29, %v1569_v5 }
 0x444   :  { %v1622_v11 = vadd.f32 %v1618_v52, %v1597_v63  ;;  %v1620_v42 = vadd.f32 %v1616_v23, %v1595_v44 }
 0x445   :  { %v1619_v53 = vadd.f32 %v1615_v34, %v1594_v60 }
 0x448   :  { %v3314_v58 = vpop.permute.xlu0 %1627  ;;  %v1630_v26 = vpop.permute.xlu1 %1629 }
 0x449   :  { %v1634_v25 = vsel %vm238_vm6, %v1630_v26, %v1624_v45  ;;  %v1581_v45 = vsel %vm186_vm5, %v3275_v46, %v3269_v43  ;;  %v1613_v43 = vld [vmem:[#allocation5 + $0x550] sm:$0xff]  ;;  %v1606_v46 = vsel %vm212_vm4, %v3271_v36, %v3286_v33  ;;  %v1632_v22 = vsel %vm238_vm6, %v3277_v54, %v3314_v58 }
 0x44a   :  { %v1643_v1 = vmul.f32 %v1639_v3, %v1634_v25  ;;  %v1592_v61 = vmul.f32 %v1588_v14, %v1581_v45  ;;  %v1668_v36 = vmul.f32 %v1664_v4, %v1659_v41  ;;  %v1644_v33 = vadd.f32 %v1640_v37, %v1619_v53  ;;  %v1742_v12 = vpop.permute.xlu2 %1741 }
 0x44b   :  { %v1617_v38 = vmul.f32 %v1613_v43, %v1606_v46  ;;  %v1641_v2 = vmul.f32 %v1637_v40, %v1632_v22  ;;  %v1631_v48 = vsel %vm238_vm6, %v3314_v58, %v1630_v26  ;;  %v1662_v26 = vld [vmem:[#allocation5 + $0x588] sm:$0xff] }
 0x44c   :  { %v1647_v57 = vadd.f32 %v1643_v1, %v1622_v11  ;;  %v1642_v10 = vmul.f32 %v1638_v31, %v1631_v48 }
 0x44d   :  { %v1645_v29 = vadd.f32 %v1641_v2, %v1620_v42 }
 0x44e   :  { %v3368_v54 = vadd.f32 %v1668_v36, %v1647_v57 }
 0x450   :  { %v1651_v55 = vpop.permute.xlu0 %1650  ;;  %v3363_v17 = vpop.permute.xlu1 %1693  ;;  %v1747_v52 = vperm.slane %v3368_v54, 4  ;;  %v1699_v25 = vperm.slane %v3368_v54, 1  ;;  %v1683_v58 = vperm.slane %v3368_v54, 0  ;;  %v1715_v6 = vperm.slane %v3368_v54, 2 }
 0x451   :  { %v1658_v56 = vsel %vm264_vm7, %v3284_v30, %v1651_v55  ;;  %v1596_v30 = vadd.f32 %v1592_v61, %v1571_v49  ;;  %v1731_v14 = vperm.slane %v3368_v54, 3  ;;  %v1763_v37 = vperm.slane %v3368_v54, 5 }
 0x452   :  { %v1665_v32 = vmul.f32 %v1661_v24, %v1658_v56  ;;  %v1751_v45 = vmul.f32 %v1747_v52, %v1742_v12  ;;  %v1703_v11 = vmul.f32 %v1699_v25, %v3363_v17  ;;  %v1779_v59 = vperm.slane %v3368_v54, 6 }
 0x453   :  { %v1621_v28 = vadd.f32 %v1617_v38, %v1596_v30  ;;  %v1719_v35 = vmul.f32 %v1715_v6, %v3354_v16 }
 0x454   :  { %v3370_v18 = vadd.f32 %v1665_v32, %v1644_v33 }
 0x455   :  { %v1646_v8 = vadd.f32 %v1642_v10, %v1621_v28 }
 0x456   :  { %v1696_v50 = vperm.slane %v3370_v18, 1  ;;  %v1680_v3 = vperm.slane %v3370_v18, 0  ;;  %v1712_v21 = vperm.slane %v3370_v18, 2  ;;  %v1744_v27 = vperm.slane %v3370_v18, 4 }
 0x458   :  { %v1678_v39 = vpop.permute.xlu0 %1677  ;;  %v1700_v5 = vmul.f32 %v1696_v50, %v3363_v17  ;;  %v1653_v19 = vpop.permute.xlu1 %1652  ;;  %v1716_v41 = vmul.f32 %v1712_v21, %v3354_v16  ;;  %v1748_v24 = vmul.f32 %v1744_v27, %v1742_v12 }
 0x459   :  { %v1684_v0 = vmul.f32 %v1680_v3, %v1678_v39  ;;  %v1687_v34 = vmul.f32 %v1683_v58, %v1678_v39  ;;  %v1656_v63 = vsel %vm264_vm7, %v1653_v19, %v3320_v7  ;;  %v1657_v1 = vsel %vm264_vm7, %v1651_v55, %v1653_v19 }
 0x45a   :  { %v1666_v13 = vmul.f32 %v1662_v26, %v1657_v1  ;;  %v1667_v60 = vmul.f32 %v1663_v51, %v1656_v63  ;;  %v1728_v7 = vperm.slane %v3370_v18, 3 }
 0x45b   :  { %v1704_v20 = vadd.f32 %v1700_v5, %v1684_v0  ;;  %v1707_v4 = vadd.f32 %v1703_v11, %v1687_v34  ;;  %v1776_v0 = vperm.slane %v3370_v18, 6 }
 0x45c   :  { %v3390_v9 = vadd.f32 %v1666_v13, %v1645_v29  ;;  %v3392_v47 = vadd.f32 %v1667_v60, %v1646_v8  ;;  %v1792_v13 = vperm.slane %v3370_v18, 7 }
 0x45d   :  { %v1723_v32 = vadd.f32 %v1719_v35, %v1707_v4  ;;  %v1720_v49 = vadd.f32 %v1716_v41, %v1704_v20 }
 0x45e   :  { %v1681_v15 = vperm.slane %v3390_v9, 0  ;;  %v1682_v53 = vperm.slane %v3392_v47, 0  ;;  %v1697_v43 = vperm.slane %v3390_v9, 1  ;;  %v1698_v46 = vperm.slane %v3392_v47, 1 }
 0x45f   :  { %v1713_v57 = vperm.slane %v3390_v9, 2  ;;  %v1714_v55 = vperm.slane %v3392_v47, 2  ;;  %v1729_v62 = vperm.slane %v3390_v9, 3  ;;  %v1730_v61 = vperm.slane %v3392_v47, 3 }
 0x460   :  { %v1685_v40 = vmul.f32 %v1681_v15, %v1678_v39  ;;  %v1686_v22 = vmul.f32 %v1682_v53, %v1678_v39  ;;  %v1701_v56 = vmul.f32 %v1697_v43, %v3363_v17  ;;  %v1702_v23 = vmul.f32 %v1698_v46, %v3363_v17  ;;  %v1726_v36 = vpop.permute.xlu1 %1725  ;;  %v1790_v43 = vpop.permute.xlu2 %1789 }
 0x461   :  { %v1717_v33 = vmul.f32 %v1713_v57, %v3354_v16  ;;  %v1732_v44 = vmul.f32 %v1728_v7, %v1726_v36  ;;  %v1718_v31 = vmul.f32 %v1714_v55, %v3354_v16  ;;  %v1735_v48 = vmul.f32 %v1731_v14, %v1726_v36  ;;  %v1758_v52 = vpop.permute.xlu0 %1757 }
 0x462   :  { %v1705_v38 = vadd.f32 %v1701_v56, %v1685_v40  ;;  %v1706_v2 = vadd.f32 %v1702_v23, %v1686_v22  ;;  %v1733_v30 = vmul.f32 %v1729_v62, %v1726_v36  ;;  %v1745_v50 = vperm.slane %v3390_v9, 4 }
 0x463   :  { %v1736_v42 = vadd.f32 %v1732_v44, %v1720_v49  ;;  %v1746_v3 = vperm.slane %v3392_v47, 4  ;;  %v1734_v17 = vmul.f32 %v1730_v61, %v1726_v36  ;;  %v1739_v29 = vadd.f32 %v1735_v48, %v1723_v32 }
 0x464   :  { %v1721_v28 = vadd.f32 %v1717_v33, %v1705_v38  ;;  %v1722_v10 = vadd.f32 %v1718_v31, %v1706_v2  ;;  %v1760_v39 = vperm.slane %v3370_v18, 5  ;;  %v1761_v58 = vperm.slane %v3390_v9, 5 }
 0x465   :  { %v1752_v25 = vadd.f32 %v1748_v24, %v1736_v42  ;;  %v1762_v26 = vperm.slane %v3392_v47, 5  ;;  %v1749_v5 = vmul.f32 %v1745_v50, %v1742_v12  ;;  %v1750_v19 = vmul.f32 %v1746_v3, %v1742_v12 }
 0x466   :  { %v1737_v16 = vadd.f32 %v1733_v30, %v1721_v28  ;;  %v1738_v51 = vadd.f32 %v1734_v17, %v1722_v10  ;;  %v1755_v6 = vadd.f32 %v1751_v45, %v1739_v29  ;;  %v1764_v21 = vmul.f32 %v1760_v39, %v1758_v52 }
 0x467   :  { %v1765_v27 = vmul.f32 %v1761_v58, %v1758_v52  ;;  %v1766_v1 = vmul.f32 %v1762_v26, %v1758_v52  ;;  %v1777_v8 = vperm.slane %v3390_v9, 6  ;;  %v1767_v60 = vmul.f32 %v1763_v37, %v1758_v52 }
 0x468   :  { %v1753_v34 = vadd.f32 %v1749_v5, %v1737_v16  ;;  %v1754_v63 = vadd.f32 %v1750_v19, %v1738_v51  ;;  %v1768_v14 = vadd.f32 %v1764_v21, %v1752_v25  ;;  %v1778_v11 = vperm.slane %v3392_v47, 6 }
 0x469   :  { %v1774_v35 = vpop.permute.xlu1 %1773  ;;  %v1793_v24 = vperm.slane %v3390_v9, 7  ;;  %v1794_v15 = vperm.slane %v3392_v47, 7  ;;  %v1771_v53 = vadd.f32 %v1767_v60, %v1755_v6  ;;  %v1795_v57 = vperm.slane %v3368_v54, 7 }
 0x46a   :  { %v1769_v7 = vadd.f32 %v1765_v27, %v1753_v34  ;;  %v1770_v20 = vadd.f32 %v1766_v1, %v1754_v63  ;;  %v1780_v12 = vmul.f32 %v1776_v0, %v1774_v35  ;;  %v1781_v45 = vmul.f32 %v1777_v8, %v1774_v35 }
 0x46b   :  { %v1782_v4 = vmul.f32 %v1778_v11, %v1774_v35  ;;  %v1783_v41 = vmul.f32 %v1779_v59, %v1774_v35  ;;  %v1796_v62 = vmul.f32 %v1792_v13, %v1790_v43  ;;  %v1797_v61 = vmul.f32 %v1793_v24, %v1790_v43 }
 0x46c   :  { %v1785_v18 = vadd.f32 %v1781_v45, %v1769_v7  ;;  %v1784_v46 = vadd.f32 %v1780_v12, %v1768_v14  ;;  %v1798_v40 = vmul.f32 %v1794_v15, %v1790_v43  ;;  %v1799_v22 = vmul.f32 %v1795_v57, %v1790_v43 }
 0x46d   :  { %v1786_v37 = vadd.f32 %v1782_v4, %v1770_v20  ;;  %v1787_v55 = vadd.f32 %v1783_v41, %v1771_v53 }
 0x46e   :  { %v1801_v56 = vadd.f32 %v1797_v61, %v1785_v18  ;;  %v1800_v36 = vadd.f32 %v1796_v62, %v1784_v46 }
 0x46f   :  { %v1802_v23 = vadd.f32 %v1798_v40, %v1786_v37  ;;  %v1803_v59 = vadd.f32 %v1799_v22, %v1787_v55 }
 0x472   :  { %v1806_v33 = vpop.permute.xlu1 %1805 }
 0x473   :  { %v1808_v9 = vadd.f32 %v1806_v33, %v1800_v36  ;;  %v1809_v32 = vadd.f32 %v1806_v33, %v1801_v56  ;;  %v1810_v47 = vadd.f32 %v1806_v33, %v1802_v23  ;;  %v1811_v54 = vadd.f32 %v1806_v33, %v1803_v59 }
 0x475   :  { %1812 = vst [vmem:[#allocation8] sm:$0xff] %v1808_v9 }
 0x476   :  { %1813 = vst [vmem:[#allocation8 + $0x8] sm:$0xff] %v1809_v32 }
 0x477   :  { %1814 = vst [vmem:[#allocation8 + $0x10] sm:$0xff] %v1810_v47 }
 0x478   :  { %1815 = vst [vmem:[#allocation8 + $0x18] sm:$0xff] %v1811_v54 }
 0x479   :  { %1826 = dma.vmem_to_hbm [thread:$0]  %s1822_s10, 512, %s1824_s13, [#allocation4]  }
 0x47a   :  { %2005 = dma.done.wait [#allocation4], 512  }
 0x47b   :  { %2006 = vsyncadd [#allocation4], 4294966784 }
 0x47c   :  { %1831 = vsyncpa [#allocation3], 1 }
 0x47d   :  { %1832 = vsyncpa [#allocation6], 1 }
 0x47e   :  { %1833 = vsyncpa [#allocation4], 1 }

</bundles_post_ra>
